<compile_context>
chip_gen: v5e
topology: v5e:2x2
jax: 0.10.0
libtpu: 0.0.40
codegen_flags: <defaults>
</compile_context>

<pallas_src>
import functools
import math

import jax
import jax.numpy as jnp
from jax.experimental import pallas as pl
from jax.experimental.pallas import tpu as pltpu

LN_EPS = 1e-5
_NEG_INF = -1e30


# ------------------------------ small helpers -------------------------------

def _round_up(n, m):
    return (n + m - 1) // m * m


def _chip_vmem_bytes():
    # 128 MiB VMEM on v5e/v6e, 64 MiB on v7x.  Fall back conservatively.
    try:
        return int(pltpu.get_tpu_info().vmem_capacity_bytes)
    except Exception:  # pragma: no cover - older jax / non-TPU fallback
        return 64 * 1024 * 1024


_VMEM_CAP = _chip_vmem_bytes()
_VMEM_LIMIT = min(96 * 1024 * 1024, _VMEM_CAP * 3 // 4)
TARGET_ROW_TILE = 512 if _VMEM_CAP >= 96 * 1024 * 1024 else 256

_COMPILER_PARAMS = pltpu.CompilerParams(
    dimension_semantics=("parallel",), vmem_limit_bytes=_VMEM_LIMIT)


def _row_tile(M):
    # Sublane-aligned (16 also covers bf16 packing) tile over B*L tokens; at
    # real sizes this gives a multi-step "parallel" grid (sharded across
    # v7x's two TensorCores), a toy M becomes a single tile.
    return min(TARGET_ROW_TILE, _round_up(M, 16))


def _layer_norm(h, g, b, eps):
    mean = jnp.mean(h, axis=-1, keepdims=True)
    var = jnp.mean(jnp.square(h - mean), axis=-1, keepdims=True)  # biased (torch)
    return (h - mean) * jax.lax.rsqrt(var + eps) * g + b


# ----------------------------- Pallas kernels -------------------------------

def _proj_q_kernel(x_ref, w_ref, b_ref, sel_ref, y_ref, qn_ref):
    # y = x @ W + b (W already bf16), emitted in bf16; qn = per-head squared
    # L2 norm of the q columns, reduced on the MXU via a block-diagonal 0/1
    # selector (zero rows for the K/V columns) -> no in-kernel reshape and no
    # re-read of q from HBM in XLA.
    y = jnp.dot(x_ref[...].astype(jnp.bfloat16), w_ref[...],
                preferred_element_type=jnp.float32) + b_ref[...]
    y_ref[...] = y.astype(y_ref.dtype)
    qn_ref[...] = jnp.dot(y * y, sel_ref[...], preferred_element_type=jnp.float32)


def _linear_kernel(x_ref, w_ref, b_ref, o_ref):
    # y = x @ W + b, bf16 output (used for the fused cross-attn K|V projection)
    y = jnp.dot(x_ref[...].astype(jnp.bfloat16), w_ref[...],
                preferred_element_type=jnp.float32) + b_ref[...]
    o_ref[...] = y.astype(o_ref.dtype)


def _linear_add_ln_kernel(x_ref, w_ref, b_ref, res_ref, g_ref, be_ref, o_ref, *, eps):
    # LN(res + x @ W + b)  -- fused out-projection + residual + LayerNorm
    y = jnp.dot(x_ref[...].astype(jnp.bfloat16), w_ref[...],
                preferred_element_type=jnp.float32) + b_ref[...]
    h = y + res_ref[...].astype(jnp.float32)
    o_ref[...] = _layer_norm(h, g_ref[...], be_ref[...], eps).astype(o_ref.dtype)


def _ffn_add_ln_kernel(x_ref, w1_ref, b1_ref, w2_ref, b2_ref, g_ref, be_ref, o_ref,
                       *, eps):
    # LN(x + relu(x @ W1 + b1) @ W2 + b2) -- (tile, d_ff) intermediate stays in VMEM
    x = x_ref[...].astype(jnp.float32)
    h = jnp.dot(x.astype(jnp.bfloat16), w1_ref[...],
                preferred_element_type=jnp.float32) + b1_ref[...]
    h = jnp.maximum(h, 0.0)
    y = jnp.dot(h.astype(jnp.bfloat16), w2_ref[...],
                preferred_element_type=jnp.float32) + b2_ref[...]
    o_ref[...] = _layer_norm(y + x, g_ref[...], be_ref[...], eps).astype(o_ref.dtype)


def _attn_kernel(q_ref, k_ref, v_ref, o_ref, *, scale, valid_u):
    # One grid step = G (batch*head) slices: scores -> masked softmax -> context.
    q = q_ref[...]                                   # bf16 (G, U_pad, dk)
    k = k_ref[...]
    v = v_ref[...]
    s = jnp.einsum("guk,gvk->guv", q, k,
                   preferred_element_type=jnp.float32) * scale
    g_dim, u_pad, _ = s.shape
    if valid_u < u_pad:
        # mask lane-padding key columns before the row max
        key_pos = jax.lax.broadcasted_iota(jnp.int32, (g_dim, u_pad, u_pad), 2)
        s = jnp.where(key_pos < valid_u, s, _NEG_INF)
    s = s - jnp.max(s, axis=-1, keepdims=True)
    p = jnp.exp(s)
    # top-k selection is done on q-norms *before* this kernel, so the approx
    # reciprocal cannot perturb it; approx=True keeps the divide on the EUP.
    p = p * pl.reciprocal(jnp.sum(p, axis=-1, keepdims=True), approx=True)
    ctx = jnp.einsum("guv,gvk->guk", p.astype(jnp.bfloat16), v,
                     preferred_element_type=jnp.float32)
    o_ref[...] = ctx.astype(o_ref.dtype)


# ------------------------------ Pallas wrappers ------------------------------

def pallas_proj_q(x, w, b, sel):
    """x: (M,K) f32, w: (K,N) bf16, b: (N,), sel: (N,H).
    Returns (y bf16 (M,N), per-head squared q-norm f32 (M,H))."""
    M, K = x.shape
    N = w.shape[1]
    H = sel.shape[1]
    tm = _row_tile(M)
    return pl.pallas_call(
        _proj_q_kernel,
        out_shape=(jax.ShapeDtypeStruct((M, N), jnp.bfloat16),
                   jax.ShapeDtypeStruct((M, H), jnp.float32)),
        grid=(pl.cdiv(M, tm),),
        in_specs=[
            pl.BlockSpec((tm, K), lambda i: (i, 0)),
            pl.BlockSpec((K, N), lambda i: (0, 0)),    # constant block: fetched once
            pl.BlockSpec((1, N), lambda i: (0, 0)),
            pl.BlockSpec((N, H), lambda i: (0, 0)),
        ],
        out_specs=(pl.BlockSpec((tm, N), lambda i: (i, 0)),
                   pl.BlockSpec((tm, H), lambda i: (i, 0))),
        compiler_params=_COMPILER_PARAMS,
    )(x, w, b.reshape(1, N), sel)


def pallas_linear(x, w, b):
    """x: (M,K), w: (K,N) bf16, b: (N,) -> (M,N) bf16."""
    M, K = x.shape
    N = w.shape[1]
    tm = _row_tile(M)
    return pl.pallas_call(
        _linear_kernel,
        out_shape=jax.ShapeDtypeStruct((M, N), jnp.bfloat16),
        grid=(pl.cdiv(M, tm),),
        in_specs=[
            pl.BlockSpec((tm, K), lambda i: (i, 0)),
            pl.BlockSpec((K, N), lambda i: (0, 0)),
            pl.BlockSpec((1, N), lambda i: (0, 0)),
        ],
        out_specs=pl.BlockSpec((tm, N), lambda i: (i, 0)),
        compiler_params=_COMPILER_PARAMS,
    )(x, w, b.reshape(1, N))


def pallas_linear_add_ln(x, w, b, res, gamma, beta, eps=LN_EPS):
    """LN(res + x @ w + b) fused.  x: (M,K) bf16 ctx, res: (M,N) f32 -> f32."""
    M, K = x.shape
    N = w.shape[1]
    tm = _row_tile(M)
    return pl.pallas_call(
        functools.partial(_linear_add_ln_kernel, eps=eps),
        out_shape=jax.ShapeDtypeStruct((M, N), jnp.float32),
        grid=(pl.cdiv(M, tm),),
        in_specs=[
            pl.BlockSpec((tm, K), lambda i: (i, 0)),
            pl.BlockSpec((K, N), lambda i: (0, 0)),
            pl.BlockSpec((1, N), lambda i: (0, 0)),
            pl.BlockSpec((tm, N), lambda i: (i, 0)),
            pl.BlockSpec((1, N), lambda i: (0, 0)),
            pl.BlockSpec((1, N), lambda i: (0, 0)),
        ],
        out_specs=pl.BlockSpec((tm, N), lambda i: (i, 0)),
        compiler_params=_COMPILER_PARAMS,
    )(x, w, b.reshape(1, N), res, gamma.reshape(1, N), beta.reshape(1, N))


def pallas_ffn_add_ln(x, w1, b1, w2, b2, gamma, beta, eps=LN_EPS):
    """LN(x + relu(x @ w1 + b1) @ w2 + b2) fused.  x: (M,D) f32 -> f32."""
    M, D = x.shape
    F = w1.shape[1]
    tm = _row_tile(M)
    return pl.pallas_call(
        functools.partial(_ffn_add_ln_kernel, eps=eps),
        out_shape=jax.ShapeDtypeStruct((M, D), jnp.float32),
        grid=(pl.cdiv(M, tm),),
        in_specs=[
            pl.BlockSpec((tm, D), lambda i: (i, 0)),
            pl.BlockSpec((D, F), lambda i: (0, 0)),
            pl.BlockSpec((1, F), lambda i: (0, 0)),
            pl.BlockSpec((F, D), lambda i: (0, 0)),
            pl.BlockSpec((1, D), lambda i: (0, 0)),
            pl.BlockSpec((1, D), lambda i: (0, 0)),
            pl.BlockSpec((1, D), lambda i: (0, 0)),
        ],
        out_specs=pl.BlockSpec((tm, D), lambda i: (i, 0)),
        compiler_params=_COMPILER_PARAMS,
    )(x, w1, b1.reshape(1, F), w2, b2.reshape(1, D),
      gamma.reshape(1, D), beta.reshape(1, D))


def _attn_group_size(BH, u_pad, dk):
    # pick G from a VMEM budget: (G,U_pad,U_pad) f32 scores + 4 bf16 (G,U_pad,dk)
    per_slice = u_pad * u_pad * 4 + 4 * u_pad * dk * 2
    G = max(1, min(BH, (6 * 1024 * 1024) // per_slice))
    while BH % G:
        G -= 1
    return G


def pallas_attn_core(q_s, k_s, v_s, scale, valid_u):
    """q_s/k_s/v_s: (B*H, U_pad, dk) bf16 -> bf16 context of the same shape."""
    BH, u_pad, dk = q_s.shape
    G = _attn_group_size(BH, u_pad, dk)
    spec = pl.BlockSpec((G, u_pad, dk), lambda i: (i, 0, 0))
    return pl.pallas_call(
        functools.partial(_attn_kernel, scale=scale, valid_u=valid_u),
        out_shape=jax.ShapeDtypeStruct((BH, u_pad, dk), jnp.bfloat16),
        grid=(BH // G,),
        in_specs=[spec, spec, spec],
        out_specs=spec,
        compiler_params=_COMPILER_PARAMS,
    )(q_s, k_s, v_s)


# -------------------- module forward (glue in plain JAX) --------------------

def sparse_attn_context(ap, queries_flat, kv_flat, B, L, n_heads, ops, is_self):
    """ProbSparse attention up to (but excluding) the output projection.
    Returns the scattered bf16 context flattened to (B*L, D); dropout=identity."""
    M, D = queries_flat.shape
    dk = D // n_heads

    if is_self:
        qkv, qn = ops["proj_q"](queries_flat, ap["w_qkv"], ap["b_qkv"], ap["sel"])
        q_f, k_f, v_f = qkv[:, :D], qkv[:, D:2 * D], qkv[:, 2 * D:]
    else:
        q_f, qn = ops["proj_q"](queries_flat, ap["w_q"], ap["b_q"], ap["sel"])
        kv = ops["linear"](kv_flat, ap["w_kv"], ap["b_kv"])
        k_f, v_f = kv[:, :D], kv[:, D:]

    # TODO(synk): head split, top-k gather and the context scatter are
    # data-dependent indexing kept in XLA glue (in bf16 to halve HBM traffic);
    # moving them into the Pallas path (scalar-prefetched idx + pl.Element
    # index_maps) is the remaining structural win.
    def to_heads(t):
        return t.reshape(B, L, n_heads, dk).transpose(0, 2, 1, 3)   # (B,H,L,dk)

    q, k, v = to_heads(q_f), to_heads(k_f), to_heads(v_f)

    U = max(1, int(L * 0.5))
    u_pad = _round_up(U, 128)                                      # lane-dense tiles
    qn_bhl = qn.reshape(B, L, n_heads).transpose(0, 2, 1)          # (B,H,L)
    _, idx = jax.lax.top_k(qn_bhl, U)                              # (B,H,U)
    idx_p = jnp.pad(idx, ((0, 0), (0, 0), (0, u_pad - U)))         # pad keys; masked in-kernel

    gather = lambda t: jnp.take_along_axis(t, idx_p[..., None], axis=2)
    q_s, k_s, v_s = gather(q), gather(k), gather(v)                # (B,H,u_pad,dk) bf16

    ctx = ops["attn_core"](
        q_s.reshape(B * n_heads, u_pad, dk),
        k_s.reshape(B * n_heads, u_pad, dk),
        v_s.reshape(B * n_heads, u_pad, dk),
        1.0 / math.sqrt(dk), U,
    ).reshape(B, n_heads, u_pad, dk)[:, :, :U]

    # scatter selected context back to its token positions, zeros elsewhere
    full = jnp.zeros((B, n_heads, L, dk), jnp.bfloat16)
    b_idx = jnp.arange(B)[:, None, None]
    h_idx = jnp.arange(n_heads)[None, :, None]
    full = full.at[b_idx, h_idx, idx].set(ctx)
    return full.transpose(0, 2, 1, 3).reshape(M, D)


def decoder_layer(p, x, cross, n_heads, ops):
    B, L, D = x.shape
    x_flat = x.reshape(B * L, D)
    cross_flat = cross.reshape(-1, D)

    # --- self-attention; out-proj + residual + LN1 fused in one kernel ---
    ctx = sparse_attn_context(p["self_attn"], x_flat, x_flat, B, L, n_heads, ops, True)
    x_flat = ops["linear_add_ln"](ctx, p["self_attn"]["w_o"], p["self_attn"]["b_o"],
                                  x_flat, p["ln1_g"], p["ln1_b"])

    # --- cross-attention; out-proj + residual + LN2 fused ---
    ctx = sparse_attn_context(p["cross_attn"], x_flat, cross_flat, B, L, n_heads, ops, False)
    x_flat = ops["linear_add_ln"](ctx, p["cross_attn"]["w_o"], p["cross_attn"]["b_o"],
                                  x_flat, p["ln2_g"], p["ln2_b"])

    # --- fused FFN + residual + LN3 ---
    x_flat = ops["ffn_add_ln"](x_flat, p["ffw1"], p["ffb1"], p["ffw2"], p["ffb2"],
                               p["ln3_g"], p["ln3_b"])
    return x_flat.reshape(B, L, D)


# ------------------------- pure-JAX reference path --------------------------
# Mirrors the exact math of the kernels (same bf16 operand casts) so the check
# validates the Pallas lowering itself.

def ref_proj_q(x, w, b, sel):
    y = jnp.dot(x.astype(jnp.bfloat16), w, preferred_element_type=jnp.float32) + b
    return (y.astype(jnp.bfloat16),
            jnp.dot(y * y, sel, preferred_element_type=jnp.float32))


def ref_linear(x, w, b):
    y = jnp.dot(x.astype(jnp.bfloat16), w, preferred_element_type=jnp.float32) + b
    return y.astype(jnp.bfloat16)


def ref_linear_add_ln(x, w, b, res, gamma, beta, eps=LN_EPS):
    y = jnp.dot(x.astype(jnp.bfloat16), w, preferred_element_type=jnp.float32) + b
    return _layer_norm(y + res.astype(jnp.float32), gamma, beta, eps)


def ref_ffn_add_ln(x, w1, b1, w2, b2, gamma, beta, eps=LN_EPS):
    x = x.astype(jnp.float32)
    h = jnp.maximum(jnp.dot(x.astype(jnp.bfloat16), w1,
                            preferred_element_type=jnp.float32) + b1, 0.0)
    y = jnp.dot(h.astype(jnp.bfloat16), w2, preferred_element_type=jnp.float32) + b2
    return _layer_norm(y + x, gamma, beta, eps)


def ref_attn_core(q_s, k_s, v_s, scale, valid_u):
    s = jnp.einsum("guk,gvk->guv", q_s, k_s,
                   preferred_element_type=jnp.float32) * scale
    if valid_u < s.shape[-1]:
        key_pos = jax.lax.broadcasted_iota(jnp.int32, s.shape, 2)
        s = jnp.where(key_pos < valid_u, s, _NEG_INF)
    s = s - jnp.max(s, axis=-1, keepdims=True)
    p = jnp.exp(s)
    p = p / jnp.sum(p, axis=-1, keepdims=True)
    ctx = jnp.einsum("guv,gvk->guk", p.astype(jnp.bfloat16), v_s,
                     preferred_element_type=jnp.float32)
    return ctx.astype(jnp.bfloat16)


PALLAS_OPS = dict(proj_q=pallas_proj_q, linear=pallas_linear,
                  linear_add_ln=pallas_linear_add_ln,
                  ffn_add_ln=pallas_ffn_add_ln, attn_core=pallas_attn_core)
REF_OPS = dict(proj_q=ref_proj_q, linear=ref_linear,
               linear_add_ln=ref_linear_add_ln,
               ffn_add_ln=ref_ffn_add_ln, attn_core=ref_attn_core)


# ------------------------------ parameter init ------------------------------

def init_params(key, d_model, d_ff):
    # torch nn.Linear default init: U(-1/sqrt(fan_in), 1/sqrt(fan_in))
    def lin(k, fan_in, fan_out):
        kw, kb = jax.random.split(k)
        s = 1.0 / math.sqrt(fan_in)
        w = jax.random.uniform(kw, (fan_in, fan_out), jnp.float32, -s, s)
        b = jax.random.uniform(kb, (fan_out,), jnp.float32, -s, s)
        return w, b

    def attn(k):
        k1, k2, k3, k4 = jax.random.split(k, 4)
        wq, bq = lin(k1, d_model, d_model)
        wk, bk = lin(k2, d_model, d_model)
        wv, bv = lin(k3, d_model, d_model)
        wo, bo = lin(k4, d_model, d_model)
        return dict(wq=wq, bq=bq, wk=wk, bk=bk, wv=wv, bv=bv, wo=wo, bo=bo)

    k1, k2, k3, k4 = jax.random.split(key, 4)
    ffw1, ffb1 = lin(k3, d_model, d_ff)
    ffw2, ffb2 = lin(k4, d_ff, d_model)
    ones = jnp.ones((d_model,), jnp.float32)
    zeros = jnp.zeros((d_model,), jnp.float32)
    return dict(
        self_attn=attn(k1), cross_attn=attn(k2),
        ffw1=ffw1, ffb1=ffb1, ffw2=ffw2, ffb2=ffb2,
        ln1_g=ones, ln1_b=zeros, ln2_g=ones, ln2_b=zeros, ln3_g=ones, ln3_b=zeros,
    )


def prepare_params(p, d_model, n_heads):
    """One-time weight prep (outside the forward): fused QKV / KV concats,
    bf16 casts of every matmul RHS, per-head squared-norm selector."""
    dk = d_model // n_heads
    sel_head = jnp.repeat(jnp.eye(n_heads, dtype=jnp.float32), dk, axis=0)  # (D,H)
    sel_qkv = jnp.concatenate(
        [sel_head, jnp.zeros((2 * d_model, n_heads), jnp.float32)], axis=0)  # (3D,H)
    bf = lambda w: w.astype(jnp.bfloat16)
    sa, ca = p["self_attn"], p["cross_attn"]
    return dict(
        self_attn=dict(
            w_qkv=bf(jnp.concatenate([sa["wq"], sa["wk"], sa["wv"]], axis=1)),
            b_qkv=jnp.concatenate([sa["bq"], sa["bk"], sa["bv"]]),
            w_o=bf(sa["wo"]), b_o=sa["bo"], sel=sel_qkv),
        cross_attn=dict(
            w_q=bf(ca["wq"]), b_q=ca["bq"],
            w_kv=bf(jnp.concatenate([ca["wk"], ca["wv"]], axis=1)),
            b_kv=jnp.concatenate([ca["bk"], ca["bv"]]),
            w_o=bf(ca["wo"]), b_o=ca["bo"], sel=sel_head),
        ffw1=bf(p["ffw1"]), ffb1=p["ffb1"], ffw2=bf(p["ffw2"]), ffb2=p["ffb2"],
        ln1_g=p["ln1_g"], ln1_b=p["ln1_b"], ln2_g=p["ln2_g"], ln2_b=p["ln2_b"],
        ln3_g=p["ln3_g"], ln3_b=p["ln3_b"],
    )


# ----------------------------------- main ------------------------------------

if __name__ == "__main__":
    B, L, d_model, n_heads, d_ff = 2, 8, 32, 4, 64
    key = jax.random.PRNGKey(0)
    kp, kx, kc = jax.random.split(key, 3)

    params = prepare_params(init_params(kp, d_model, d_ff), d_model, n_heads)
    x = jax.random.normal(kx, (B, L, d_model), jnp.float32)
    cross = jax.random.normal(kc, (B, L, d_model), jnp.float32)

    pallas_forward = jax.jit(
        functools.partial(decoder_layer, n_heads=n_heads, ops=PALLAS_OPS))
    out = jax.block_until_ready(pallas_forward(params, x, cross))

    ref = decoder_layer(params, x, cross, n_heads, REF_OPS)
    assert out.shape == (B, L, d_model)
    assert bool(jnp.allclose(out, ref, atol=2e-2, rtol=2e-2)), "mismatch vs JAX reference"

    print("KERNEL_OK")
</pallas_src>

<mosaic_0001>
module attributes {stable_mosaic.version = 11 : i64} {
  func.func @_proj_q_kernel(%arg0: i32, %arg1: memref<16x32xf32, #tpu.memory_space<vmem>>, %arg2: memref<32x96xbf16, #tpu.memory_space<vmem>>, %arg3: memref<1x96xf32, #tpu.memory_space<vmem>>, %arg4: memref<96x4xf32, #tpu.memory_space<vmem>>, %arg5: memref<16x96xbf16, #tpu.memory_space<vmem>>, %arg6: memref<16x4xf32, #tpu.memory_space<vmem>>) attributes {dimension_semantics = [#tpu.dimension_semantics<parallel>], iteration_bounds = array<i64: 1>, scalar_prefetch = 0 : i64, scratch_operands = 0 : i64, tpu.core_type = #tpu.core_type<tc>, window_params = [{transform_indices = @transform_0, window_bounds = array<i64: 16, 32>}, {pipeline_mode = #tpu.pipeline_mode<synchronous>, transform_indices = @transform_1, window_bounds = array<i64: 32, 96>}, {pipeline_mode = #tpu.pipeline_mode<synchronous>, transform_indices = @transform_2, window_bounds = array<i64: 1, 96>}, {pipeline_mode = #tpu.pipeline_mode<synchronous>, transform_indices = @transform_3, window_bounds = array<i64: 96, 4>}, {transform_indices = @transform_4, window_bounds = array<i64: 16, 96>}, {transform_indices = @transform_5, window_bounds = array<i64: 16, 4>}]} {
    %c0 = arith.constant 0 : index
    %c0_0 = arith.constant 0 : index
    %0 = vector.load %arg1[%c0, %c0_0] : memref<16x32xf32, #tpu.memory_space<vmem>>, vector<16x32xf32>
    %1 = arith.truncf %0 : vector<16x32xf32> to vector<16x32xbf16>
    %c0_1 = arith.constant 0 : index
    %c0_2 = arith.constant 0 : index
    %2 = vector.load %arg2[%c0_1, %c0_2] : memref<32x96xbf16, #tpu.memory_space<vmem>>, vector<32x96xbf16>
    %cst = arith.constant dense<0.000000e+00> : vector<16x96xf32>
    %3 = tpu.matmul %1, %2, %cst {dimension_numbers = #tpu.dot_dimension_numbers<[1], [0], [0], [1], [0, 0, 1, 1], [], []>} : vector<16x32xbf16>, vector<32x96xbf16>, vector<16x96xf32> -> vector<16x96xf32>
    %c0_3 = arith.constant 0 : index
    %c0_4 = arith.constant 0 : index
    %4 = vector.load %arg3[%c0_3, %c0_4] : memref<1x96xf32, #tpu.memory_space<vmem>>, vector<1x96xf32>
    %5 = vector.broadcast %4 : vector<1x96xf32> to vector<16x96xf32>
    %6 = arith.addf %3, %5 : vector<16x96xf32>
    %7 = arith.truncf %6 : vector<16x96xf32> to vector<16x96xbf16>
    %c0_5 = arith.constant 0 : index
    %c0_6 = arith.constant 0 : index
    %8 = vector.load %arg5[%c0_5, %c0_6] : memref<16x96xbf16, #tpu.memory_space<vmem>>, vector<16x96xbf16>
    tpu.vector_store %arg5[%c0_5, %c0_6], %7 {strides = array<i32>} : memref<16x96xbf16, #tpu.memory_space<vmem>>, vector<16x96xbf16>,
    %9 = arith.mulf %6, %6 : vector<16x96xf32>
    %c0_7 = arith.constant 0 : index
    %c0_8 = arith.constant 0 : index
    %10 = vector.load %arg4[%c0_7, %c0_8] : memref<96x4xf32, #tpu.memory_space<vmem>>, vector<96x4xf32>
    %cst_9 = arith.constant dense<0.000000e+00> : vector<16x4xf32>
    %11 = tpu.matmul %9, %10, %cst_9 {dimension_numbers = #tpu.dot_dimension_numbers<[1], [0], [0], [1], [0, 0, 1, 1], [], []>} : vector<16x96xf32>, vector<96x4xf32>, vector<16x4xf32> -> vector<16x4xf32>
    %c0_10 = arith.constant 0 : index
    %c0_11 = arith.constant 0 : index
    %12 = vector.load %arg6[%c0_10, %c0_11] : memref<16x4xf32, #tpu.memory_space<vmem>>, vector<16x4xf32>
    tpu.vector_store %arg6[%c0_10, %c0_11], %11 {strides = array<i32>} : memref<16x4xf32, #tpu.memory_space<vmem>>, vector<16x4xf32>,
    return
  }
  func.func @transform_0(%arg0: i32) -> (i32, i32) {
    %c0_i32 = arith.constant 0 : i32
    %c0_i32_0 = arith.constant 0 : i32
    return %arg0, %c0_i32 : i32, i32
  }
  func.func @transform_1(%arg0: i32) -> (i32, i32) {
    %c0_i32 = arith.constant 0 : i32
    %c0_i32_0 = arith.constant 0 : i32
    %c0_i32_1 = arith.constant 0 : i32
    return %c0_i32, %c0_i32_0 : i32, i32
  }
  func.func @transform_2(%arg0: i32) -> (i32, i32) {
    %c0_i32 = arith.constant 0 : i32
    %c0_i32_0 = arith.constant 0 : i32
    %c0_i32_1 = arith.constant 0 : i32
    return %c0_i32, %c0_i32_0 : i32, i32
  }
  func.func @transform_3(%arg0: i32) -> (i32, i32) {
    %c0_i32 = arith.constant 0 : i32
    %c0_i32_0 = arith.constant 0 : i32
    %c0_i32_1 = arith.constant 0 : i32
    return %c0_i32, %c0_i32_0 : i32, i32
  }
  func.func @transform_4(%arg0: i32) -> (i32, i32) {
    %c0_i32 = arith.constant 0 : i32
    %c0_i32_0 = arith.constant 0 : i32
    return %arg0, %c0_i32 : i32, i32
  }
  func.func @transform_5(%arg0: i32) -> (i32, i32) {
    %c0_i32 = arith.constant 0 : i32
    %c0_i32_0 = arith.constant 0 : i32
    return %arg0, %c0_i32 : i32, i32
  }
}

module attributes {stable_mosaic.version = 11 : i64} {
  func.func @_attn_kernel(%arg0: i32, %arg1: memref<8x128x8xbf16, #tpu.memory_space<vmem>>, %arg2: memref<8x128x8xbf16, #tpu.memory_space<vmem>>, %arg3: memref<8x128x8xbf16, #tpu.memory_space<vmem>>, %arg4: memref<8x128x8xbf16, #tpu.memory_space<vmem>>) attributes {dimension_semantics = [#tpu.dimension_semantics<parallel>], iteration_bounds = array<i64: 1>, scalar_prefetch = 0 : i64, scratch_operands = 0 : i64, tpu.core_type = #tpu.core_type<tc>, window_params = [{transform_indices = @transform_0, window_bounds = array<i64: 8, 128, 8>}, {transform_indices = @transform_1, window_bounds = array<i64: 8, 128, 8>}, {transform_indices = @transform_2, window_bounds = array<i64: 8, 128, 8>}, {transform_indices = @transform_3, window_bounds = array<i64: 8, 128, 8>}]} {
    %c0 = arith.constant 0 : index
    %c0_0 = arith.constant 0 : index
    %c0_1 = arith.constant 0 : index
    %0 = vector.load %arg1[%c0, %c0_0, %c0_1] : memref<8x128x8xbf16, #tpu.memory_space<vmem>>, vector<8x128x8xbf16>
    %c0_2 = arith.constant 0 : index
    %c0_3 = arith.constant 0 : index
    %c0_4 = arith.constant 0 : index
    %1 = vector.load %arg2[%c0_2, %c0_3, %c0_4] : memref<8x128x8xbf16, #tpu.memory_space<vmem>>, vector<8x128x8xbf16>
    %c0_5 = arith.constant 0 : index
    %c0_6 = arith.constant 0 : index
    %c0_7 = arith.constant 0 : index
    %2 = vector.load %arg3[%c0_5, %c0_6, %c0_7] : memref<8x128x8xbf16, #tpu.memory_space<vmem>>, vector<8x128x8xbf16>
    "tpu.trace_start"() <{level = 10 : i32, message = "guk,gvk->guv"}> : () -> ()
    %cst = arith.constant dense<0.000000e+00> : vector<8x128x128xf32>
    %3 = tpu.matmul %0, %1, %cst {dimension_numbers = #tpu.dot_dimension_numbers<[2], [2], [1], [1], [0, 0, 0, 1, 1, 1], [0], [0]>} : vector<8x128x8xbf16>, vector<8x128x8xbf16>, vector<8x128x128xf32> -> vector<8x128x128xf32>
    "tpu.trace_stop"() : () -> ()
    %cst_8 = arith.constant 0.353553385 : f32
    %4 = vector.broadcast %cst_8 : f32 to vector<8x128x128xf32>
    %5 = arith.mulf %3, %4 : vector<8x128x128xf32>
    %6 = tpu.iota {dimensions = array<i32: 2>} : vector<8x128x128xi32>
    %c4_i32 = arith.constant 4 : i32
    %7 = vector.broadcast %c4_i32 : i32 to vector<8x128x128xi32>
    %8 = arith.cmpi slt, %6, %7 : vector<8x128x128xi32>
    %cst_9 = arith.constant -1.000000e+30 : f32
    %9 = vector.broadcast %cst_9 : f32 to vector<8x128x128xf32>
    %10 = arith.select %8, %5, %9 : vector<8x128x128xi1>, vector<8x128x128xf32>
    %cst_10 = arith.constant dense<0xFF800000> : vector<8x128xf32>
    %11 = vector.multi_reduction <maximumf>, %10, %cst_10 [2] : vector<8x128x128xf32> to vector<8x128xf32>
    %12 = vector.shape_cast %11 : vector<8x128xf32> to vector<8x128x1xf32>
    %13 = vector.broadcast %12 : vector<8x128x1xf32> to vector<8x128x128xf32>
    %14 = arith.subf %10, %13 : vector<8x128x128xf32>
    %15 = math.exp %14 : vector<8x128x128xf32>
    %cst_11 = arith.constant dense<0.000000e+00> : vector<8x128xf32>
    %16 = vector.multi_reduction <add>, %15, %cst_11 [2] : vector<8x128x128xf32> to vector<8x128xf32>
    %17 = vector.shape_cast %16 : vector<8x128xf32> to vector<8x128x1xf32>
    %18 = tpu.reciprocal %17 {approx = true} : vector<8x128x1xf32> -> vector<8x128x1xf32>
    %19 = vector.broadcast %18 : vector<8x128x1xf32> to vector<8x128x128xf32>
    %20 = arith.mulf %15, %19 : vector<8x128x128xf32>
    %21 = arith.truncf %20 : vector<8x128x128xf32> to vector<8x128x128xbf16>
    "tpu.trace_start"() <{level = 10 : i32, message = "guv,gvk->guk"}> : () -> ()
    %cst_12 = arith.constant dense<0.000000e+00> : vector<8x128x8xf32>
    %22 = tpu.matmul %21, %2, %cst_12 {dimension_numbers = #tpu.dot_dimension_numbers<[2], [1], [1], [2], [0, 0, 0, 1, 1, 2], [0], [0]>} : vector<8x128x128xbf16>, vector<8x128x8xbf16>, vector<8x128x8xf32> -> vector<8x128x8xf32>
    "tpu.trace_stop"() : () -> ()
    %23 = arith.truncf %22 : vector<8x128x8xf32> to vector<8x128x8xbf16>
    %c0_13 = arith.constant 0 : index
    %c0_14 = arith.constant 0 : index
    %c0_15 = arith.constant 0 : index
    %24 = vector.load %arg4[%c0_13, %c0_14, %c0_15] : memref<8x128x8xbf16, #tpu.memory_space<vmem>>, vector<8x128x8xbf16>
    tpu.vector_store %arg4[%c0_13, %c0_14, %c0_15], %23 {strides = array<i32>} : memref<8x128x8xbf16, #tpu.memory_space<vmem>>, vector<8x128x8xbf16>,
    return
  }
  func.func @transform_0(%arg0: i32) -> (i32, i32, i32) {
    %c0_i32 = arith.constant 0 : i32
    %c0_i32_0 = arith.constant 0 : i32
    %c0_i32_1 = arith.constant 0 : i32
    return %arg0, %c0_i32, %c0_i32_0 : i32, i32, i32
  }
  func.func @transform_1(%arg0: i32) -> (i32, i32, i32) {
    %c0_i32 = arith.constant 0 : i32
    %c0_i32_0 = arith.constant 0 : i32
    %c0_i32_1 = arith.constant 0 : i32
    return %arg0, %c0_i32, %c0_i32_0 : i32, i32, i32
  }
  func.func @transform_2(%arg0: i32) -> (i32, i32, i32) {
    %c0_i32 = arith.constant 0 : i32
    %c0_i32_0 = arith.constant 0 : i32
    %c0_i32_1 = arith.constant 0 : i32
    return %arg0, %c0_i32, %c0_i32_0 : i32, i32, i32
  }
  func.func @transform_3(%arg0: i32) -> (i32, i32, i32) {
    %c0_i32 = arith.constant 0 : i32
    %c0_i32_0 = arith.constant 0 : i32
    %c0_i32_1 = arith.constant 0 : i32
    return %arg0, %c0_i32, %c0_i32_0 : i32, i32, i32
  }
}

module attributes {stable_mosaic.version = 11 : i64} {
  func.func @_linear_add_ln_kernel(%arg0: i32, %arg1: memref<16x32xbf16, #tpu.memory_space<vmem>>, %arg2: memref<32x32xbf16, #tpu.memory_space<vmem>>, %arg3: memref<1x32xf32, #tpu.memory_space<vmem>>, %arg4: memref<16x32xf32, #tpu.memory_space<vmem>>, %arg5: memref<1x32xf32, #tpu.memory_space<vmem>>, %arg6: memref<1x32xf32, #tpu.memory_space<vmem>>, %arg7: memref<16x32xf32, #tpu.memory_space<vmem>>) attributes {dimension_semantics = [#tpu.dimension_semantics<parallel>], iteration_bounds = array<i64: 1>, scalar_prefetch = 0 : i64, scratch_operands = 0 : i64, tpu.core_type = #tpu.core_type<tc>, window_params = [{transform_indices = @transform_0, window_bounds = array<i64: 16, 32>}, {pipeline_mode = #tpu.pipeline_mode<synchronous>, transform_indices = @transform_1, window_bounds = array<i64: 32, 32>}, {pipeline_mode = #tpu.pipeline_mode<synchronous>, transform_indices = @transform_2, window_bounds = array<i64: 1, 32>}, {transform_indices = @transform_3, window_bounds = array<i64: 16, 32>}, {pipeline_mode = #tpu.pipeline_mode<synchronous>, transform_indices = @transform_4, window_bounds = array<i64: 1, 32>}, {pipeline_mode = #tpu.pipeline_mode<synchronous>, transform_indices = @transform_5, window_bounds = array<i64: 1, 32>}, {transform_indices = @transform_6, window_bounds = array<i64: 16, 32>}]} {
    %c0 = arith.constant 0 : index
    %c0_0 = arith.constant 0 : index
    %0 = vector.load %arg1[%c0, %c0_0] : memref<16x32xbf16, #tpu.memory_space<vmem>>, vector<16x32xbf16>
    %c0_1 = arith.constant 0 : index
    %c0_2 = arith.constant 0 : index
    %1 = vector.load %arg2[%c0_1, %c0_2] : memref<32x32xbf16, #tpu.memory_space<vmem>>, vector<32x32xbf16>
    %cst = arith.constant dense<0.000000e+00> : vector<16x32xf32>
    %2 = tpu.matmul %0, %1, %cst {dimension_numbers = #tpu.dot_dimension_numbers<[1], [0], [0], [1], [0, 0, 1, 1], [], []>} : vector<16x32xbf16>, vector<32x32xbf16>, vector<16x32xf32> -> vector<16x32xf32>
    %c0_3 = arith.constant 0 : index
    %c0_4 = arith.constant 0 : index
    %3 = vector.load %arg3[%c0_3, %c0_4] : memref<1x32xf32, #tpu.memory_space<vmem>>, vector<1x32xf32>
    %4 = vector.broadcast %3 : vector<1x32xf32> to vector<16x32xf32>
    %5 = arith.addf %2, %4 : vector<16x32xf32>
    %c0_5 = arith.constant 0 : index
    %c0_6 = arith.constant 0 : index
    %6 = vector.load %arg4[%c0_5, %c0_6] : memref<16x32xf32, #tpu.memory_space<vmem>>, vector<16x32xf32>
    %7 = arith.addf %5, %6 : vector<16x32xf32>
    %c0_7 = arith.constant 0 : index
    %c0_8 = arith.constant 0 : index
    %8 = vector.load %arg5[%c0_7, %c0_8] : memref<1x32xf32, #tpu.memory_space<vmem>>, vector<1x32xf32>
    %c0_9 = arith.constant 0 : index
    %c0_10 = arith.constant 0 : index
    %9 = vector.load %arg6[%c0_9, %c0_10] : memref<1x32xf32, #tpu.memory_space<vmem>>, vector<1x32xf32>
    %cst_11 = arith.constant dense<0.000000e+00> : vector<16xf32>
    %10 = vector.multi_reduction <add>, %7, %cst_11 [1] : vector<16x32xf32> to vector<16xf32>
    %11 = vector.shape_cast %10 : vector<16xf32> to vector<16x1xf32>
    %cst_12 = arith.constant 3.200000e+01 : f32
    %12 = vector.broadcast %cst_12 : f32 to vector<16x1xf32>
    %13 = arith.divf %11, %12 : vector<16x1xf32>
    %14 = vector.broadcast %13 : vector<16x1xf32> to vector<16x32xf32>
    %15 = arith.subf %7, %14 : vector<16x32xf32>
    %16 = arith.mulf %15, %15 : vector<16x32xf32>
    %cst_13 = arith.constant dense<0.000000e+00> : vector<16xf32>
    %17 = vector.multi_reduction <add>, %16, %cst_13 [1] : vector<16x32xf32> to vector<16xf32>
    %18 = vector.shape_cast %17 : vector<16xf32> to vector<16x1xf32>
    %cst_14 = arith.constant 3.200000e+01 : f32
    %19 = vector.broadcast %cst_14 : f32 to vector<16x1xf32>
    %20 = arith.divf %18, %19 : vector<16x1xf32>
    %21 = vector.broadcast %13 : vector<16x1xf32> to vector<16x32xf32>
    %22 = arith.subf %7, %21 : vector<16x32xf32>
    %cst_15 = arith.constant 9.99999974E-6 : f32
    %23 = vector.broadcast %cst_15 : f32 to vector<16x1xf32>
    %24 = arith.addf %20, %23 : vector<16x1xf32>
    %25 = math.rsqrt %24 : vector<16x1xf32>
    %26 = vector.broadcast %25 : vector<16x1xf32> to vector<16x32xf32>
    %27 = arith.mulf %22, %26 : vector<16x32xf32>
    %28 = vector.broadcast %8 : vector<1x32xf32> to vector<16x32xf32>
    %29 = arith.mulf %27, %28 : vector<16x32xf32>
    %30 = vector.broadcast %9 : vector<1x32xf32> to vector<16x32xf32>
    %31 = arith.addf %29, %30 : vector<16x32xf32>
    %c0_16 = arith.constant 0 : index
    %c0_17 = arith.constant 0 : index
    %32 = vector.load %arg7[%c0_16, %c0_17] : memref<16x32xf32, #tpu.memory_space<vmem>>, vector<16x32xf32>
    tpu.vector_store %arg7[%c0_16, %c0_17], %31 {strides = array<i32>} : memref<16x32xf32, #tpu.memory_space<vmem>>, vector<16x32xf32>,
    return
  }
  func.func @transform_0(%arg0: i32) -> (i32, i32) {
    %c0_i32 = arith.constant 0 : i32
    %c0_i32_0 = arith.constant 0 : i32
    return %arg0, %c0_i32 : i32, i32
  }
  func.func @transform_1(%arg0: i32) -> (i32, i32) {
    %c0_i32 = arith.constant 0 : i32
    %c0_i32_0 = arith.constant 0 : i32
    %c0_i32_1 = arith.constant 0 : i32
    return %c0_i32, %c0_i32_0 : i32, i32
  }
  func.func @transform_2(%arg0: i32) -> (i32, i32) {
    %c0_i32 = arith.constant 0 : i32
    %c0_i32_0 = arith.constant 0 : i32
    %c0_i32_1 = arith.constant 0 : i32
    return %c0_i32, %c0_i32_0 : i32, i32
  }
  func.func @transform_3(%arg0: i32) -> (i32, i32) {
    %c0_i32 = arith.constant 0 : i32
    %c0_i32_0 = arith.constant 0 : i32
    return %arg0, %c0_i32 : i32, i32
  }
  func.func @transform_4(%arg0: i32) -> (i32, i32) {
    %c0_i32 = arith.constant 0 : i32
    %c0_i32_0 = arith.constant 0 : i32
    %c0_i32_1 = arith.constant 0 : i32
    return %c0_i32, %c0_i32_0 : i32, i32
  }
  func.func @transform_5(%arg0: i32) -> (i32, i32) {
    %c0_i32 = arith.constant 0 : i32
    %c0_i32_0 = arith.constant 0 : i32
    %c0_i32_1 = arith.constant 0 : i32
    return %c0_i32, %c0_i32_0 : i32, i32
  }
  func.func @transform_6(%arg0: i32) -> (i32, i32) {
    %c0_i32 = arith.constant 0 : i32
    %c0_i32_0 = arith.constant 0 : i32
    return %arg0, %c0_i32 : i32, i32
  }
}

module attributes {stable_mosaic.version = 11 : i64} {
  func.func @_proj_q_kernel(%arg0: i32, %arg1: memref<16x32xf32, #tpu.memory_space<vmem>>, %arg2: memref<32x32xbf16, #tpu.memory_space<vmem>>, %arg3: memref<1x32xf32, #tpu.memory_space<vmem>>, %arg4: memref<32x4xf32, #tpu.memory_space<vmem>>, %arg5: memref<16x32xbf16, #tpu.memory_space<vmem>>, %arg6: memref<16x4xf32, #tpu.memory_space<vmem>>) attributes {dimension_semantics = [#tpu.dimension_semantics<parallel>], iteration_bounds = array<i64: 1>, scalar_prefetch = 0 : i64, scratch_operands = 0 : i64, tpu.core_type = #tpu.core_type<tc>, window_params = [{transform_indices = @transform_0, window_bounds = array<i64: 16, 32>}, {pipeline_mode = #tpu.pipeline_mode<synchronous>, transform_indices = @transform_1, window_bounds = array<i64: 32, 32>}, {pipeline_mode = #tpu.pipeline_mode<synchronous>, transform_indices = @transform_2, window_bounds = array<i64: 1, 32>}, {pipeline_mode = #tpu.pipeline_mode<synchronous>, transform_indices = @transform_3, window_bounds = array<i64: 32, 4>}, {transform_indices = @transform_4, window_bounds = array<i64: 16, 32>}, {transform_indices = @transform_5, window_bounds = array<i64: 16, 4>}]} {
    %c0 = arith.constant 0 : index
    %c0_0 = arith.constant 0 : index
    %0 = vector.load %arg1[%c0, %c0_0] : memref<16x32xf32, #tpu.memory_space<vmem>>, vector<16x32xf32>
    %1 = arith.truncf %0 : vector<16x32xf32> to vector<16x32xbf16>
    %c0_1 = arith.constant 0 : index
    %c0_2 = arith.constant 0 : index
    %2 = vector.load %arg2[%c0_1, %c0_2] : memref<32x32xbf16, #tpu.memory_space<vmem>>, vector<32x32xbf16>
    %cst = arith.constant dense<0.000000e+00> : vector<16x32xf32>
    %3 = tpu.matmul %1, %2, %cst {dimension_numbers = #tpu.dot_dimension_numbers<[1], [0], [0], [1], [0, 0, 1, 1], [], []>} : vector<16x32xbf16>, vector<32x32xbf16>, vector<16x32xf32> -> vector<16x32xf32>
    %c0_3 = arith.constant 0 : index
    %c0_4 = arith.constant 0 : index
    %4 = vector.load %arg3[%c0_3, %c0_4] : memref<1x32xf32, #tpu.memory_space<vmem>>, vector<1x32xf32>
    %5 = vector.broadcast %4 : vector<1x32xf32> to vector<16x32xf32>
    %6 = arith.addf %3, %5 : vector<16x32xf32>
    %7 = arith.truncf %6 : vector<16x32xf32> to vector<16x32xbf16>
    %c0_5 = arith.constant 0 : index
    %c0_6 = arith.constant 0 : index
    %8 = vector.load %arg5[%c0_5, %c0_6] : memref<16x32xbf16, #tpu.memory_space<vmem>>, vector<16x32xbf16>
    tpu.vector_store %arg5[%c0_5, %c0_6], %7 {strides = array<i32>} : memref<16x32xbf16, #tpu.memory_space<vmem>>, vector<16x32xbf16>,
    %9 = arith.mulf %6, %6 : vector<16x32xf32>
    %c0_7 = arith.constant 0 : index
    %c0_8 = arith.constant 0 : index
    %10 = vector.load %arg4[%c0_7, %c0_8] : memref<32x4xf32, #tpu.memory_space<vmem>>, vector<32x4xf32>
    %cst_9 = arith.constant dense<0.000000e+00> : vector<16x4xf32>
    %11 = tpu.matmul %9, %10, %cst_9 {dimension_numbers = #tpu.dot_dimension_numbers<[1], [0], [0], [1], [0, 0, 1, 1], [], []>} : vector<16x32xf32>, vector<32x4xf32>, vector<16x4xf32> -> vector<16x4xf32>
    %c0_10 = arith.constant 0 : index
    %c0_11 = arith.constant 0 : index
    %12 = vector.load %arg6[%c0_10, %c0_11] : memref<16x4xf32, #tpu.memory_space<vmem>>, vector<16x4xf32>
    tpu.vector_store %arg6[%c0_10, %c0_11], %11 {strides = array<i32>} : memref<16x4xf32, #tpu.memory_space<vmem>>, vector<16x4xf32>,
    return
  }
  func.func @transform_0(%arg0: i32) -> (i32, i32) {
    %c0_i32 = arith.constant 0 : i32
    %c0_i32_0 = arith.constant 0 : i32
    return %arg0, %c0_i32 : i32, i32
  }
  func.func @transform_1(%arg0: i32) -> (i32, i32) {
    %c0_i32 = arith.constant 0 : i32
    %c0_i32_0 = arith.constant 0 : i32
    %c0_i32_1 = arith.constant 0 : i32
    return %c0_i32, %c0_i32_0 : i32, i32
  }
  func.func @transform_2(%arg0: i32) -> (i32, i32) {
    %c0_i32 = arith.constant 0 : i32
    %c0_i32_0 = arith.constant 0 : i32
    %c0_i32_1 = arith.constant 0 : i32
    return %c0_i32, %c0_i32_0 : i32, i32
  }
  func.func @transform_3(%arg0: i32) -> (i32, i32) {
    %c0_i32 = arith.constant 0 : i32
    %c0_i32_0 = arith.constant 0 : i32
    %c0_i32_1 = arith.constant 0 : i32
    return %c0_i32, %c0_i32_0 : i32, i32
  }
  func.func @transform_4(%arg0: i32) -> (i32, i32) {
    %c0_i32 = arith.constant 0 : i32
    %c0_i32_0 = arith.constant 0 : i32
    return %arg0, %c0_i32 : i32, i32
  }
  func.func @transform_5(%arg0: i32) -> (i32, i32) {
    %c0_i32 = arith.constant 0 : i32
    %c0_i32_0 = arith.constant 0 : i32
    return %arg0, %c0_i32 : i32, i32
  }
}

module attributes {stable_mosaic.version = 11 : i64} {
  func.func @_linear_kernel(%arg0: i32, %arg1: memref<16x32xf32, #tpu.memory_space<vmem>>, %arg2: memref<32x64xbf16, #tpu.memory_space<vmem>>, %arg3: memref<1x64xf32, #tpu.memory_space<vmem>>, %arg4: memref<16x64xbf16, #tpu.memory_space<vmem>>) attributes {dimension_semantics = [#tpu.dimension_semantics<parallel>], iteration_bounds = array<i64: 1>, scalar_prefetch = 0 : i64, scratch_operands = 0 : i64, tpu.core_type = #tpu.core_type<tc>, window_params = [{transform_indices = @transform_0, window_bounds = array<i64: 16, 32>}, {pipeline_mode = #tpu.pipeline_mode<synchronous>, transform_indices = @transform_1, window_bounds = array<i64: 32, 64>}, {pipeline_mode = #tpu.pipeline_mode<synchronous>, transform_indices = @transform_2, window_bounds = array<i64: 1, 64>}, {transform_indices = @transform_3, window_bounds = array<i64: 16, 64>}]} {
    %c0 = arith.constant 0 : index
    %c0_0 = arith.constant 0 : index
    %0 = vector.load %arg1[%c0, %c0_0] : memref<16x32xf32, #tpu.memory_space<vmem>>, vector<16x32xf32>
    %1 = arith.truncf %0 : vector<16x32xf32> to vector<16x32xbf16>
    %c0_1 = arith.constant 0 : index
    %c0_2 = arith.constant 0 : index
    %2 = vector.load %arg2[%c0_1, %c0_2] : memref<32x64xbf16, #tpu.memory_space<vmem>>, vector<32x64xbf16>
    %cst = arith.constant dense<0.000000e+00> : vector<16x64xf32>
    %3 = tpu.matmul %1, %2, %cst {dimension_numbers = #tpu.dot_dimension_numbers<[1], [0], [0], [1], [0, 0, 1, 1], [], []>} : vector<16x32xbf16>, vector<32x64xbf16>, vector<16x64xf32> -> vector<16x64xf32>
    %c0_3 = arith.constant 0 : index
    %c0_4 = arith.constant 0 : index
    %4 = vector.load %arg3[%c0_3, %c0_4] : memref<1x64xf32, #tpu.memory_space<vmem>>, vector<1x64xf32>
    %5 = vector.broadcast %4 : vector<1x64xf32> to vector<16x64xf32>
    %6 = arith.addf %3, %5 : vector<16x64xf32>
    %7 = arith.truncf %6 : vector<16x64xf32> to vector<16x64xbf16>
    %c0_5 = arith.constant 0 : index
    %c0_6 = arith.constant 0 : index
    %8 = vector.load %arg4[%c0_5, %c0_6] : memref<16x64xbf16, #tpu.memory_space<vmem>>, vector<16x64xbf16>
    tpu.vector_store %arg4[%c0_5, %c0_6], %7 {strides = array<i32>} : memref<16x64xbf16, #tpu.memory_space<vmem>>, vector<16x64xbf16>,
    return
  }
  func.func @transform_0(%arg0: i32) -> (i32, i32) {
    %c0_i32 = arith.constant 0 : i32
    %c0_i32_0 = arith.constant 0 : i32
    return %arg0, %c0_i32 : i32, i32
  }
  func.func @transform_1(%arg0: i32) -> (i32, i32) {
    %c0_i32 = arith.constant 0 : i32
    %c0_i32_0 = arith.constant 0 : i32
    %c0_i32_1 = arith.constant 0 : i32
    return %c0_i32, %c0_i32_0 : i32, i32
  }
  func.func @transform_2(%arg0: i32) -> (i32, i32) {
    %c0_i32 = arith.constant 0 : i32
    %c0_i32_0 = arith.constant 0 : i32
    %c0_i32_1 = arith.constant 0 : i32
    return %c0_i32, %c0_i32_0 : i32, i32
  }
  func.func @transform_3(%arg0: i32) -> (i32, i32) {
    %c0_i32 = arith.constant 0 : i32
    %c0_i32_0 = arith.constant 0 : i32
    return %arg0, %c0_i32 : i32, i32
  }
}

module attributes {stable_mosaic.version = 11 : i64} {
  func.func @_ffn_add_ln_kernel(%arg0: i32, %arg1: memref<16x32xf32, #tpu.memory_space<vmem>>, %arg2: memref<32x64xbf16, #tpu.memory_space<vmem>>, %arg3: memref<1x64xf32, #tpu.memory_space<vmem>>, %arg4: memref<64x32xbf16, #tpu.memory_space<vmem>>, %arg5: memref<1x32xf32, #tpu.memory_space<vmem>>, %arg6: memref<1x32xf32, #tpu.memory_space<vmem>>, %arg7: memref<1x32xf32, #tpu.memory_space<vmem>>, %arg8: memref<16x32xf32, #tpu.memory_space<vmem>>) attributes {dimension_semantics = [#tpu.dimension_semantics<parallel>], iteration_bounds = array<i64: 1>, scalar_prefetch = 0 : i64, scratch_operands = 0 : i64, tpu.core_type = #tpu.core_type<tc>, window_params = [{transform_indices = @transform_0, window_bounds = array<i64: 16, 32>}, {pipeline_mode = #tpu.pipeline_mode<synchronous>, transform_indices = @transform_1, window_bounds = array<i64: 32, 64>}, {pipeline_mode = #tpu.pipeline_mode<synchronous>, transform_indices = @transform_2, window_bounds = array<i64: 1, 64>}, {pipeline_mode = #tpu.pipeline_mode<synchronous>, transform_indices = @transform_3, window_bounds = array<i64: 64, 32>}, {pipeline_mode = #tpu.pipeline_mode<synchronous>, transform_indices = @transform_4, window_bounds = array<i64: 1, 32>}, {pipeline_mode = #tpu.pipeline_mode<synchronous>, transform_indices = @transform_5, window_bounds = array<i64: 1, 32>}, {pipeline_mode = #tpu.pipeline_mode<synchronous>, transform_indices = @transform_6, window_bounds = array<i64: 1, 32>}, {transform_indices = @transform_7, window_bounds = array<i64: 16, 32>}]} {
    %c0 = arith.constant 0 : index
    %c0_0 = arith.constant 0 : index
    %0 = vector.load %arg1[%c0, %c0_0] : memref<16x32xf32, #tpu.memory_space<vmem>>, vector<16x32xf32>
    %1 = arith.truncf %0 : vector<16x32xf32> to vector<16x32xbf16>
    %c0_1 = arith.constant 0 : index
    %c0_2 = arith.constant 0 : index
    %2 = vector.load %arg2[%c0_1, %c0_2] : memref<32x64xbf16, #tpu.memory_space<vmem>>, vector<32x64xbf16>
    %cst = arith.constant dense<0.000000e+00> : vector<16x64xf32>
    %3 = tpu.matmul %1, %2, %cst {dimension_numbers = #tpu.dot_dimension_numbers<[1], [0], [0], [1], [0, 0, 1, 1], [], []>} : vector<16x32xbf16>, vector<32x64xbf16>, vector<16x64xf32> -> vector<16x64xf32>
    %c0_3 = arith.constant 0 : index
    %c0_4 = arith.constant 0 : index
    %4 = vector.load %arg3[%c0_3, %c0_4] : memref<1x64xf32, #tpu.memory_space<vmem>>, vector<1x64xf32>
    %5 = vector.broadcast %4 : vector<1x64xf32> to vector<16x64xf32>
    %6 = arith.addf %3, %5 : vector<16x64xf32>
    %cst_5 = arith.constant 0.000000e+00 : f32
    %7 = vector.broadcast %cst_5 : f32 to vector<16x64xf32>
    %8 = arith.maximumf %6, %7 : vector<16x64xf32>
    %9 = arith.truncf %8 : vector<16x64xf32> to vector<16x64xbf16>
    %c0_6 = arith.constant 0 : index
    %c0_7 = arith.constant 0 : index
    %10 = vector.load %arg4[%c0_6, %c0_7] : memref<64x32xbf16, #tpu.memory_space<vmem>>, vector<64x32xbf16>
    %cst_8 = arith.constant dense<0.000000e+00> : vector<16x32xf32>
    %11 = tpu.matmul %9, %10, %cst_8 {dimension_numbers = #tpu.dot_dimension_numbers<[1], [0], [0], [1], [0, 0, 1, 1], [], []>} : vector<16x64xbf16>, vector<64x32xbf16>, vector<16x32xf32> -> vector<16x32xf32>
    %c0_9 = arith.constant 0 : index
    %c0_10 = arith.constant 0 : index
    %12 = vector.load %arg5[%c0_9, %c0_10] : memref<1x32xf32, #tpu.memory_space<vmem>>, vector<1x32xf32>
    %13 = vector.broadcast %12 : vector<1x32xf32> to vector<16x32xf32>
    %14 = arith.addf %11, %13 : vector<16x32xf32>
    %15 = arith.addf %14, %0 : vector<16x32xf32>
    %c0_11 = arith.constant 0 : index
    %c0_12 = arith.constant 0 : index
    %16 = vector.load %arg6[%c0_11, %c0_12] : memref<1x32xf32, #tpu.memory_space<vmem>>, vector<1x32xf32>
    %c0_13 = arith.constant 0 : index
    %c0_14 = arith.constant 0 : index
    %17 = vector.load %arg7[%c0_13, %c0_14] : memref<1x32xf32, #tpu.memory_space<vmem>>, vector<1x32xf32>
    %cst_15 = arith.constant dense<0.000000e+00> : vector<16xf32>
    %18 = vector.multi_reduction <add>, %15, %cst_15 [1] : vector<16x32xf32> to vector<16xf32>
    %19 = vector.shape_cast %18 : vector<16xf32> to vector<16x1xf32>
    %cst_16 = arith.constant 3.200000e+01 : f32
    %20 = vector.broadcast %cst_16 : f32 to vector<16x1xf32>
    %21 = arith.divf %19, %20 : vector<16x1xf32>
    %22 = vector.broadcast %21 : vector<16x1xf32> to vector<16x32xf32>
    %23 = arith.subf %15, %22 : vector<16x32xf32>
    %24 = arith.mulf %23, %23 : vector<16x32xf32>
    %cst_17 = arith.constant dense<0.000000e+00> : vector<16xf32>
    %25 = vector.multi_reduction <add>, %24, %cst_17 [1] : vector<16x32xf32> to vector<16xf32>
    %26 = vector.shape_cast %25 : vector<16xf32> to vector<16x1xf32>
    %cst_18 = arith.constant 3.200000e+01 : f32
    %27 = vector.broadcast %cst_18 : f32 to vector<16x1xf32>
    %28 = arith.divf %26, %27 : vector<16x1xf32>
    %29 = vector.broadcast %21 : vector<16x1xf32> to vector<16x32xf32>
    %30 = arith.subf %15, %29 : vector<16x32xf32>
    %cst_19 = arith.constant 9.99999974E-6 : f32
    %31 = vector.broadcast %cst_19 : f32 to vector<16x1xf32>
    %32 = arith.addf %28, %31 : vector<16x1xf32>
    %33 = math.rsqrt %32 : vector<16x1xf32>
    %34 = vector.broadcast %33 : vector<16x1xf32> to vector<16x32xf32>
    %35 = arith.mulf %30, %34 : vector<16x32xf32>
    %36 = vector.broadcast %16 : vector<1x32xf32> to vector<16x32xf32>
    %37 = arith.mulf %35, %36 : vector<16x32xf32>
    %38 = vector.broadcast %17 : vector<1x32xf32> to vector<16x32xf32>
    %39 = arith.addf %37, %38 : vector<16x32xf32>
    %c0_20 = arith.constant 0 : index
    %c0_21 = arith.constant 0 : index
    %40 = vector.load %arg8[%c0_20, %c0_21] : memref<16x32xf32, #tpu.memory_space<vmem>>, vector<16x32xf32>
    tpu.vector_store %arg8[%c0_20, %c0_21], %39 {strides = array<i32>} : memref<16x32xf32, #tpu.memory_space<vmem>>, vector<16x32xf32>,
    return
  }
  func.func @transform_0(%arg0: i32) -> (i32, i32) {
    %c0_i32 = arith.constant 0 : i32
    %c0_i32_0 = arith.constant 0 : i32
    return %arg0, %c0_i32 : i32, i32
  }
  func.func @transform_1(%arg0: i32) -> (i32, i32) {
    %c0_i32 = arith.constant 0 : i32
    %c0_i32_0 = arith.constant 0 : i32
    %c0_i32_1 = arith.constant 0 : i32
    return %c0_i32, %c0_i32_0 : i32, i32
  }
  func.func @transform_2(%arg0: i32) -> (i32, i32) {
    %c0_i32 = arith.constant 0 : i32
    %c0_i32_0 = arith.constant 0 : i32
    %c0_i32_1 = arith.constant 0 : i32
    return %c0_i32, %c0_i32_0 : i32, i32
  }
  func.func @transform_3(%arg0: i32) -> (i32, i32) {
    %c0_i32 = arith.constant 0 : i32
    %c0_i32_0 = arith.constant 0 : i32
    %c0_i32_1 = arith.constant 0 : i32
    return %c0_i32, %c0_i32_0 : i32, i32
  }
  func.func @transform_4(%arg0: i32) -> (i32, i32) {
    %c0_i32 = arith.constant 0 : i32
    %c0_i32_0 = arith.constant 0 : i32
    %c0_i32_1 = arith.constant 0 : i32
    return %c0_i32, %c0_i32_0 : i32, i32
  }
  func.func @transform_5(%arg0: i32) -> (i32, i32) {
    %c0_i32 = arith.constant 0 : i32
    %c0_i32_0 = arith.constant 0 : i32
    %c0_i32_1 = arith.constant 0 : i32
    return %c0_i32, %c0_i32_0 : i32, i32
  }
  func.func @transform_6(%arg0: i32) -> (i32, i32) {
    %c0_i32 = arith.constant 0 : i32
    %c0_i32_0 = arith.constant 0 : i32
    %c0_i32_1 = arith.constant 0 : i32
    return %c0_i32, %c0_i32_0 : i32, i32
  }
  func.func @transform_7(%arg0: i32) -> (i32, i32) {
    %c0_i32 = arith.constant 0 : i32
    %c0_i32_0 = arith.constant 0 : i32
    return %arg0, %c0_i32 : i32, i32
  }
}

</mosaic_0001>

<bundles_post_ra>
// kernel: decoder_layer.8
= control target key start
LH: loop header
LB: loop body
LE: loop exit
PB: predicated region body
PF: predicated region fallthrough
CT: control target
= control target key end

     0   :  { %vm43_vm0 = vcmask 261120   ;;  %vm63_vm1 = vcmask 781312   ;;  %vm80_vm2 = vcmask 785408   ;;  %vm110_vm3 = vcmask 31744   ;;  %s240_s1 = inlined_call_operand.vmem [shape: bf16[32,96], index: 1, kind: input, shape index: {}]   ;;  %s241_s0 = inlined_call_operand.vmem [shape: f32[16,32], index: 0, kind: input, shape index: {}]   ;;  %s242_s3 = inlined_call_operand.vmem [shape: f32[96,4], index: 3, kind: input, shape index: {}]   ;;  %s243_s2 = inlined_call_operand.vmem [shape: f32[1,96], index: 2, kind: input, shape index: {}]   ;;  %s244_s4 = inlined_call_operand.vmem [shape: bf16[16,96], index: 4, kind: output, shape index: {0}]   ;;  %s245_s5 = inlined_call_operand.vmem [shape: f32[16,4], index: 5, kind: output, shape index: {1}]  }
   0x1   :  { %v133_v0 = vld [vmem:[%s240_s1 + $0x8] sm:$0xff]  ;;  %v79_v1 = vld [vmem:[%s242_s3 + $0x58] sm:$0xff]  ;;  %v78_v2 = vld [vmem:[%s242_s3 + $0x50] sm:$0xff] }
   0x2   :  { %53 = vmatpush.bf16.msra.mxu0 %v133_v0  ;;  %v132_v3 = vld [vmem:[%s240_s1] sm:$0xff]  ;;  %v21_v5 = vld [vmem:[%s241_s0 + $0x8] sm:$0xff]  ;;  %91 = vmatpush.msra.mxu1 %v79_v1  ;;  %v75_v9 = vld [vmem:[%s242_s3 + $0x38] sm:$0xff] }
   0x3   :  { %v20_v4 = vld [vmem:[%s241_s0] sm:$0xff]  ;;  %v77_v6 = vld [vmem:[%s242_s3 + $0x48] sm:$0xff]  ;;  %134 = vmatpush.msra.mxu2 %v79_v1  ;;  %v74_v10 = vld [vmem:[%s242_s3 + $0x30] sm:$0xff] }
   0x4   :  { %92 = vmatpush.msra.mxu1 %v78_v2  ;;  %v22_v7 = vpack.c.bf16 %v21_v5, %v20_v4  ;;  %v76_v8 = vld [vmem:[%s242_s3 + $0x40] sm:$0xff]  ;;  %v73_v11 = vld [vmem:[%s242_s3 + $0x28] sm:$0xff]  ;;  %v71_v13 = vld [vmem:[%s242_s3 + $0x18] sm:$0xff] }
   0x5   :  { %135 = vmatpush.msra.mxu2 %v78_v2  ;;  %v72_v12 = vld [vmem:[%s242_s3 + $0x20] sm:$0xff]  ;;  %v70_v14 = vld [vmem:[%s242_s3 + $0x10] sm:$0xff]  ;;  %v69_v15 = vld [vmem:[%s242_s3 + $0x8] sm:$0xff] }
   0x6   :  { %54 = vmatpush.bf16.msra.mxu0 %v132_v3  ;;  %93 = vmatpush.msra.mxu1 %v77_v6  ;;  %v68_v16 = vld [vmem:[%s242_s3] sm:$0xff] }
   0x7   :  { %136 = vmatpush.msra.mxu2 %v77_v6  ;;  %v146_v17 = vld [vmem:[%s243_s2] ss:$0 sm:$0xff] }
   0x8   :  { %94 = vmatpush.msra.mxu1 %v76_v8 }
   0x9   :  { %129 = vmatmul.msk.bf16.vlgmr.msra.gmra.mxu0 %vm43_vm0, %v22_v7  ;;  %137 = vmatpush.msra.mxu2 %v76_v8 }
   0xa   :  { %95 = vmatpush.msra.mxu1 %v75_v9 }
   0xb   :  { %138 = vmatpush.msra.mxu2 %v75_v9 }
   0xc   :  { %96 = vmatpush.msra.mxu1 %v74_v10 }
   0xd   :  { %139 = vmatpush.msra.mxu2 %v74_v10 }
   0xe   :  { %97 = vmatpush.msra.mxu1 %v73_v11 }
   0xf   :  { %140 = vmatpush.msra.mxu2 %v73_v11 }
  0x10   :  { %98 = vmatpush.msra.mxu1 %v72_v12 }
  0x11   :  { %141 = vmatpush.msra.mxu2 %v72_v12 }
  0x12   :  { %99 = vmatpush.msra.mxu1 %v71_v13 }
  0x13   :  { %142 = vmatpush.msra.mxu2 %v71_v13 }
  0x14   :  { %100 = vmatpush.msra.mxu1 %v70_v14 }
  0x15   :  { %143 = vmatpush.msra.mxu2 %v70_v14 }
  0x16   :  { %101 = vmatpush.msra.mxu1 %v69_v15 }
  0x17   :  { %144 = vmatpush.msra.mxu2 %v69_v15 }
  0x18   :  { %102 = vmatpush.msra.mxu1 %v68_v16 }
  0x19   :  { %145 = vmatpush.msra.mxu2 %v68_v16 }
  0x86   :  { %v56_v18 = vpop.f32.mrf.mxu0 }
  0x87   :  { %v57_v19 = vadd.f32 %v146_v17, %v56_v18 }
  0x89   :  { %v61_v20 = vpack.c.bf16 %v57_v19, %v57_v19  ;;  %v66_v21 = vmul.f32 %v57_v19, %v57_v19 }
  0x8b   :  { %64 = vst.msk [vmem:[%s244_s4] sm:$0xf] %vm63_vm1, %v61_v20  ;;  %130 = vmatmul.msk.f32.vlgmr.msra.gmra.mxu1 %vm80_vm2, %v66_v21 }
  0x8e   :  { %v58_v22 = vpop.f32.mrf.mxu0 }
  0x8f   :  { %v59_v23 = vadd.f32 %v146_v17, %v58_v22 }
  0x91   :  { %v62_v24 = vpack.c.bf16 %v59_v23, %v59_v23  ;;  %v67_v25 = vmul.f32 %v59_v23, %v59_v23 }
  0x93   :  { %65 = vst.msk [vmem:[%s244_s4 + $0x4] sm:$0xf] %vm63_vm1, %v62_v24  ;;  %131 = vmatmul.msk.f32.vlgmr.msra.gmra.mxu2 %vm80_vm2, %v67_v25 }
 0x108   :  { %v104_v26 = vpop.f32.mrf.mxu1 }
 0x109   :  { %111 = vst.msk [vmem:[%s245_s5] sm:$0xff] %vm110_vm3, %v104_v26 }
 0x116   :  { %v107_v27 = vpop.f32.mrf.mxu2 }
 0x117   :  { %112 = vst.msk [vmem:[%s245_s5 + $0x8] sm:$0xff] %vm110_vm3, %v107_v27 }

// kernel: decoder_layer.10
= control target key start
LH: loop header
LB: loop body
LE: loop exit
PB: predicated region body
PF: predicated region fallthrough
CT: control target
= control target key end

     0   :  { %vm51_vm0 = vcmask 261120   ;;  %v168_v14 = vmov 32.0   ;;  %s241_s1 = inlined_call_operand.vmem [shape: bf16[32,32], index: 1, kind: input, shape index: {}]   ;;  %s242_s2 = inlined_call_operand.vmem [shape: f32[1,32], index: 2, kind: input, shape index: {}]   ;;  %s243_s0 = inlined_call_operand.vmem [shape: bf16[16,32], index: 0, kind: input, shape index: {}]   ;;  %s244_s3 = inlined_call_operand.vmem [shape: f32[16,32], index: 3, kind: input, shape index: {}]   ;;  %s245_s4 = inlined_call_operand.vmem [shape: f32[1,32], index: 4, kind: input, shape index: {}]   ;;  %s246_s5 = inlined_call_operand.vmem [shape: f32[1,32], index: 5, kind: input, shape index: {}]   ;;  %s247_s6 = inlined_call_operand.vmem [shape: f32[16,32], index: 6, kind: output, shape index: {}]  }
   0x1   :  { %v157_v0 = vld [vmem:[%s241_s1 + $0x8] sm:$0xff]  ;;  %v156_v1 = vld [vmem:[%s241_s1] sm:$0xff]  ;;  %162 = vrcp.f32 %v168_v14 }
   0x2   :  { %61 = vmatpush.bf16.msra.mxu0 %v157_v0  ;;  %v155_v2 = vld [vmem:[%s243_s0] sm:$0xff]  ;;  %v70_v10 = vld [vmem:[%s244_s3 + $0x8] sm:$0xff] }
   0x3   :  { %v159_v3 = vld [vmem:[%s242_s2] ss:$0 sm:$0xff] }
   0x4   :  { %v69_v5 = vld [vmem:[%s244_s3] sm:$0xff] }
   0x5   :  { %v160_v45 = vld [vmem:[%s245_s4] ss:$0 sm:$0xff] }
   0x6   :  { %62 = vmatpush.bf16.msra.mxu0 %v156_v1  ;;  %v161_v48 = vld [vmem:[%s246_s5] ss:$0 sm:$0xff] }
   0x7   :  { %v163_v15 = vpop.eup %162 }
   0x8   :  { %v82_v16 = vmul.f32 32.0, %v163_v15  ;;  %vm86_vm1 = vweird.f32 %v163_v15 }
   0x9   :  { %154 = vmatmul.msk.bf16.vlgmr.msra.gmra.mxu0 %vm51_vm0, %v155_v2 }
   0xa   :  { %v83_v17 = vsub.f32 1.0, %v82_v16 }
   0xc   :  { %v84_v18 = vmul.f32 %v163_v15, %v83_v17 }
   0xe   :  { %v85_v19 = vadd.f32 %v163_v15, %v84_v18 }
  0x10   :  { %v87_v20 = vsel %vm86_vm1, %v163_v15, %v85_v19 }
  0x86   :  { %v64_v4 = vpop.f32.mrf.mxu0 }
  0x87   :  { %v65_v6 = vadd.f32 %v159_v3, %v64_v4 }
  0x89   :  { %v71_v7 = vadd.f32 %v69_v5, %v65_v6 }
  0x8b   :  { %v75_v8 = vsel %vm51_vm0, %v71_v7, 0.0 }
  0x8c   :  { %76 = vadd.xlane.f32.xlu0 %v75_v8 }
  0x8e   :  { %v66_v9 = vpop.f32.mrf.mxu0 }
  0x8f   :  { %v67_v11 = vadd.f32 %v159_v3, %v66_v9 }
  0x91   :  { %v72_v12 = vadd.f32 %v70_v10, %v67_v11 }
  0x93   :  { %v78_v13 = vsel %vm51_vm0, %v72_v12, 0.0 }
  0x94   :  { %79 = vadd.xlane.f32.xlu0 %v78_v13 }
  0xff   :  { %v77_v21 = vpop.xlane.xlu0 %76 }
 0x100   :  { %v88_v22 = vmul.f32 %v87_v20, %v77_v21 }
 0x102   :  { %v90_v23 = vsub.f32 %v71_v7, %v88_v22 }
 0x104   :  { %v92_v24 = vmul.f32 %v90_v23, %v90_v23 }
 0x106   :  { %v94_v25 = vsel %vm51_vm0, %v92_v24, 0.0 }
 0x107   :  { %95 = vadd.xlane.f32.xlu1 %v94_v25  ;;  %v80_v26 = vpop.xlane.xlu0 %79 }
 0x108   :  { %v89_v27 = vmul.f32 %v87_v20, %v80_v26 }
 0x10a   :  { %v91_v28 = vsub.f32 %v72_v12, %v89_v27 }
 0x10c   :  { %v93_v29 = vmul.f32 %v91_v28, %v91_v28 }
 0x10e   :  { %v97_v30 = vsel %vm51_vm0, %v93_v29, 0.0 }
 0x10f   :  { %98 = vadd.xlane.f32.xlu1 %v97_v30 }
 0x17a   :  { %v96_v31 = vpop.xlane.xlu1 %95 }
 0x17b   :  { %v100_v32 = vmul.f32 %v96_v31, %v87_v20 }
 0x17d   :  { %v102_v33 = vadd.f32 1e-05, %v100_v32 }
 0x17f   :  { %164 = vrsqrt.f32 %v102_v33  ;;  %vm110_vm3 = vweird.f32 %v102_v33 }
 0x182   :  { %v99_v34 = vpop.xlane.xlu1 %98 }
 0x183   :  { %v101_v35 = vmul.f32 %v99_v34, %v87_v20 }
 0x185   :  { %v165_v36 = vpop.eup %164  ;;  %v103_v37 = vadd.f32 1e-05, %v101_v35 }
 0x186   :  { %v105_v38 = vmul.f32 %v165_v36, %v102_v33  ;;  %vm111_vm2 = vweird.f32 %v165_v36 }
 0x187   :  { %166 = vrsqrt.f32 %v103_v37  ;;  %vm112_vm4 = vmor %vm110_vm3, %vm111_vm2  ;;  %vm120_vm6 = vweird.f32 %v103_v37 }
 0x188   :  { %v106_v39 = vmul.f32 %v165_v36, %v105_v38 }
 0x18a   :  { %v107_v40 = vmul.f32 0.5, %v106_v39 }
 0x18c   :  { %v108_v41 = vsub.f32 1.5, %v107_v40 }
 0x18d   :  { %v167_v42 = vpop.eup %166 }
 0x18e   :  { %v109_v43 = vmul.f32 %v165_v36, %v108_v41  ;;  %v115_v44 = vmul.f32 %v167_v42, %v103_v37  ;;  %vm121_vm5 = vweird.f32 %v167_v42 }
 0x18f   :  { %vm122_vm7 = vmor %vm120_vm6, %vm121_vm5 }
 0x190   :  { %v113_v46 = vsel %vm112_vm4, %v165_v36, %v109_v43  ;;  %v116_v47 = vmul.f32 %v167_v42, %v115_v44 }
 0x191   :  { %v124_v49 = vmul.f32 %v113_v46, %v90_v23 }
 0x192   :  { %v117_v50 = vmul.f32 0.5, %v116_v47 }
 0x193   :  { %v129_v51 = vmul.f32 %v160_v45, %v124_v49 }
 0x194   :  { %v118_v52 = vsub.f32 1.5, %v117_v50 }
 0x195   :  { %v134_v53 = vadd.f32 %v161_v48, %v129_v51 }
 0x196   :  { %v119_v54 = vmul.f32 %v167_v42, %v118_v52 }
 0x197   :  { %136 = vst.msk [vmem:[%s247_s6] sm:$0xff] %vm51_vm0, %v134_v53 }
 0x198   :  { %v123_v55 = vsel %vm122_vm7, %v167_v42, %v119_v54 }
 0x199   :  { %v125_v56 = vmul.f32 %v123_v55, %v91_v28 }
 0x19b   :  { %v130_v57 = vmul.f32 %v160_v45, %v125_v56 }
 0x19d   :  { %v135_v58 = vadd.f32 %v161_v48, %v130_v57 }
 0x19f   :  { %137 = vst.msk [vmem:[%s247_s6 + $0x8] sm:$0xff] %vm51_vm0, %v135_v58 }

// kernel: decoder_layer.12
= control target key start
LH: loop header
LB: loop body
LE: loop exit
PB: predicated region body
PF: predicated region fallthrough
CT: control target
= control target key end

     0   :  { %vm38_vm0 = vcmask 261120   ;;  %vm58_vm1 = vcmask 519168   ;;  %s118_s1 = inlined_call_operand.vmem [shape: bf16[32,64], index: 1, kind: input, shape index: {}]   ;;  %s119_s0 = inlined_call_operand.vmem [shape: f32[16,32], index: 0, kind: input, shape index: {}]   ;;  %s120_s2 = inlined_call_operand.vmem [shape: f32[1,64], index: 2, kind: input, shape index: {}]   ;;  %s121_s3 = inlined_call_operand.vmem [shape: bf16[16,64], index: 3, kind: output, shape index: {}]  }
   0x1   :  { %v75_v0 = vld [vmem:[%s118_s1 + $0x8] sm:$0xff]  ;;  %v74_v1 = vld [vmem:[%s118_s1] sm:$0xff] }
   0x2   :  { %48 = vmatpush.bf16.msra.mxu0 %v75_v0  ;;  %v15_v2 = vld [vmem:[%s119_s0] sm:$0xff]  ;;  %v16_v3 = vld [vmem:[%s119_s0 + $0x8] sm:$0xff] }
   0x3   :  { %v17_v4 = vpack.c.bf16 %v16_v3, %v15_v2  ;;  %v76_v5 = vld [vmem:[%s120_s2] ss:$0 sm:$0xff] }
   0x6   :  { %49 = vmatpush.bf16.msra.mxu0 %v74_v1 }
   0x9   :  { %73 = vmatmul.msk.bf16.vlgmr.msra.gmra.mxu0 %vm38_vm0, %v17_v4 }
  0x86   :  { %v51_v6 = vpop.f32.mrf.mxu0 }
  0x87   :  { %v52_v7 = vadd.f32 %v76_v5, %v51_v6 }
  0x89   :  { %v56_v8 = vpack.c.bf16 %v52_v7, %v52_v7 }
  0x8b   :  { %59 = vst.msk [vmem:[%s121_s3] sm:$0xf] %vm58_vm1, %v56_v8 }
  0x8e   :  { %v53_v9 = vpop.f32.mrf.mxu0 }
  0x8f   :  { %v54_v10 = vadd.f32 %v76_v5, %v53_v9 }
  0x91   :  { %v57_v11 = vpack.c.bf16 %v54_v10, %v54_v10 }
  0x93   :  { %60 = vst.msk [vmem:[%s121_s3 + $0x4] sm:$0xf] %vm58_vm1, %v57_v11 }

// kernel: decoder_layer.11
= control target key start
LH: loop header
LB: loop body
LE: loop exit
PB: predicated region body
PF: predicated region fallthrough
CT: control target
= control target key end

     0   :  { %vm43_vm0 = vcmask 261120   ;;  %vm63_vm1 = vcmask 257024   ;;  %vm101_vm2 = vcmask 31744   ;;  %s198_s1 = inlined_call_operand.vmem [shape: bf16[32,32], index: 1, kind: input, shape index: {}]   ;;  %s199_s0 = inlined_call_operand.vmem [shape: f32[16,32], index: 0, kind: input, shape index: {}]   ;;  %s200_s3 = inlined_call_operand.vmem [shape: f32[32,4], index: 3, kind: input, shape index: {}]   ;;  %s201_s2 = inlined_call_operand.vmem [shape: f32[1,32], index: 2, kind: input, shape index: {}]   ;;  %s202_s4 = inlined_call_operand.vmem [shape: bf16[16,32], index: 4, kind: output, shape index: {0}]   ;;  %s203_s5 = inlined_call_operand.vmem [shape: f32[16,4], index: 5, kind: output, shape index: {1}]  }
   0x1   :  { %v124_v0 = vld [vmem:[%s198_s1 + $0x8] sm:$0xff]  ;;  %v71_v1 = vld [vmem:[%s200_s3 + $0x18] sm:$0xff]  ;;  %v123_v2 = vld [vmem:[%s198_s1] sm:$0xff] }
   0x2   :  { %53 = vmatpush.bf16.msra.mxu0 %v124_v0  ;;  %v20_v3 = vld [vmem:[%s199_s0] sm:$0xff]  ;;  %v21_v4 = vld [vmem:[%s199_s0 + $0x8] sm:$0xff]  ;;  %90 = vmatpush.msra.mxu1 %v71_v1  ;;  %v70_v6 = vld [vmem:[%s200_s3 + $0x10] sm:$0xff] }
   0x3   :  { %v22_v5 = vpack.c.bf16 %v21_v4, %v20_v3  ;;  %v69_v7 = vld [vmem:[%s200_s3 + $0x8] sm:$0xff]  ;;  %v68_v8 = vld [vmem:[%s200_s3] sm:$0xff] }
   0x4   :  { %91 = vmatpush.msra.mxu1 %v70_v6  ;;  %v125_v9 = vld [vmem:[%s201_s2] ss:$0 sm:$0xff] }
   0x6   :  { %54 = vmatpush.bf16.msra.mxu0 %v123_v2  ;;  %92 = vmatpush.msra.mxu1 %v69_v7 }
   0x8   :  { %93 = vmatpush.msra.mxu1 %v68_v8 }
   0x9   :  { %120 = vmatmul.msk.bf16.vlgmr.msra.gmra.mxu0 %vm43_vm0, %v22_v5 }
  0x86   :  { %v56_v10 = vpop.f32.mrf.mxu0 }
  0x87   :  { %v57_v11 = vadd.f32 %v125_v9, %v56_v10 }
  0x89   :  { %v61_v12 = vpack.c.bf16 %v57_v11, %v57_v11  ;;  %v66_v13 = vmul.f32 %v57_v11, %v57_v11 }
  0x8b   :  { %64 = vst.msk [vmem:[%s202_s4] sm:$0xf] %vm63_vm1, %v61_v12  ;;  %121 = vmatmul.msk.f32.vlgmr.msra.gmra.mxu1 %vm43_vm0, %v66_v13 }
  0x8e   :  { %v58_v14 = vpop.f32.mrf.mxu0 }
  0x8f   :  { %v59_v15 = vadd.f32 %v125_v9, %v58_v14 }
  0x91   :  { %v62_v16 = vpack.c.bf16 %v59_v15, %v59_v15  ;;  %v67_v17 = vmul.f32 %v59_v15, %v59_v15 }
  0x93   :  { %65 = vst.msk [vmem:[%s202_s4 + $0x4] sm:$0xf] %vm63_vm1, %v62_v16  ;;  %122 = vmatmul.msk.f32.gmra.mxu1 %vm43_vm0, %v67_v17 }
 0x108   :  { %v95_v18 = vpop.f32.mrf.mxu1 }
 0x109   :  { %102 = vst.msk [vmem:[%s203_s5] sm:$0xff] %vm101_vm2, %v95_v18 }
 0x110   :  { %v98_v19 = vpop.f32.mrf.mxu1 }
 0x111   :  { %103 = vst.msk [vmem:[%s203_s5 + $0x8] sm:$0xff] %vm101_vm2, %v98_v19 }

// kernel: decoder_layer.9
= control target key start
LH: loop header
LB: loop body
LE: loop exit
PB: predicated region body
PF: predicated region fallthrough
CT: control target
= control target key end

     0   :  { %vm478_vm0 = vcmask 64512   ;;  %vm4642_vm2 = vcmask 60416   ;;  %s9229_s1 = inlined_call_operand.vmem [shape: bf16[8,128,8], index: 1, kind: input, shape index: {}]   ;;  %s9230_s0 = inlined_call_operand.vmem [shape: bf16[8,128,8], index: 0, kind: input, shape index: {}]   ;;  %s9231_s2 = inlined_call_operand.vmem [shape: bf16[8,128,8], index: 2, kind: input, shape index: {}]   ;;  %s9232_s3 = inlined_call_operand.vmem [shape: bf16[8,128,8], index: 3, kind: output, shape index: {}]  }
   0x1   :  { %v5678_v0 = vld [vmem:[%s9229_s1 + $0x38] sm:$0xff]  ;;  %v5677_v8 = vld [vmem:[%s9229_s1 + $0x30] sm:$0xff]  ;;  %v5676_v16 = vld [vmem:[%s9229_s1 + $0x28] sm:$0xff] }
   0x2   :  { %v5686_v1 = vld [vmem:[%s9229_s1 + $0x78] sm:$0xff]  ;;  %v525_v4 = vsel %vm478_vm0, %v5678_v0, 0  ;;  %v5685_v9 = vld [vmem:[%s9229_s1 + $0x70] sm:$0xff]  ;;  %v522_v12 = vsel %vm478_vm0, %v5677_v8, 0  ;;  %v5684_v17 = vld [vmem:[%s9229_s1 + $0x68] sm:$0xff]  ;;  %v519_v20 = vsel %vm478_vm0, %v5676_v16, 0 }
   0x3   :  { %v5694_v2 = vld [vmem:[%s9229_s1 + $0xb8] sm:$0xff]  ;;  %v702_v5 = vsel %vm478_vm0, %v5686_v1, 0  ;;  %527 = vmatpush.bf16.xpose.msra.mxu0 %v525_v4  ;;  %v5693_v10 = vld [vmem:[%s9229_s1 + $0xb0] sm:$0xff]  ;;  %v699_v13 = vsel %vm478_vm0, %v5685_v9, 0  ;;  %v5692_v18 = vld [vmem:[%s9229_s1 + $0xa8] sm:$0xff]  ;;  %v696_v21 = vsel %vm478_vm0, %v5684_v17, 0 }
   0x4   :  { %v5702_v3 = vld [vmem:[%s9229_s1 + $0xf8] sm:$0xff]  ;;  %v879_v6 = vsel %vm478_vm0, %v5694_v2, 0  ;;  %704 = vmatpush.bf16.xpose.msra.mxu1 %v702_v5  ;;  %v5701_v11 = vld [vmem:[%s9229_s1 + $0xf0] sm:$0xff]  ;;  %v876_v14 = vsel %vm478_vm0, %v5693_v10, 0  ;;  %v5700_v19 = vld [vmem:[%s9229_s1 + $0xe8] sm:$0xff]  ;;  %v873_v22 = vsel %vm478_vm0, %v5692_v18, 0 }
   0x5   :  { %v1056_v7 = vsel %vm478_vm0, %v5702_v3, 0  ;;  %881 = vmatpush.bf16.xpose.msra.mxu2 %v879_v6  ;;  %v1053_v15 = vsel %vm478_vm0, %v5701_v11, 0  ;;  %v1050_v23 = vsel %vm478_vm0, %v5700_v19, 0  ;;  %v5675_v24 = vld [vmem:[%s9229_s1 + $0x20] sm:$0xff]  ;;  %v5674_v32 = vld [vmem:[%s9229_s1 + $0x18] sm:$0xff]  ;;  %v5673_v40 = vld [vmem:[%s9229_s1 + $0x10] sm:$0xff] }
   0x6   :  { %1058 = vmatpush.bf16.xpose.msra.mxu3 %v1056_v7  ;;  %v5683_v25 = vld [vmem:[%s9229_s1 + $0x60] sm:$0xff]  ;;  %v516_v28 = vsel %vm478_vm0, %v5675_v24, 0  ;;  %v5682_v33 = vld [vmem:[%s9229_s1 + $0x58] sm:$0xff]  ;;  %v513_v36 = vsel %vm478_vm0, %v5674_v32, 0  ;;  %v5681_v41 = vld [vmem:[%s9229_s1 + $0x50] sm:$0xff]  ;;  %v510_v44 = vsel %vm478_vm0, %v5673_v40, 0 }
   0x7   :  { %v5691_v26 = vld [vmem:[%s9229_s1 + $0xa0] sm:$0xff]  ;;  %v693_v29 = vsel %vm478_vm0, %v5683_v25, 0  ;;  %v5690_v34 = vld [vmem:[%s9229_s1 + $0x98] sm:$0xff]  ;;  %v690_v37 = vsel %vm478_vm0, %v5682_v33, 0  ;;  %v5689_v42 = vld [vmem:[%s9229_s1 + $0x90] sm:$0xff]  ;;  %v687_v45 = vsel %vm478_vm0, %v5681_v41, 0 }
   0x8   :  { %v5699_v27 = vld [vmem:[%s9229_s1 + $0xe0] sm:$0xff]  ;;  %v870_v30 = vsel %vm478_vm0, %v5691_v26, 0  ;;  %v5698_v35 = vld [vmem:[%s9229_s1 + $0xd8] sm:$0xff]  ;;  %v867_v38 = vsel %vm478_vm0, %v5690_v34, 0  ;;  %v5697_v43 = vld [vmem:[%s9229_s1 + $0xd0] sm:$0xff]  ;;  %v864_v46 = vsel %vm478_vm0, %v5689_v42, 0 }
   0x9   :  { %v1047_v31 = vsel %vm478_vm0, %v5699_v27, 0  ;;  %v1044_v39 = vsel %vm478_vm0, %v5698_v35, 0  ;;  %v1041_v47 = vsel %vm478_vm0, %v5697_v43, 0  ;;  %v5672_v48 = vld [vmem:[%s9229_s1 + $0x8] sm:$0xff]  ;;  %v5671_v56 = vld [vmem:[%s9229_s1] sm:$0xff]  ;;  %v5710_v4 = vld [vmem:[%s9229_s1 + $0x138] sm:$0xff] }
   0xa   :  { %v5680_v49 = vld [vmem:[%s9229_s1 + $0x48] sm:$0xff]  ;;  %v507_v52 = vsel %vm478_vm0, %v5672_v48, 0  ;;  %v5679_v57 = vld [vmem:[%s9229_s1 + $0x40] sm:$0xff]  ;;  %v504_v60 = vsel %vm478_vm0, %v5671_v56, 0  ;;  %v5718_v5 = vld [vmem:[%s9229_s1 + $0x178] sm:$0xff]  ;;  %v1233_v7 = vsel %vm478_vm0, %v5710_v4, 0 }
   0xb   :  { %528 = vmatpush.bf16.xpose.msra.mxu0 %v522_v12  ;;  %v5688_v50 = vld [vmem:[%s9229_s1 + $0x88] sm:$0xff]  ;;  %v684_v53 = vsel %vm478_vm0, %v5680_v49, 0  ;;  %v5687_v58 = vld [vmem:[%s9229_s1 + $0x80] sm:$0xff]  ;;  %v681_v61 = vsel %vm478_vm0, %v5679_v57, 0  ;;  %v5734_v6 = vld [vmem:[%s9229_s1 + $0x1f8] sm:$0xff]  ;;  %v1410_v8 = vsel %vm478_vm0, %v5718_v5, 0 }
   0xc   :  { %705 = vmatpush.bf16.xpose.msra.mxu1 %v699_v13  ;;  %v5696_v51 = vld [vmem:[%s9229_s1 + $0xc8] sm:$0xff]  ;;  %v861_v54 = vsel %vm478_vm0, %v5688_v50, 0  ;;  %v5695_v59 = vld [vmem:[%s9229_s1 + $0xc0] sm:$0xff]  ;;  %v858_v62 = vsel %vm478_vm0, %v5687_v58, 0  ;;  %v1764_v9 = vsel %vm478_vm0, %v5734_v6, 0  ;;  %v5717_v16 = vld [vmem:[%s9229_s1 + $0x170] sm:$0xff] }
   0xd   :  { %882 = vmatpush.bf16.xpose.msra.mxu2 %v876_v14  ;;  %v1038_v55 = vsel %vm478_vm0, %v5696_v51, 0  ;;  %v1035_v63 = vsel %vm478_vm0, %v5695_v59, 0  ;;  %v5607_v0 = vld [vmem:[%s9230_s0] sm:$0xff]  ;;  %v5608_v10 = vld [vmem:[%s9230_s0 + $0x8] sm:$0xff]  ;;  %v5726_v14 = vld [vmem:[%s9229_s1 + $0x1b8] sm:$0xff] }
   0xe   :  { %1059 = vmatpush.bf16.xpose.msra.mxu3 %v1053_v15  ;;  %v5615_v1 = vld [vmem:[%s9230_s0 + $0x40] sm:$0xff]  ;;  %v5616_v11 = vld [vmem:[%s9230_s0 + $0x48] sm:$0xff]  ;;  %v5709_v15 = vld [vmem:[%s9229_s1 + $0x130] sm:$0xff]  ;;  %v1587_v18 = vsel %vm478_vm0, %v5726_v14, 0 }
   0xf   :  { %v5623_v2 = vld [vmem:[%s9230_s0 + $0x80] sm:$0xff]  ;;  %v5624_v12 = vld [vmem:[%s9230_s0 + $0x88] sm:$0xff]  ;;  %v5733_v17 = vld [vmem:[%s9229_s1 + $0x1f0] sm:$0xff]  ;;  %v1230_v19 = vsel %vm478_vm0, %v5709_v15, 0 }
  0x10   :  { %v5631_v3 = vld [vmem:[%s9230_s0 + $0xc0] sm:$0xff]  ;;  %v5632_v13 = vld [vmem:[%s9230_s0 + $0xc8] sm:$0xff]  ;;  %v5625_v24 = vld [vmem:[%s9230_s0 + $0x90] sm:$0xff] }
  0x11   :  { %v5633_v25 = vld [vmem:[%s9230_s0 + $0xd0] sm:$0xff]  ;;  %v5708_v27 = vld [vmem:[%s9229_s1 + $0x128] sm:$0xff]  ;;  %v5707_v40 = vld [vmem:[%s9229_s1 + $0x120] sm:$0xff] }
  0x12   :  { %v5725_v26 = vld [vmem:[%s9229_s1 + $0x1b0] sm:$0xff]  ;;  %v5724_v34 = vld [vmem:[%s9229_s1 + $0x1a8] sm:$0xff]  ;;  %v5715_v41 = vld [vmem:[%s9229_s1 + $0x160] sm:$0xff]  ;;  %v1224_v43 = vsel %vm478_vm0, %v5707_v40, 0 }
  0x13   :  { %529 = vmatpush.bf16.xpose.msra.mxu0 %v519_v20  ;;  %v1407_v20 = vsel %vm478_vm0, %v5717_v16, 0  ;;  %v1581_v35 = vsel %vm478_vm0, %v5724_v34, 0  ;;  %v5731_v42 = vld [vmem:[%s9229_s1 + $0x1e0] sm:$0xff]  ;;  %v5706_v48 = vld [vmem:[%s9229_s1 + $0x118] sm:$0xff]  ;;  %v5612_v58 = vld [vmem:[%s9230_s0 + $0x28] sm:$0xff] }
  0x14   :  { %706 = vmatpush.bf16.xpose.msra.mxu1 %v696_v21  ;;  %v1761_v21 = vsel %vm478_vm0, %v5733_v17, 0  ;;  %v5714_v49 = vld [vmem:[%s9229_s1 + $0x158] sm:$0xff]  ;;  %v1221_v51 = vsel %vm478_vm0, %v5706_v48, 0  ;;  %v5627_v56 = vld [vmem:[%s9230_s0 + $0xa0] sm:$0xff]  ;;  %v5620_v59 = vld [vmem:[%s9230_s0 + $0x68] sm:$0xff] }
  0x15   :  { %883 = vmatpush.bf16.xpose.msra.mxu2 %v873_v22  ;;  %v5609_v22 = vld [vmem:[%s9230_s0 + $0x10] sm:$0xff]  ;;  %v5730_v50 = vld [vmem:[%s9229_s1 + $0x1d8] sm:$0xff]  ;;  %v5635_v57 = vld [vmem:[%s9230_s0 + $0xe0] sm:$0xff] }
  0x16   :  { %1060 = vmatpush.bf16.xpose.msra.mxu3 %v1050_v23  ;;  %v5617_v23 = vld [vmem:[%s9230_s0 + $0x50] sm:$0xff]  ;;  %v5614_v14 = vld [vmem:[%s9230_s0 + $0x38] sm:$0xff]  ;;  %v5704_v16 = vld [vmem:[%s9229_s1 + $0x108] sm:$0xff] }
  0x17   :  { %v5705_v4 = vld [vmem:[%s9229_s1 + $0x110] sm:$0xff]  ;;  %v5622_v15 = vld [vmem:[%s9230_s0 + $0x78] sm:$0xff]  ;;  %v5712_v17 = vld [vmem:[%s9229_s1 + $0x148] sm:$0xff] }
  0x18   :  { %v5713_v5 = vld [vmem:[%s9229_s1 + $0x150] sm:$0xff]  ;;  %v1218_v6 = vsel %vm478_vm0, %v5705_v4, 0 }
  0x1b   :  { %530 = vmatpush.bf16.xpose.msra.mxu0 %v516_v28  ;;  %v5716_v28 = vld [vmem:[%s9229_s1 + $0x168] sm:$0xff] }
  0x1c   :  { %707 = vmatpush.bf16.xpose.msra.mxu1 %v693_v29  ;;  %v1584_v29 = vsel %vm478_vm0, %v5725_v26, 0  ;;  %v1404_v32 = vsel %vm478_vm0, %v5716_v28, 0 }
  0x1d   :  { %884 = vmatpush.bf16.xpose.msra.mxu2 %v870_v30  ;;  %v5732_v30 = vld [vmem:[%s9229_s1 + $0x1e8] sm:$0xff] }
  0x1e   :  { %1061 = vmatpush.bf16.xpose.msra.mxu3 %v1047_v31  ;;  %v1227_v31 = vsel %vm478_vm0, %v5708_v27, 0  ;;  %v1758_v33 = vsel %vm478_vm0, %v5732_v30, 0  ;;  %v5720_v30 = vld [vmem:[%s9229_s1 + $0x188] sm:$0xff] }
  0x23   :  { %531 = vmatpush.bf16.xpose.msra.mxu0 %v513_v36  ;;  %v5610_v36 = vld [vmem:[%s9230_s0 + $0x18] sm:$0xff] }
  0x24   :  { %708 = vmatpush.bf16.xpose.msra.mxu1 %v690_v37  ;;  %v5618_v37 = vld [vmem:[%s9230_s0 + $0x58] sm:$0xff] }
  0x25   :  { %885 = vmatpush.bf16.xpose.msra.mxu2 %v867_v38  ;;  %v5626_v38 = vld [vmem:[%s9230_s0 + $0x98] sm:$0xff] }
  0x26   :  { %1062 = vmatpush.bf16.xpose.msra.mxu3 %v1044_v39  ;;  %v5634_v39 = vld [vmem:[%s9230_s0 + $0xd8] sm:$0xff] }
  0x2b   :  { %532 = vmatpush.bf16.xpose.msra.mxu0 %v510_v44  ;;  %v1401_v44 = vsel %vm478_vm0, %v5715_v41, 0 }
  0x2c   :  { %709 = vmatpush.bf16.xpose.msra.mxu1 %v687_v45  ;;  %v5723_v45 = vld [vmem:[%s9229_s1 + $0x1a0] sm:$0xff] }
  0x2d   :  { %886 = vmatpush.bf16.xpose.msra.mxu2 %v864_v46  ;;  %v1755_v46 = vsel %vm478_vm0, %v5731_v42, 0  ;;  %v5727_v42 = vld [vmem:[%s9229_s1 + $0x1c0] sm:$0xff] }
  0x2e   :  { %1063 = vmatpush.bf16.xpose.msra.mxu3 %v1041_v47  ;;  %v1578_v47 = vsel %vm478_vm0, %v5723_v45, 0  ;;  %v1743_v45 = vsel %vm478_vm0, %v5727_v42, 0 }
  0x33   :  { %533 = vmatpush.bf16.xpose.msra.mxu0 %v507_v52  ;;  %v1398_v52 = vsel %vm478_vm0, %v5714_v49, 0 }
  0x34   :  { %710 = vmatpush.bf16.xpose.msra.mxu1 %v684_v53  ;;  %v1752_v53 = vsel %vm478_vm0, %v5730_v50, 0 }
  0x35   :  { %887 = vmatpush.bf16.xpose.msra.mxu2 %v861_v54  ;;  %v5611_v54 = vld [vmem:[%s9230_s0 + $0x20] sm:$0xff] }
  0x36   :  { %1064 = vmatpush.bf16.xpose.msra.mxu3 %v1038_v55  ;;  %v5619_v55 = vld [vmem:[%s9230_s0 + $0x60] sm:$0xff] }
  0x3b   :  { %534 = vmatpush.bf16.xpose.msra.mxu0 %v504_v60  ;;  %v5628_v60 = vld [vmem:[%s9230_s0 + $0xa8] sm:$0xff] }
  0x3c   :  { %711 = vmatpush.bf16.xpose.msra.mxu1 %v681_v61  ;;  %v5636_v61 = vld [vmem:[%s9230_s0 + $0xe8] sm:$0xff] }
  0x3d   :  { %888 = vmatpush.bf16.xpose.msra.mxu2 %v858_v62  ;;  %v5613_v62 = vld [vmem:[%s9230_s0 + $0x30] sm:$0xff] }
  0x3e   :  { %1065 = vmatpush.bf16.xpose.msra.mxu3 %v1035_v63  ;;  %v5621_v63 = vld [vmem:[%s9230_s0 + $0x70] sm:$0xff] }
  0x42   :  { %4839 = vmatmul.msk.bf16.vlgmr.msra.gmra.mxu0 %vm478_vm0, %v5607_v0  ;;  %v5629_v0 = vld [vmem:[%s9230_s0 + $0xb0] sm:$0xff] }
  0x43   :  { %4911 = vmatmul.msk.bf16.vlgmr.msra.gmra.mxu1 %vm478_vm0, %v5615_v1  ;;  %1235 = vmatpush.bf16.xpose.msrb.mxu0 %v1233_v7  ;;  %v5637_v1 = vld [vmem:[%s9230_s0 + $0xf0] sm:$0xff]  ;;  %v1395_v7 = vsel %vm478_vm0, %v5713_v5, 0  ;;  %v5655_v5 = vld [vmem:[%s9230_s0 + $0x180] sm:$0xff] }
  0x44   :  { %4983 = vmatmul.msk.bf16.vlgmr.msra.gmra.mxu2 %vm478_vm0, %v5623_v2  ;;  %1412 = vmatpush.bf16.xpose.msrb.mxu1 %v1410_v8  ;;  %v5722_v2 = vld [vmem:[%s9229_s1 + $0x198] sm:$0xff]  ;;  %v5729_v8 = vld [vmem:[%s9229_s1 + $0x1d0] sm:$0xff] }
  0x45   :  { %5055 = vmatmul.msk.bf16.vlgmr.msra.gmra.mxu3 %vm478_vm0, %v5631_v3  ;;  %1589 = vmatpush.bf16.xpose.msrb.mxu2 %v1587_v18  ;;  %v1575_v3 = vsel %vm478_vm0, %v5722_v2, 0  ;;  %v5638_v18 = vld [vmem:[%s9230_s0 + $0xf8] sm:$0xff] }
  0x46   :  { %1766 = vmatpush.bf16.xpose.msrb.mxu3 %v1764_v9  ;;  %v1749_v9 = vsel %vm478_vm0, %v5729_v8, 0 }
  0x4b   :  { %1236 = vmatpush.bf16.xpose.msrb.mxu0 %v1230_v19  ;;  %v1215_v19 = vsel %vm478_vm0, %v5704_v16, 0 }
  0x4c   :  { %1413 = vmatpush.bf16.xpose.msrb.mxu1 %v1407_v20  ;;  %v1392_v20 = vsel %vm478_vm0, %v5712_v17, 0 }
  0x4d   :  { %1590 = vmatpush.bf16.xpose.msrb.mxu2 %v1584_v29 }
  0x4e   :  { %1767 = vmatpush.bf16.xpose.msrb.mxu3 %v1761_v21  ;;  %v5728_v21 = vld [vmem:[%s9229_s1 + $0x1c8] sm:$0xff] }
  0x52   :  { %4840 = vmatmul.msk.bf16.gmra.mxu0 %vm478_vm0, %v5608_v10  ;;  %v5630_v10 = vld [vmem:[%s9230_s0 + $0xb8] sm:$0xff] }
  0x53   :  { %4912 = vmatmul.msk.bf16.gmra.mxu1 %vm478_vm0, %v5616_v11  ;;  %1237 = vmatpush.bf16.xpose.msrb.mxu0 %v1227_v31  ;;  %v5721_v11 = vld [vmem:[%s9229_s1 + $0x190] sm:$0xff]  ;;  %v5703_v31 = vld [vmem:[%s9229_s1 + $0x100] sm:$0xff] }
  0x54   :  { %4984 = vmatmul.msk.bf16.gmra.mxu2 %vm478_vm0, %v5624_v12  ;;  %1414 = vmatpush.bf16.xpose.msrb.mxu1 %v1404_v32  ;;  %v1572_v12 = vsel %vm478_vm0, %v5721_v11, 0  ;;  %v5711_v32 = vld [vmem:[%s9229_s1 + $0x140] sm:$0xff]  ;;  %v1212_v34 = vsel %vm478_vm0, %v5703_v31, 0 }
  0x55   :  { %5056 = vmatmul.msk.bf16.gmra.mxu3 %vm478_vm0, %v5632_v13  ;;  %1591 = vmatpush.bf16.xpose.msrb.mxu2 %v1581_v35  ;;  %v1943_v13 = vlaneseq  ;;  %v1389_v35 = vsel %vm478_vm0, %v5711_v32, 0 }
  0x56   :  { %1768 = vmatpush.bf16.xpose.msrb.mxu3 %v1758_v33  ;;  %v1569_v33 = vsel %vm478_vm0, %v5720_v30, 0 }
  0x5b   :  { %1238 = vmatpush.bf16.xpose.msrb.mxu0 %v1224_v43 }
  0x5c   :  { %1415 = vmatpush.bf16.xpose.msrb.mxu1 %v1401_v44 }
  0x5d   :  { %1592 = vmatpush.bf16.xpose.msrb.mxu2 %v1578_v47  ;;  %v5647_v47 = vld [vmem:[%s9230_s0 + $0x140] sm:$0xff] }
  0x5e   :  { %1769 = vmatpush.bf16.xpose.msrb.mxu3 %v1755_v46  ;;  %v5639_v46 = vld [vmem:[%s9230_s0 + $0x100] sm:$0xff] }
  0x62   :  { %4841 = vmatmul.msk.bf16.gmra.mxu0 %vm478_vm0, %v5609_v22  ;;  %v6693_v22 = vand.u32 127, %v1943_v13 }
  0x63   :  { %4913 = vmatmul.msk.bf16.gmra.mxu1 %vm478_vm0, %v5617_v23  ;;  %1239 = vmatpush.bf16.xpose.msrb.mxu0 %v1221_v51  ;;  %v1746_v23 = vsel %vm478_vm0, %v5728_v21, 0 }
  0x64   :  { %4985 = vmatmul.msk.bf16.gmra.mxu2 %vm478_vm0, %v5625_v24  ;;  %1416 = vmatpush.bf16.xpose.msrb.mxu1 %v1398_v52  ;;  %vm1945_vm1 = vcmp.lt.s32.totalorder %v6693_v22, 4 }
  0x65   :  { %5057 = vmatmul.msk.bf16.gmra.mxu3 %vm478_vm0, %v5633_v25  ;;  %1593 = vmatpush.bf16.xpose.msrb.mxu2 %v1575_v3 }
  0x66   :  { %1770 = vmatpush.bf16.xpose.msrb.mxu3 %v1752_v53 }
  0x6b   :  { %1240 = vmatpush.bf16.xpose.msrb.mxu0 %v1218_v6 }
  0x6c   :  { %1417 = vmatpush.bf16.xpose.msrb.mxu1 %v1395_v7 }
  0x6d   :  { %1594 = vmatpush.bf16.xpose.msrb.mxu2 %v1572_v12 }
  0x6e   :  { %1771 = vmatpush.bf16.xpose.msrb.mxu3 %v1749_v9 }
  0x72   :  { %4842 = vmatmul.msk.bf16.gmra.mxu0 %vm478_vm0, %v5610_v36 }
  0x73   :  { %4914 = vmatmul.msk.bf16.gmra.mxu1 %vm478_vm0, %v5618_v37  ;;  %1241 = vmatpush.bf16.xpose.msrb.mxu0 %v1215_v19 }
  0x74   :  { %4986 = vmatmul.msk.bf16.gmra.mxu2 %vm478_vm0, %v5626_v38  ;;  %1418 = vmatpush.bf16.xpose.msrb.mxu1 %v1392_v20 }
  0x75   :  { %5058 = vmatmul.msk.bf16.gmra.mxu3 %vm478_vm0, %v5634_v39  ;;  %1595 = vmatpush.bf16.xpose.msrb.mxu2 %v1569_v33 }
  0x76   :  { %1772 = vmatpush.bf16.xpose.msrb.mxu3 %v1746_v23 }
  0x7b   :  { %1242 = vmatpush.bf16.xpose.msrb.mxu0 %v1212_v34 }
  0x7c   :  { %1419 = vmatpush.bf16.xpose.msrb.mxu1 %v1389_v35 }
  0x7e   :  { %1773 = vmatpush.bf16.xpose.msrb.mxu3 %v1743_v45 }
  0x82   :  { %4843 = vmatmul.msk.bf16.gmra.mxu0 %vm478_vm0, %v5611_v54 }
  0x83   :  { %4915 = vmatmul.msk.bf16.gmra.mxu1 %vm478_vm0, %v5619_v55 }
  0x84   :  { %4987 = vmatmul.msk.bf16.gmra.mxu2 %vm478_vm0, %v5627_v56  ;;  %v5719_v56 = vld [vmem:[%s9229_s1 + $0x180] sm:$0xff] }
  0x85   :  { %5059 = vmatmul.msk.bf16.gmra.mxu3 %vm478_vm0, %v5635_v57  ;;  %v5663_v57 = vld [vmem:[%s9230_s0 + $0x1c0] sm:$0xff] }
  0x92   :  { %4844 = vmatmul.msk.bf16.gmra.mxu0 %vm478_vm0, %v5612_v58 }
  0x93   :  { %4916 = vmatmul.msk.bf16.gmra.mxu1 %vm478_vm0, %v5620_v59 }
  0x94   :  { %4988 = vmatmul.msk.bf16.gmra.mxu2 %vm478_vm0, %v5628_v60  ;;  %v1566_v60 = vsel %vm478_vm0, %v5719_v56, 0 }
  0x95   :  { %5060 = vmatmul.msk.bf16.gmra.mxu3 %vm478_vm0, %v5636_v61  ;;  %1596 = vmatpush.bf16.xpose.msrb.mxu2 %v1566_v60 }
  0xa2   :  { %4845 = vmatmul.msk.bf16.gmra.mxu0 %vm478_vm0, %v5613_v62 }
  0xa3   :  { %4917 = vmatmul.msk.bf16.gmra.mxu1 %vm478_vm0, %v5621_v63 }
  0xa4   :  { %4989 = vmatmul.msk.bf16.gmra.mxu2 %vm478_vm0, %v5629_v0 }
  0xa5   :  { %5061 = vmatmul.msk.bf16.gmra.mxu3 %vm478_vm0, %v5637_v1 }
  0xb2   :  { %4846 = vmatmul.msk.bf16.gmra.mxu0 %vm478_vm0, %v5614_v14 }
  0xb3   :  { %4918 = vmatmul.msk.bf16.gmra.mxu1 %vm478_vm0, %v5622_v15 }
  0xb4   :  { %4990 = vmatmul.msk.bf16.gmra.mxu2 %vm478_vm0, %v5630_v10 }
  0xb5   :  { %5062 = vmatmul.msk.bf16.gmra.mxu3 %vm478_vm0, %v5638_v18 }
  0xbf   :  { %v536_v24 = vpop.f32.mrf.mxu0 }
  0xc0   :  { %v713_v25 = vpop.f32.mrf.mxu1  ;;  %v1815_v26 = vmul.f32 0.35355338, %v536_v24 }
  0xc1   :  { %v1831_v27 = vmul.f32 0.35355338, %v713_v25 }
  0xc2   :  { %v6704_v29 = vsel %vm1945_vm1, %v1815_v26, -1e+30  ;;  %5127 = vmatmul.msk.bf16.vlgmr.msrb.gmra.mxu0 %vm478_vm0, %v5639_v46 }
  0xc3   :  { %v6700_v28 = vsel %vm1945_vm1, %v1831_v27, -1e+30  ;;  %2074 = vmax.xlane.f32.xlu0 %v6704_v29  ;;  %5199 = vmatmul.msk.bf16.vlgmr.msrb.gmra.mxu1 %vm478_vm0, %v5647_v47 }
  0xc4   :  { %2106 = vmax.xlane.f32.xlu1 %v6700_v28  ;;  %5271 = vmatmul.msk.bf16.vlgmr.msrb.gmra.mxu2 %vm478_vm0, %v5655_v5 }
  0xc5   :  { %5343 = vmatmul.msk.bf16.vlgmr.msrb.gmra.mxu3 %vm478_vm0, %v5663_v57 }
  0xc7   :  { %v890_v36 = vpop.f32.mrf.mxu2  ;;  %v538_v40 = vpop.f32.mrf.mxu0 }
  0xc8   :  { %v1067_v37 = vpop.f32.mrf.mxu3  ;;  %v1847_v38 = vmul.f32 0.35355338, %v890_v36  ;;  %v715_v43 = vpop.f32.mrf.mxu1  ;;  %v1816_v49 = vmul.f32 0.35355338, %v538_v40 }
  0xc9   :  { %v1863_v39 = vmul.f32 0.35355338, %v1067_v37  ;;  %v1832_v48 = vmul.f32 0.35355338, %v715_v43 }
  0xca   :  { %v6722_v41 = vsel %vm1945_vm1, %v1847_v38, -1e+30  ;;  %v6760_v58 = vsel %vm1945_vm1, %v1816_v49, -1e+30  ;;  %v5648_v38 = vld [vmem:[%s9230_s0 + $0x148] sm:$0xff] }
  0xcb   :  { %2138 = vmax.xlane.f32.xlu2 %v6722_v41  ;;  %v6730_v44 = vsel %vm1945_vm1, %v1863_v39, -1e+30  ;;  %v6748_v55 = vsel %vm1945_vm1, %v1832_v48, -1e+30  ;;  %v5640_v49 = vld [vmem:[%s9230_s0 + $0x108] sm:$0xff] }
  0xcc   :  { %2170 = vmax.xlane.f32.xlu0 %v6730_v44 }
  0xcf   :  { %v892_v50 = vpop.f32.mrf.mxu2  ;;  %v541_v53 = vpop.f32.mrf.mxu0 }
  0xd0   :  { %v1069_v51 = vpop.f32.mrf.mxu3  ;;  %v1817_v59 = vmul.f32 0.35355338, %v541_v53  ;;  %v718_v61 = vpop.f32.mrf.mxu1  ;;  %v1848_v62 = vmul.f32 0.35355338, %v892_v50 }
  0xd1   :  { %v1864_v52 = vmul.f32 0.35355338, %v1069_v51  ;;  %v1833_v8 = vmul.f32 0.35355338, %v718_v61  ;;  %v5656_v61 = vld [vmem:[%s9230_s0 + $0x188] sm:$0xff] }
  0xd2   :  { %v6767_v2 = vsel %vm1945_vm1, %v1817_v59, -1e+30  ;;  %v6780_v6 = vsel %vm1945_vm1, %v1848_v62, -1e+30  ;;  %5128 = vmatmul.msk.bf16.gmra.mxu0 %vm478_vm0, %v5640_v49 }
  0xd3   :  { %v6744_v54 = vsel %vm1945_vm1, %v1864_v52, -1e+30  ;;  %2108 = vmax.xlane.f32.xlu2 %v6748_v55  ;;  %v6790_v13 = vsel %vm1945_vm1, %v1833_v8, -1e+30  ;;  %5200 = vmatmul.msk.bf16.gmra.mxu1 %vm478_vm0, %v5648_v38 }
  0xd4   :  { %2172 = vmax.xlane.f32.xlu1 %v6744_v54  ;;  %2076 = vmax.xlane.f32.xlu0 %v6760_v58 }
  0xd5   :  { %5272 = vmatmul.msk.bf16.gmra.mxu2 %vm478_vm0, %v5656_v61  ;;  %v5657_v61 = vld [vmem:[%s9230_s0 + $0x190] sm:$0xff] }
  0xd7   :  { %v895_v63 = vpop.f32.mrf.mxu2  ;;  %v543_v3 = vpop.f32.mrf.mxu0 }
  0xd8   :  { %v1072_v0 = vpop.f32.mrf.mxu3  ;;  %v1849_v7 = vmul.f32 0.35355338, %v895_v63  ;;  %v720_v10 = vpop.f32.mrf.mxu1  ;;  %v1818_v18 = vmul.f32 0.35355338, %v543_v3 }
  0xd9   :  { %v1865_v1 = vmul.f32 0.35355338, %v1072_v0  ;;  %v1834_v30 = vmul.f32 0.35355338, %v720_v10 }
  0xda   :  { %v6786_v12 = vsel %vm1945_vm1, %v1849_v7, -1e+30  ;;  %v6805_v23 = vsel %vm1945_vm1, %v1818_v18, -1e+30 }
  0xdb   :  { %v6771_v4 = vsel %vm1945_vm1, %v1865_v1, -1e+30  ;;  %v6824_v34 = vsel %vm1945_vm1, %v1834_v30, -1e+30 }
  0xdc   :  { %2174 = vmax.xlane.f32.xlu2 %v6771_v4  ;;  %2078 = vmax.xlane.f32.xlu1 %v6767_v2 }
  0xdd   :  { %2140 = vmax.xlane.f32.xlu0 %v6780_v6 }
  0xdf   :  { %v897_v9 = vpop.f32.mrf.mxu2  ;;  %v546_v14 = vpop.f32.mrf.mxu0 }
  0xe0   :  { %v1850_v11 = vmul.f32 0.35355338, %v897_v9  ;;  %v1074_v16 = vpop.f32.mrf.mxu3  ;;  %v1819_v17 = vmul.f32 0.35355338, %v546_v14  ;;  %v723_v21 = vpop.f32.mrf.mxu1  ;;  %v5664_v9 = vld [vmem:[%s9230_s0 + $0x1c8] sm:$0xff] }
  0xe1   :  { %v1866_v19 = vmul.f32 0.35355338, %v1074_v16  ;;  %v1835_v25 = vmul.f32 0.35355338, %v723_v21  ;;  %5344 = vmatmul.msk.bf16.gmra.mxu3 %vm478_vm0, %v5664_v9 }
  0xe2   :  { %v6794_v15 = vsel %vm1945_vm1, %v1850_v11, -1e+30  ;;  %v6801_v20 = vsel %vm1945_vm1, %v1819_v17, -1e+30 }
  0xe3   :  { %v6811_v24 = vsel %vm1945_vm1, %v1866_v19, -1e+30  ;;  %v6816_v31 = vsel %vm1945_vm1, %v1835_v25, -1e+30 }
  0xe4   :  { %2144 = vmax.xlane.f32.xlu2 %v6794_v15  ;;  %2142 = vmax.xlane.f32.xlu1 %v6786_v12 }
  0xe5   :  { %2110 = vmax.xlane.f32.xlu0 %v6790_v13  ;;  %5273 = vmatmul.msk.bf16.gmra.mxu2 %vm478_vm0, %v5657_v61 }
  0xe7   :  { %v900_v26 = vpop.f32.mrf.mxu2  ;;  %v548_v35 = vpop.f32.mrf.mxu0 }
  0xe8   :  { %v1851_v27 = vmul.f32 0.35355338, %v900_v26  ;;  %v1077_v32 = vpop.f32.mrf.mxu3  ;;  %v725_v37 = vpop.f32.mrf.mxu1  ;;  %v1820_v39 = vmul.f32 0.35355338, %v548_v35 }
  0xe9   :  { %v1867_v36 = vmul.f32 0.35355338, %v1077_v32  ;;  %v1836_v40 = vmul.f32 0.35355338, %v725_v37 }
  0xea   :  { %v6820_v33 = vsel %vm1945_vm1, %v1851_v27, -1e+30  ;;  %v6839_v45 = vsel %vm1945_vm1, %v1820_v39, -1e+30 }
  0xeb   :  { %v6835_v42 = vsel %vm1945_vm1, %v1867_v36, -1e+30  ;;  %v6845_v47 = vsel %vm1945_vm1, %v1836_v40, -1e+30 }
  0xec   :  { %2080 = vmax.xlane.f32.xlu1 %v6805_v23  ;;  %2082 = vmax.xlane.f32.xlu2 %v6801_v20 }
  0xed   :  { %2176 = vmax.xlane.f32.xlu0 %v6811_v24 }
  0xef   :  { %v902_v43 = vpop.f32.mrf.mxu2  ;;  %v551_v48 = vpop.f32.mrf.mxu0 }
  0xf0   :  { %v1079_v46 = vpop.f32.mrf.mxu3  ;;  %v1821_v50 = vmul.f32 0.35355338, %v551_v48  ;;  %v1852_v51 = vmul.f32 0.35355338, %v902_v43  ;;  %v728_v53 = vpop.f32.mrf.mxu1 }
  0xf1   :  { %v1868_v52 = vmul.f32 0.35355338, %v1079_v46  ;;  %v1837_v62 = vmul.f32 0.35355338, %v728_v53 }
  0xf2   :  { %v6854_v56 = vsel %vm1945_vm1, %v1821_v50, -1e+30  ;;  %v6858_v59 = vsel %vm1945_vm1, %v1852_v51, -1e+30 }
  0xf3   :  { %v6862_v60 = vsel %vm1945_vm1, %v1868_v52, -1e+30  ;;  %v6873_v3 = vsel %vm1945_vm1, %v1837_v62, -1e+30 }
  0xf4   :  { %2112 = vmax.xlane.f32.xlu1 %v6824_v34  ;;  %2114 = vmax.xlane.f32.xlu2 %v6816_v31 }
  0xf5   :  { %2146 = vmax.xlane.f32.xlu0 %v6820_v33 }
  0xf7   :  { %v905_v57 = vpop.f32.mrf.mxu2  ;;  %v553_v7 = vpop.f32.mrf.mxu0 }
  0xf8   :  { %v1853_v63 = vmul.f32 0.35355338, %v905_v57  ;;  %v1082_v0 = vpop.f32.mrf.mxu3  ;;  %v730_v10 = vpop.f32.mrf.mxu1  ;;  %v1822_v14 = vmul.f32 0.35355338, %v553_v7 }
  0xf9   :  { %v1869_v1 = vmul.f32 0.35355338, %v1082_v0  ;;  %v1838_v16 = vmul.f32 0.35355338, %v730_v10  ;;  %v5649_v10 = vld [vmem:[%s9230_s0 + $0x150] sm:$0xff] }
  0xfa   :  { %v6877_v5 = vsel %vm1945_vm1, %v1853_v63, -1e+30  ;;  %v6896_v25 = vsel %vm1945_vm1, %v1822_v14, -1e+30  ;;  %5201 = vmatmul.msk.bf16.gmra.mxu1 %vm478_vm0, %v5649_v10 }
  0xfb   :  { %v6881_v8 = vsel %vm1945_vm1, %v1869_v1, -1e+30  ;;  %v6892_v21 = vsel %vm1945_vm1, %v1838_v16, -1e+30 }
  0xfc   :  { %2178 = vmax.xlane.f32.xlu1 %v6835_v42  ;;  %2084 = vmax.xlane.f32.xlu2 %v6839_v45 }
  0xfd   :  { %2116 = vmax.xlane.f32.xlu0 %v6845_v47 }
  0xff   :  { %v907_v11 = vpop.f32.mrf.mxu2  ;;  %v556_v19 = vpop.f32.mrf.mxu0 }
 0x100   :  { %v1854_v17 = vmul.f32 0.35355338, %v907_v11  ;;  %v1084_v18 = vpop.f32.mrf.mxu3  ;;  %v1823_v27 = vmul.f32 0.35355338, %v556_v19  ;;  %v733_v30 = vpop.f32.mrf.mxu1 }
 0x101   :  { %v1839_v32 = vmul.f32 0.35355338, %v733_v30  ;;  %v1870_v35 = vmul.f32 0.35355338, %v1084_v18 }
 0x102   :  { %v6902_v26 = vsel %vm1945_vm1, %v1854_v17, -1e+30  ;;  %v6907_v36 = vsel %vm1945_vm1, %v1823_v27, -1e+30 }
 0x103   :  { %9331 = vst [vmem:[#allocation2_spill] sm:$0xff] %v6907_v36  ;;  %v6911_v38 = vsel %vm1945_vm1, %v1839_v32, -1e+30  ;;  %v6915_v40 = vsel %vm1945_vm1, %v1870_v35, -1e+30 }
 0x104   :  { %2148 = vmax.xlane.f32.xlu1 %v6858_v59  ;;  %2180 = vmax.xlane.f32.xlu2 %v6862_v60  ;;  %9332 = vst [vmem:[#allocation3_spill] sm:$0xff] %v6911_v38 }
 0x105   :  { %2086 = vmax.xlane.f32.xlu0 %v6854_v56 }
 0x107   :  { %v910_v37 = vpop.f32.mrf.mxu2  ;;  %v558_v46 = vpop.f32.mrf.mxu0 }
 0x108   :  { %v1087_v39 = vpop.f32.mrf.mxu3  ;;  %v1855_v43 = vmul.f32 0.35355338, %v910_v37  ;;  %v1824_v49 = vmul.f32 0.35355338, %v558_v46  ;;  %v735_v52 = vpop.f32.mrf.mxu1 }
 0x109   :  { %v1871_v48 = vmul.f32 0.35355338, %v1087_v39  ;;  %v1840_v63 = vmul.f32 0.35355338, %v735_v52  ;;  %v5641_v39 = vld [vmem:[%s9230_s0 + $0x110] sm:$0xff] }
 0x10a   :  { %v6922_v50 = vsel %vm1945_vm1, %v1855_v43, -1e+30  ;;  %v6932_v57 = vsel %vm1945_vm1, %v1824_v49, -1e+30  ;;  %5129 = vmatmul.msk.bf16.gmra.mxu0 %vm478_vm0, %v5641_v39 }
 0x10b   :  { %9333 = vst [vmem:[#allocation4_spill] sm:$0xff] %v6922_v50  ;;  %v6926_v51 = vsel %vm1945_vm1, %v1871_v48, -1e+30  ;;  %v6944_v11 = vsel %vm1945_vm1, %v1840_v63, -1e+30 }
 0x10c   :  { %2118 = vmax.xlane.f32.xlu1 %v6873_v3  ;;  %2150 = vmax.xlane.f32.xlu2 %v6877_v5  ;;  %9334 = vst [vmem:[#allocation5_spill] sm:$0xff] %v6926_v51 }
 0x10d   :  { %2182 = vmax.xlane.f32.xlu0 %v6881_v8  ;;  %9335 = vst [vmem:[#allocation6_spill] sm:$0xff] %v6932_v57 }
 0x10e   :  { %9336 = vst [vmem:[#allocation7_spill] sm:$0xff] %v6944_v11 }
 0x10f   :  { %v912_v53 = vpop.f32.mrf.mxu2  ;;  %v561_v7 = vpop.f32.mrf.mxu0 }
 0x110   :  { %v1089_v62 = vpop.f32.mrf.mxu3  ;;  %v1856_v0 = vmul.f32 0.35355338, %v912_v53  ;;  %v738_v9 = vpop.f32.mrf.mxu1  ;;  %v1825_v17 = vmul.f32 0.35355338, %v561_v7 }
 0x111   :  { %v1872_v1 = vmul.f32 0.35355338, %v1089_v62  ;;  %v1841_v18 = vmul.f32 0.35355338, %v738_v9 }
 0x112   :  { %v6948_v14 = vsel %vm1945_vm1, %v1856_v0, -1e+30  ;;  %v6964_v32 = vsel %vm1945_vm1, %v1825_v17, -1e+30 }
 0x113   :  { %9337 = vst [vmem:[#allocation8_spill] sm:$0xff] %v6948_v14  ;;  %v6954_v16 = vsel %vm1945_vm1, %v1872_v1, -1e+30  ;;  %v6960_v30 = vsel %vm1945_vm1, %v1841_v18, -1e+30 }
 0x114   :  { %2120 = vmax.xlane.f32.xlu2 %v6892_v21  ;;  %2088 = vmax.xlane.f32.xlu1 %v6896_v25  ;;  %9338 = vst [vmem:[#allocation9_spill] sm:$0xff] %v6954_v16 }
 0x115   :  { %2152 = vmax.xlane.f32.xlu0 %v6902_v26  ;;  %9339 = vst [vmem:[#allocation10_spill] sm:$0xff] %v6960_v30 }
 0x116   :  { %9340 = vst [vmem:[#allocation11_spill] sm:$0xff] %v6964_v32 }
 0x117   :  { %v915_v19 = vpop.f32.mrf.mxu2  ;;  %v563_v43 = vpop.f32.mrf.mxu0 }
 0x118   :  { %v1857_v27 = vmul.f32 0.35355338, %v915_v19  ;;  %v1092_v35 = vpop.f32.mrf.mxu3  ;;  %v740_v48 = vpop.f32.mrf.mxu1  ;;  %v1826_v49 = vmul.f32 0.35355338, %v563_v43 }
 0x119   :  { %v1873_v46 = vmul.f32 0.35355338, %v1092_v35  ;;  %v1842_v52 = vmul.f32 0.35355338, %v740_v48 }
 0x11a   :  { %v6968_v37 = vsel %vm1945_vm1, %v1857_v27, -1e+30  ;;  %v6985_v63 = vsel %vm1945_vm1, %v1826_v49, -1e+30 }
 0x11b   :  { %9341 = vst [vmem:[#allocation12_spill] sm:$0xff] %v6968_v37  ;;  %v6981_v61 = vsel %vm1945_vm1, %v1873_v46, -1e+30  ;;  %v6991_v1 = vsel %vm1945_vm1, %v1842_v52, -1e+30 }
 0x11c   :  { %2184 = vmax.xlane.f32.xlu1 %v6915_v40  ;;  %2090 = vmax.xlane.f32.xlu2 %v6907_v36  ;;  %9342 = vst [vmem:[#allocation13_spill] sm:$0xff] %v6981_v61 }
 0x11d   :  { %2122 = vmax.xlane.f32.xlu0 %v6911_v38  ;;  %9343 = vst [vmem:[#allocation14_spill] sm:$0xff] %v6985_v63 }
 0x11e   :  { %9344 = vst [vmem:[#allocation15_spill] sm:$0xff] %v6991_v1 }
 0x11f   :  { %v917_v62 = vpop.f32.mrf.mxu2  ;;  %v566_v7 = vpop.f32.mrf.mxu0 }
 0x120   :  { %v1094_v0 = vpop.f32.mrf.mxu3  ;;  %v1827_v9 = vmul.f32 0.35355338, %v566_v7  ;;  %v1858_v10 = vmul.f32 0.35355338, %v917_v62  ;;  %v743_v35 = vpop.f32.mrf.mxu1 }
 0x121   :  { %v1874_v17 = vmul.f32 0.35355338, %v1094_v0  ;;  %v1843_v49 = vmul.f32 0.35355338, %v743_v35 }
 0x122   :  { %v7002_v39 = vsel %vm1945_vm1, %v1827_v9, -1e+30  ;;  %v7006_v46 = vsel %vm1945_vm1, %v1858_v10, -1e+30 }
 0x123   :  { %9345 = vst [vmem:[#allocation16_spill] sm:$0xff] %v7002_v39  ;;  %v7010_v48 = vsel %vm1945_vm1, %v1874_v17, -1e+30  ;;  %v7023_v17 = vsel %vm1945_vm1, %v1843_v49, -1e+30 }
 0x124   :  { %2154 = vmax.xlane.f32.xlu1 %v6922_v50  ;;  %2186 = vmax.xlane.f32.xlu2 %v6926_v51  ;;  %9346 = vst [vmem:[#allocation17_spill] sm:$0xff] %v7006_v46 }
 0x125   :  { %2092 = vmax.xlane.f32.xlu0 %v6932_v57  ;;  %9347 = vst [vmem:[#allocation18_spill] sm:$0xff] %v7010_v48 }
 0x126   :  { %9348 = vst [vmem:[#allocation19_spill] sm:$0xff] %v7023_v17 }
 0x127   :  { %v920_v43 = vpop.f32.mrf.mxu2  ;;  %v568_v35 = vpop.f32.mrf.mxu0 }
 0x128   :  { %v1859_v52 = vmul.f32 0.35355338, %v920_v43  ;;  %v1097_v62 = vpop.f32.mrf.mxu3 }
 0x129   :  { %v1875_v0 = vmul.f32 0.35355338, %v1097_v62  ;;  %v5642_v62 = vld [vmem:[%s9230_s0 + $0x118] sm:$0xff] }
 0x12a   :  { %5130 = vmatmul.msk.bf16.gmra.mxu0 %vm478_vm0, %v5642_v62 }
 0x12b   :  { %v7031_v43 = vsel %vm1945_vm1, %v1875_v0, -1e+30 }
 0x12c   :  { %2124 = vmax.xlane.f32.xlu1 %v6944_v11  ;;  %2156 = vmax.xlane.f32.xlu2 %v6948_v14  ;;  %9350 = vst [vmem:[#allocation21_spill] sm:$0xff] %v7031_v43 }
 0x12d   :  { %2188 = vmax.xlane.f32.xlu0 %v6954_v16 }
 0x12f   :  { %v922_v49 = vpop.f32.mrf.mxu2 }
 0x134   :  { %2126 = vmax.xlane.f32.xlu2 %v6960_v30  ;;  %2094 = vmax.xlane.f32.xlu1 %v6964_v32  ;;  %v571_v30 = vpop.f32.mrf.mxu0 }
 0x135   :  { %2158 = vmax.xlane.f32.xlu0 %v6968_v37  ;;  %v1829_v62 = vmul.f32 0.35355338, %v571_v30 }
 0x136   :  { %v6977_v53 = vpop.xlane.xlu0 %2074 }
 0x137   :  { %v6994_v18 = vpop.xlane.xlu1 %2106  ;;  %v7077_v32 = vsel %vm1945_vm1, %v1829_v62, -1e+30  ;;  %v925_v16 = vpop.f32.mrf.mxu2 }
 0x138   :  { %9354 = vst [vmem:[#allocation25_spill] sm:$0xff] %v7077_v32 }
 0x13c   :  { %2190 = vmax.xlane.f32.xlu1 %v6981_v61  ;;  %2096 = vmax.xlane.f32.xlu2 %v6985_v63  ;;  %v1860_v63 = vmul.f32 0.35355338, %v922_v49  ;;  %v1099_v61 = vpop.f32.mrf.mxu3 }
 0x13d   :  { %2128 = vmax.xlane.f32.xlu0 %v6991_v1 }
 0x13e   :  { %v6996_v19 = vpop.xlane.xlu2 %2138 }
 0x13f   :  { %v6998_v27 = vpop.xlane.xlu0 %2170 }
 0x144   :  { %2160 = vmax.xlane.f32.xlu1 %v7006_v46  ;;  %2192 = vmax.xlane.f32.xlu2 %v7010_v48  ;;  %v7027_v46 = vsel %vm1945_vm1, %v1859_v52, -1e+30  ;;  %v1828_v52 = vmul.f32 0.35355338, %v568_v35  ;;  %v7061_v35 = vsel %vm1945_vm1, %v1860_v63, -1e+30 }
 0x145   :  { %2098 = vmax.xlane.f32.xlu0 %v7002_v39  ;;  %9349 = vst [vmem:[#allocation20_spill] sm:$0xff] %v7027_v46  ;;  %v745_v39 = vpop.f32.mrf.mxu1 }
 0x146   :  { %v7017_v9 = vpop.xlane.xlu2 %2108  ;;  %v1844_v48 = vmul.f32 0.35355338, %v745_v39  ;;  %v5650_v39 = vld [vmem:[%s9230_s0 + $0x158] sm:$0xff]  ;;  %9353 = vst [vmem:[#allocation24_spill] sm:$0xff] %v7061_v35 }
 0x147   :  { %v7015_v7 = vpop.xlane.xlu1 %2172  ;;  %v7019_v10 = vpop.xlane.xlu0 %2076  ;;  %5202 = vmatmul.msk.bf16.gmra.mxu1 %vm478_vm0, %v5650_v39 }
 0x148   :  { %v1102_v39 = vpop.f32.mrf.mxu3 }
 0x149   :  { %v1877_v62 = vmul.f32 0.35355338, %v1102_v39 }
 0x14c   :  { %2130 = vmax.xlane.f32.xlu1 %v7023_v17  ;;  %2162 = vmax.xlane.f32.xlu2 %v7027_v46  ;;  %v7048_v17 = vsel %vm1945_vm1, %v1844_v48, -1e+30  ;;  %v5658_v48 = vld [vmem:[%s9230_s0 + $0x198] sm:$0xff] }
 0x14d   :  { %2194 = vmax.xlane.f32.xlu0 %v7031_v43  ;;  %9351 = vst [vmem:[#allocation22_spill] sm:$0xff] %v7048_v17  ;;  %v7052_v43 = vsel %vm1945_vm1, %v1828_v52, -1e+30  ;;  %v748_v49 = vpop.f32.mrf.mxu1  ;;  %5274 = vmatmul.msk.bf16.gmra.mxu2 %vm478_vm0, %v5658_v48 }
 0x14e   :  { %9352 = vst [vmem:[#allocation23_spill] sm:$0xff] %v7052_v43  ;;  %v1845_v52 = vmul.f32 0.35355338, %v748_v49  ;;  %v573_v49 = vpop.f32.mrf.mxu0 }
 0x14f   :  { %v7040_v37 = vpop.xlane.xlu2 %2174  ;;  %v7042_v0 = vpop.xlane.xlu1 %2078 }
 0x150   :  { %v7044_v1 = vpop.xlane.xlu0 %2140  ;;  %v7081_v30 = vsel %vm1945_vm1, %v1845_v52, -1e+30  ;;  %v1830_v52 = vmul.f32 0.35355338, %v573_v49  ;;  %v2330_v49 = vsub.f32 %v6704_v29, %v6977_v53 }
 0x151   :  { %9355 = vst [vmem:[#allocation26_spill] sm:$0xff] %v7081_v30 }
 0x152   :  { %v7108_v39 = vsel %vm1945_vm1, %v1830_v52, -1e+30  ;;  %v2458_v52 = vmul.f32 1.442695, %v2330_v49 }
 0x153   :  { %9359 = vst [vmem:[#allocation30_spill] sm:$0xff] %v7108_v39 }
 0x154   :  { %2132 = vmax.xlane.f32.xlu2 %v7048_v17  ;;  %2100 = vmax.xlane.f32.xlu1 %v7052_v43  ;;  %v1876_v17 = vmul.f32 0.35355338, %v1099_v61  ;;  %v1861_v61 = vmul.f32 0.35355338, %v925_v16  ;;  %5799 = vpow2.f32 %v2458_v52 }
 0x155   :  { %2164 = vmax.xlane.f32.xlu0 %v7061_v35  ;;  %v750_v16 = vpop.f32.mrf.mxu1 }
 0x156   :  { %v7085_v48 = vsel %vm1945_vm1, %v1876_v17, -1e+30  ;;  %v7098_v17 = vsel %vm1945_vm1, %v1861_v61, -1e+30  ;;  %v1104_v61 = vpop.f32.mrf.mxu3 }
 0x157   :  { %v7069_v46 = vpop.xlane.xlu2 %2144  ;;  %v7071_v43 = vpop.xlane.xlu1 %2142  ;;  %9356 = vst [vmem:[#allocation27_spill] sm:$0xff] %v7085_v48 }
 0x158   :  { %v7073_v63 = vpop.xlane.xlu0 %2110  ;;  %9357 = vst [vmem:[#allocation28_spill] sm:$0xff] %v7098_v17 }
 0x15c   :  { %2196 = vmax.xlane.f32.xlu1 %v7085_v48  ;;  %2102 = vmax.xlane.f32.xlu2 %v7077_v32  ;;  %v7102_v48 = vsel %vm1945_vm1, %v1877_v62, -1e+30  ;;  %v927_v32 = vpop.f32.mrf.mxu2  ;;  %v2346_v62 = vsub.f32 %v6700_v28, %v6994_v18  ;;  %v5651_v28 = vld [vmem:[%s9230_s0 + $0x160] sm:$0xff]  ;;  %v2378_v18 = vsub.f32 %v6730_v44, %v6998_v27  ;;  %v7154_v27 = vpop.eup %5799 }
 0x15d   :  { %2134 = vmax.xlane.f32.xlu0 %v7081_v30  ;;  %9358 = vst [vmem:[#allocation29_spill] sm:$0xff] %v7102_v48  ;;  %v1846_v30 = vmul.f32 0.35355338, %v750_v16  ;;  %v1862_v57 = vmul.f32 0.35355338, %v927_v32  ;;  %v1421_v38 = vpop.f32.mrf.mxu1  ;;  %5203 = vmatmul.msk.bf16.gmra.mxu1 %vm478_vm0, %v5651_v28 }
 0x15e   :  { %v2490_v36 = vmul.f32 1.442695, %v2346_v62 }
 0x15f   :  { %v7090_v35 = vpop.xlane.xlu1 %2080  ;;  %v7092_v14 = vpop.xlane.xlu2 %2082  ;;  %v7123_v29 = vsel %vm1945_vm1, %v1846_v30, -1e+30  ;;  %v7127_v53 = vsel %vm1945_vm1, %v1862_v57, -1e+30  ;;  %v1895_v57 = vmul.f32 0.35355338, %v1421_v38  ;;  %v2362_v30 = vsub.f32 %v6722_v41, %v6996_v19 }
 0x160   :  { %v7094_v11 = vpop.xlane.xlu0 %2176  ;;  %9360 = vst [vmem:[#allocation31_spill] sm:$0xff] %v7123_v29  ;;  %5801 = vpow2.f32 %v2490_v36  ;;  %v1244_v36 = vpop.f32.mrf.mxu0  ;;  %v2331_v41 = vsub.f32 %v6760_v58, %v7019_v10 }
 0x161   :  { %9361 = vst [vmem:[#allocation32_spill] sm:$0xff] %v7127_v53  ;;  %v7152_v62 = vsel %vm1945_vm1, %v1895_v57, -1e+30  ;;  %v2522_v44 = vmul.f32 1.442695, %v2362_v30 }
 0x162   :  { %9363 = vst [vmem:[#allocation34_spill] sm:$0xff] %v7152_v62  ;;  %v1879_v19 = vmul.f32 0.35355338, %v1244_v36  ;;  %v2460_v57 = vmul.f32 1.442695, %v2331_v41  ;;  %v5659_v36 = vld [vmem:[%s9230_s0 + $0x1a0] sm:$0xff]  ;;  %v2347_v41 = vsub.f32 %v6748_v55, %v7017_v9 }
 0x163   :  { %5275 = vmatmul.msk.bf16.gmra.mxu2 %vm478_vm0, %v5659_v36  ;;  %v2379_v36 = vsub.f32 %v6744_v54, %v7015_v7  ;;  %v5660_v7 = vld [vmem:[%s9230_s0 + $0x1a8] sm:$0xff] }
 0x164   :  { %2166 = vmax.xlane.f32.xlu1 %v7098_v17  ;;  %2198 = vmax.xlane.f32.xlu2 %v7102_v48  ;;  %v1878_v48 = vmul.f32 0.35355338, %v1104_v61  ;;  %v7171_v30 = vsel %vm1945_vm1, %v1879_v19, -1e+30 }
 0x165   :  { %2104 = vmax.xlane.f32.xlu0 %v7108_v39  ;;  %9365 = vst [vmem:[#allocation36_spill] sm:$0xff] %v7171_v30 }
 0x166   :  { %v7136_v32 = vsel %vm1945_vm1, %v1878_v48, -1e+30  ;;  %v2554_v48 = vmul.f32 1.442695, %v2378_v18  ;;  %v7156_v38 = vpop.eup %5801 }
 0x167   :  { %v7115_v51 = vpop.xlane.xlu1 %2112  ;;  %v7117_v17 = vpop.xlane.xlu2 %2114  ;;  %9362 = vst [vmem:[#allocation33_spill] sm:$0xff] %v7136_v32 }
 0x168   :  { %v7119_v50 = vpop.xlane.xlu0 %2146  ;;  %9364 = vst [vmem:[#allocation35_spill] sm:$0xff] %v7156_v38  ;;  %5803 = vpow2.f32 %v2554_v48  ;;  %v5643_v48 = vld [vmem:[%s9230_s0 + $0x120] sm:$0xff] }
 0x169   :  { %5805 = vpow2.f32 %v2522_v44  ;;  %v1775_v44 = vpop.f32.mrf.mxu3  ;;  %5131 = vmatmul.msk.bf16.gmra.mxu0 %vm478_vm0, %v5643_v48  ;;  %v2363_v48 = vsub.f32 %v6780_v6, %v7044_v1 }
 0x16a   :  { %5807 = vpow2.f32 %v2460_v57  ;;  %v1927_v19 = vmul.f32 0.35355338, %v1775_v44  ;;  %v1423_v44 = vpop.f32.mrf.mxu1 }
 0x16c   :  { %2136 = vmax.xlane.f32.xlu1 %v7123_v29  ;;  %2168 = vmax.xlane.f32.xlu2 %v7127_v53  ;;  %v2492_v53 = vmul.f32 1.442695, %v2347_v41  ;;  %v7198_v55 = vsel %vm1945_vm1, %v1927_v19, -1e+30 }
 0x16d   :  { %2200 = vmax.xlane.f32.xlu0 %v7136_v32  ;;  %9368 = vst [vmem:[#allocation39_spill] sm:$0xff] %v7198_v55 }
 0x16e   :  { %v7176_v58 = vpop.eup %5803  ;;  %5809 = vpow2.f32 %v2492_v53 }
 0x16f   :  { %v7144_v16 = vpop.xlane.xlu1 %2178  ;;  %v7146_v49 = vpop.xlane.xlu2 %2084  ;;  %9366 = vst [vmem:[#allocation37_spill] sm:$0xff] %v7176_v58 }
 0x170   :  { %v7148_v61 = vpop.xlane.xlu0 %2116  ;;  %v7178_v10 = vpop.eup %5805 }
 0x171   :  { %9367 = vst [vmem:[#allocation38_spill] sm:$0xff] %v7178_v10  ;;  %v7204_v57 = vpop.eup %5807  ;;  %v1777_v1 = vpop.f32.mrf.mxu3 }
 0x173   :  { %5276 = vmatmul.msk.bf16.gmra.mxu2 %vm478_vm0, %v5660_v7 }
 0x174   :  { %2714 = vadd.xlane.f32.xlu1 %v7154_v27  ;;  %2234 = vmax.xlane.f32.xlu2 %v7152_v62  ;;  %v1598_v62 = vpop.f32.mrf.mxu2  ;;  %v7219_v53 = vpop.eup %5809 }
 0x175   :  { %2746 = vadd.xlane.f32.xlu0 %v7156_v38  ;;  %v1911_v29 = vmul.f32 0.35355338, %v1598_v62  ;;  %v1246_v62 = vpop.f32.mrf.mxu0  ;;  %v2524_v38 = vmul.f32 1.442695, %v2363_v48  ;;  %v2332_v48 = vsub.f32 %v6767_v2, %v7042_v0  ;;  %v2364_v0 = vsub.f32 %v6786_v12, %v7071_v43  ;;  %v5644_v43 = vld [vmem:[%s9230_s0 + $0x128] sm:$0xff] }
 0x176   :  { %v1880_v41 = vmul.f32 0.35355338, %v1246_v62  ;;  %v2348_v62 = vsub.f32 %v6790_v13, %v7073_v63 }
 0x177   :  { %v7163_v52 = vpop.xlane.xlu1 %2148  ;;  %v7165_v28 = vpop.xlane.xlu2 %2180  ;;  %v7202_v9 = vsel %vm1945_vm1, %v1911_v29, -1e+30  ;;  %5811 = vpow2.f32 %v2524_v38  ;;  %v2462_v38 = vmul.f32 1.442695, %v2332_v48  ;;  %v5665_v48 = vld [vmem:[%s9230_s0 + $0x1d0] sm:$0xff] }
 0x178   :  { %v7167_v18 = vpop.xlane.xlu0 %2086  ;;  %9369 = vst [vmem:[#allocation40_spill] sm:$0xff] %v7202_v9  ;;  %v7223_v6 = vsel %vm1945_vm1, %v1880_v41, -1e+30  ;;  %5345 = vmatmul.msk.bf16.gmra.mxu3 %vm478_vm0, %v5665_v48 }
 0x179   :  { %9370 = vst [vmem:[#allocation41_spill] sm:$0xff] %v7223_v6  ;;  %5132 = vmatmul.msk.bf16.gmra.mxu0 %vm478_vm0, %v5644_v43 }
 0x17c   :  { %2810 = vadd.xlane.f32.xlu2 %v7176_v58  ;;  %2202 = vmax.xlane.f32.xlu1 %v7171_v30  ;;  %v1896_v58 = vmul.f32 0.35355338, %v1423_v44  ;;  %v1928_v44 = vmul.f32 0.35355338, %v1777_v1  ;;  %v1600_v2 = vpop.f32.mrf.mxu2 }
 0x17d   :  { %2778 = vadd.xlane.f32.xlu0 %v7178_v10  ;;  %v1249_v48 = vpop.f32.mrf.mxu0 }
 0x17e   :  { %v7229_v54 = vsel %vm1945_vm1, %v1896_v58, -1e+30  ;;  %v7250_v13 = vsel %vm1945_vm1, %v1928_v44, -1e+30  ;;  %v2526_v44 = vmul.f32 1.442695, %v2364_v0  ;;  %v2380_v0 = vsub.f32 %v6771_v4, %v7040_v37 }
 0x17f   :  { %v7190_v39 = vpop.xlane.xlu1 %2118  ;;  %v7192_v30 = vpop.xlane.xlu2 %2150  ;;  %9371 = vst [vmem:[#allocation42_spill] sm:$0xff] %v7229_v54 }
 0x180   :  { %v7194_v32 = vpop.xlane.xlu0 %2182  ;;  %9372 = vst [vmem:[#allocation43_spill] sm:$0xff] %v7250_v13  ;;  %v2558_v4 = vmul.f32 1.442695, %v2380_v0 }
 0x184   :  { %2716 = vadd.xlane.f32.xlu2 %v7204_v57  ;;  %2298 = vmax.xlane.f32.xlu1 %v7198_v55  ;;  %v2556_v55 = vmul.f32 1.442695, %v2379_v36 }
 0x185   :  { %2266 = vmax.xlane.f32.xlu0 %v7202_v9  ;;  %v7246_v9 = vpop.eup %5811 }
 0x186   :  { %5813 = vpow2.f32 %v2556_v55  ;;  %v1912_v55 = vmul.f32 0.35355338, %v1600_v2  ;;  %v1426_v2 = vpop.f32.mrf.mxu1 }
 0x187   :  { %v7213_v29 = vpop.xlane.xlu2 %2120  ;;  %v7215_v19 = vpop.xlane.xlu1 %2088 }
 0x188   :  { %v7217_v10 = vpop.xlane.xlu0 %2152  ;;  %v7273_v12 = vsel %vm1945_vm1, %v1912_v55, -1e+30  ;;  %v1897_v55 = vmul.f32 0.35355338, %v1426_v2 }
 0x189   :  { %9376 = vst [vmem:[#allocation47_spill] sm:$0xff] %v7273_v12 }
 0x18a   :  { %v7300_v37 = vsel %vm1945_vm1, %v1897_v55, -1e+30 }
 0x18b   :  { %9377 = vst [vmem:[#allocation48_spill] sm:$0xff] %v7300_v37 }
 0x18c   :  { %2748 = vadd.xlane.f32.xlu1 %v7219_v53  ;;  %2204 = vmax.xlane.f32.xlu2 %v7223_v6  ;;  %v2494_v6 = vmul.f32 1.442695, %v2348_v62  ;;  %v7252_v63 = vpop.eup %5813 }
 0x18d   :  { %2236 = vmax.xlane.f32.xlu0 %v7229_v54  ;;  %9373 = vst [vmem:[#allocation44_spill] sm:$0xff] %v7252_v63 }
 0x18e   :  { %5815 = vpow2.f32 %v2494_v6  ;;  %v5652_v6 = vld [vmem:[%s9230_s0 + $0x168] sm:$0xff] }
 0x18f   :  { %v7240_v36 = vpop.xlane.xlu1 %2184  ;;  %v7242_v58 = vpop.xlane.xlu2 %2090  ;;  %5817 = vpow2.f32 %v2462_v38  ;;  %5204 = vmatmul.msk.bf16.gmra.mxu1 %vm478_vm0, %v5652_v6  ;;  %v2333_v6 = vsub.f32 %v6805_v23, %v7090_v35 }
 0x190   :  { %v7244_v41 = vpop.xlane.xlu0 %2122  ;;  %5819 = vpow2.f32 %v2526_v44 }
 0x191   :  { %5821 = vpow2.f32 %v2558_v4  ;;  %v2464_v4 = vmul.f32 1.442695, %v2333_v6 }
 0x194   :  { %2780 = vadd.xlane.f32.xlu1 %v7246_v9  ;;  %2300 = vmax.xlane.f32.xlu2 %v7250_v13  ;;  %v7269_v54 = vpop.eup %5815  ;;  %v2349_v13 = vsub.f32 %v6824_v34, %v7115_v51  ;;  %v1603_v34 = vpop.f32.mrf.mxu2 }
 0x195   :  { %2812 = vadd.xlane.f32.xlu0 %v7252_v63  ;;  %9375 = vst [vmem:[#allocation46_spill] sm:$0xff] %v7269_v54  ;;  %v7281_v38 = vpop.eup %5817  ;;  %v1913_v2 = vmul.f32 0.35355338, %v1603_v34  ;;  %v1780_v34 = vpop.f32.mrf.mxu3 }
 0x196   :  { %v2496_v44 = vmul.f32 1.442695, %v2349_v13  ;;  %v7306_v51 = vpop.eup %5819  ;;  %v2365_v13 = vsub.f32 %v6794_v15, %v7069_v46 }
 0x197   :  { %v7259_v1 = vpop.xlane.xlu1 %2154  ;;  %v7261_v7 = vpop.xlane.xlu2 %2186  ;;  %v7326_v23 = vsel %vm1945_vm1, %v1913_v2, -1e+30 }
 0x198   :  { %v7263_v62 = vpop.xlane.xlu0 %2092  ;;  %5823 = vpow2.f32 %v2496_v44  ;;  %9380 = vst [vmem:[#allocation51_spill] sm:$0xff] %v7326_v23  ;;  %v2528_v35 = vmul.f32 1.442695, %v2365_v13  ;;  %v7329_v15 = vpop.eup %5821  ;;  %v1929_v44 = vmul.f32 0.35355338, %v1780_v34 }
 0x199   :  { %9374 = vst [vmem:[#allocation45_spill] sm:$0xff] %v7263_v62  ;;  %v1881_v62 = vmul.f32 0.35355338, %v1249_v48  ;;  %v5666_v48 = vld [vmem:[%s9230_s0 + $0x1d8] sm:$0xff]  ;;  %5825 = vpow2.f32 %v2464_v4  ;;  %v2381_v4 = vsub.f32 %v6811_v24, %v7094_v11  ;;  %v1251_v34 = vpop.f32.mrf.mxu0 }
 0x19a   :  { %5346 = vmatmul.msk.bf16.gmra.mxu3 %vm478_vm0, %v5666_v48  ;;  %9381 = vst [vmem:[#allocation52_spill] sm:$0xff] %v7329_v15  ;;  %5827 = vpow2.f32 %v2528_v35  ;;  %v7344_v48 = vsel %vm1945_vm1, %v1929_v44, -1e+30  ;;  %v5645_v35 = vld [vmem:[%s9230_s0 + $0x130] sm:$0xff]  ;;  %v1882_v11 = vmul.f32 0.35355338, %v1251_v34 }
 0x19b   :  { %v7304_v43 = vsel %vm1945_vm1, %v1881_v62, -1e+30  ;;  %9385 = vst [vmem:[#allocation56_spill] sm:$0xff] %v7344_v48  ;;  %v5661_v44 = vld [vmem:[%s9230_s0 + $0x1b0] sm:$0xff]  ;;  %5133 = vmatmul.msk.bf16.gmra.mxu0 %vm478_vm0, %v5645_v35  ;;  %v2366_v35 = vsub.f32 %v6820_v33, %v7119_v50 }
 0x19c   :  { %2268 = vmax.xlane.f32.xlu1 %v7273_v12  ;;  %2750 = vadd.xlane.f32.xlu2 %v7269_v54  ;;  %9378 = vst [vmem:[#allocation49_spill] sm:$0xff] %v7304_v43 }
 0x19d   :  { %2718 = vadd.xlane.f32.xlu0 %v7281_v38  ;;  %5277 = vmatmul.msk.bf16.gmra.mxu2 %vm478_vm0, %v5661_v44  ;;  %v1782_v44 = vpop.f32.mrf.mxu3 }
 0x19e   :  { %v7331_v46 = vpop.eup %5823 }
 0x19f   :  { %v7292_v63 = vpop.xlane.xlu1 %2124  ;;  %v7294_v12 = vpop.xlane.xlu2 %2156 }
 0x1a0   :  { %v7296_v54 = vpop.xlane.xlu0 %2188 }
 0x1a4   :  { %2238 = vmax.xlane.f32.xlu1 %v7300_v37  ;;  %2782 = vadd.xlane.f32.xlu2 %v7306_v51  ;;  %v7346_v37 = vpop.eup %5825 }
 0x1a5   :  { %2206 = vmax.xlane.f32.xlu0 %v7304_v43  ;;  %9386 = vst [vmem:[#allocation57_spill] sm:$0xff] %v7346_v37  ;;  %v7348_v43 = vpop.eup %5827 }
 0x1a7   :  { %v7315_v62 = vpop.xlane.xlu2 %2126  ;;  %v7317_v0 = vpop.xlane.xlu1 %2094 }
 0x1a8   :  { %v7319_v55 = vpop.xlane.xlu0 %2158 }
 0x1a9   :  { %9379 = vst [vmem:[#allocation50_spill] sm:$0xff] %v7319_v55  ;;  %v2350_v55 = vsub.f32 %v6816_v31, %v7117_v17  ;;  %v5667_v31 = vld [vmem:[%s9230_s0 + $0x1e0] sm:$0xff] }
 0x1aa   :  { %5347 = vmatmul.msk.bf16.gmra.mxu3 %vm478_vm0, %v5667_v31  ;;  %v2530_v31 = vmul.f32 1.442695, %v2366_v35 }
 0x1ab   :  { %v2498_v17 = vmul.f32 1.442695, %v2350_v55 }
 0x1ac   :  { %2814 = vadd.xlane.f32.xlu1 %v7329_v15  ;;  %2270 = vmax.xlane.f32.xlu2 %v7326_v23  ;;  %v1428_v23 = vpop.f32.mrf.mxu1 }
 0x1ad   :  { %2752 = vadd.xlane.f32.xlu0 %v7331_v46  ;;  %v1898_v24 = vmul.f32 0.35355338, %v1428_v23  ;;  %v5653_v23 = vld [vmem:[%s9230_s0 + $0x170] sm:$0xff] }
 0x1ae   :  { %5205 = vmatmul.msk.bf16.gmra.mxu1 %vm478_vm0, %v5653_v23  ;;  %v2382_v23 = vsub.f32 %v6835_v42, %v7144_v16  ;;  %v1254_v16 = vpop.f32.mrf.mxu0 }
 0x1af   :  { %v7336_v6 = vpop.xlane.xlu1 %2190  ;;  %v7338_v2 = vpop.xlane.xlu2 %2096  ;;  %v7380_v34 = vsel %vm1945_vm1, %v1898_v24, -1e+30 }
 0x1b0   :  { %9382 = vst [vmem:[#allocation53_spill] sm:$0xff] %v7336_v6  ;;  %v7340_v13 = vpop.xlane.xlu0 %2128 }
 0x1b1   :  { %9383 = vst [vmem:[#allocation54_spill] sm:$0xff] %v7338_v2  ;;  %v1605_v2 = vpop.f32.mrf.mxu2 }
 0x1b2   :  { %9384 = vst [vmem:[#allocation55_spill] sm:$0xff] %v7340_v13  ;;  %v2560_v13 = vmul.f32 1.442695, %v2381_v4  ;;  %v1914_v6 = vmul.f32 0.35355338, %v1605_v2  ;;  %v2334_v4 = vsub.f32 %v6801_v20, %v7092_v14 }
 0x1b3   :  { %9387 = vst [vmem:[#allocation58_spill] sm:$0xff] %v7380_v34  ;;  %v7384_v2 = vsel %vm1945_vm1, %v1882_v11, -1e+30 }
 0x1b4   :  { %2720 = vadd.xlane.f32.xlu1 %v7346_v37  ;;  %2302 = vmax.xlane.f32.xlu2 %v7344_v48  ;;  %9388 = vst [vmem:[#allocation59_spill] sm:$0xff] %v7384_v2  ;;  %5829 = vpow2.f32 %v2560_v13  ;;  %v7392_v55 = vsel %vm1945_vm1, %v1914_v6, -1e+30  ;;  %v2466_v14 = vmul.f32 1.442695, %v2334_v4  ;;  %v1431_v50 = vpop.f32.mrf.mxu1 }
 0x1b5   :  { %2784 = vadd.xlane.f32.xlu0 %v7348_v43  ;;  %9389 = vst [vmem:[#allocation60_spill] sm:$0xff] %v7392_v55  ;;  %5831 = vpow2.f32 %v2498_v17  ;;  %v1930_v13 = vmul.f32 0.35355338, %v1782_v44  ;;  %v1899_v4 = vmul.f32 0.35355338, %v1431_v50 }
 0x1b6   :  { %5833 = vpow2.f32 %v2466_v14  ;;  %v5742_v14 = vld [vmem:[%s9231_s2 + $0x38] sm:$0xff] }
 0x1b7   :  { %v7365_v48 = vpop.xlane.xlu1 %2160  ;;  %v7367_v15 = vpop.xlane.xlu2 %2192  ;;  %v7412_v33 = vsel %vm1945_vm1, %v1930_v13, -1e+30  ;;  %5835 = vpow2.f32 %v2530_v31  ;;  %v5668_v13 = vld [vmem:[%s9230_s0 + $0x1e8] sm:$0xff]  ;;  %3450 = vmatpush.bf16.msra.mxu0 %v5742_v14  ;;  %v7433_v42 = vsel %vm1945_vm1, %v1899_v4, -1e+30 }
 0x1b8   :  { %v7369_v37 = vpop.xlane.xlu0 %2098  ;;  %9391 = vst [vmem:[#allocation62_spill] sm:$0xff] %v7412_v33  ;;  %v1883_v4 = vmul.f32 0.35355338, %v1254_v16  ;;  %v2367_v16 = vsub.f32 %v6858_v59, %v7163_v52  ;;  %v2383_v59 = vsub.f32 %v6862_v60, %v7165_v28  ;;  %v5749_v52 = vld [vmem:[%s9231_s2 + $0x70] sm:$0xff]  ;;  %v5738_v60 = vld [vmem:[%s9231_s2 + $0x18] sm:$0xff]  ;;  %v5748_v28 = vld [vmem:[%s9231_s2 + $0x68] sm:$0xff] }
 0x1b9   :  { %9394 = vst [vmem:[#allocation65_spill] sm:$0xff] %v7433_v42 }
 0x1ba   :  { %v7404_v6 = vpop.eup %5829  ;;  %5348 = vmatmul.msk.bf16.gmra.mxu3 %vm478_vm0, %v5668_v13  ;;  %v2335_v13 = vsub.f32 %v6839_v45, %v7146_v49  ;;  %v7466_v45 = vsel %vm1945_vm1, %v1883_v4, -1e+30  ;;  %v5662_v4 = vld [vmem:[%s9230_s0 + $0x1b8] sm:$0xff] }
 0x1bb   :  { %v7406_v17 = vpop.eup %5831  ;;  %9398 = vst [vmem:[#allocation69_spill] sm:$0xff] %v7466_v45  ;;  %5278 = vmatmul.msk.bf16.gmra.mxu2 %vm478_vm0, %v5662_v4  ;;  %v5737_v4 = vld [vmem:[%s9231_s2 + $0x10] sm:$0xff] }
 0x1bc   :  { %2240 = vmax.xlane.f32.xlu2 %v7380_v34  ;;  %2208 = vmax.xlane.f32.xlu1 %v7384_v2  ;;  %v7429_v31 = vpop.eup %5833  ;;  %v2562_v2 = vmul.f32 1.442695, %v2382_v23  ;;  %v2351_v23 = vsub.f32 %v6845_v47, %v7148_v61  ;;  %v5750_v47 = vld [vmem:[%s9231_s2 + $0x78] sm:$0xff]  ;;  %v2468_v49 = vmul.f32 1.442695, %v2335_v13 }
 0x1bd   :  { %2272 = vmax.xlane.f32.xlu0 %v7392_v55  ;;  %v7436_v50 = vpop.eup %5835  ;;  %v1608_v55 = vpop.f32.mrf.mxu2  ;;  %3595 = vmatpush.bf16.msra.mxu1 %v5750_v47 }
 0x1be   :  { %v1915_v14 = vmul.f32 0.35355338, %v1608_v55  ;;  %5837 = vpow2.f32 %v2562_v2  ;;  %v2500_v55 = vmul.f32 1.442695, %v2351_v23  ;;  %v5646_v23 = vld [vmem:[%s9230_s0 + $0x138] sm:$0xff] }
 0x1bf   :  { %v7398_v24 = vpop.xlane.xlu1 %2130  ;;  %v7400_v20 = vpop.xlane.xlu2 %2162  ;;  %5134 = vmatmul.msk.bf16.gmra.mxu0 %vm478_vm0, %v5646_v23  ;;  %v2532_v23 = vmul.f32 1.442695, %v2367_v16 }
 0x1c0   :  { %9390 = vst [vmem:[#allocation61_spill] sm:$0xff] %v7398_v24  ;;  %v7402_v11 = vpop.xlane.xlu0 %2194  ;;  %v7462_v2 = vsel %vm1945_vm1, %v1915_v14, -1e+30  ;;  %v5739_v14 = vld [vmem:[%s9231_s2 + $0x20] sm:$0xff]  ;;  %5839 = vpow2.f32 %v2500_v55 }
 0x1c1   :  { %9397 = vst [vmem:[#allocation68_spill] sm:$0xff] %v7462_v2  ;;  %5841 = vpow2.f32 %v2468_v49  ;;  %3596 = vmatpush.bf16.msra.mxu1 %v5749_v52  ;;  %v5758_v49 = vld [vmem:[%s9231_s2 + $0xb8] sm:$0xff] }
 0x1c2   :  { %3740 = vmatpush.bf16.msra.mxu2 %v5758_v49  ;;  %v5766_v52 = vld [vmem:[%s9231_s2 + $0xf8] sm:$0xff]  ;;  %5843 = vpow2.f32 %v2532_v23  ;;  %v5765_v23 = vld [vmem:[%s9231_s2 + $0xf0] sm:$0xff] }
 0x1c3   :  { %3885 = vmatpush.bf16.msra.mxu3 %v5766_v52 }
 0x1c4   :  { %2816 = vadd.xlane.f32.xlu2 %v7404_v6  ;;  %2754 = vadd.xlane.f32.xlu1 %v7406_v17 }
 0x1c5   :  { %2304 = vmax.xlane.f32.xlu0 %v7412_v33  ;;  %v5741_v33 = vld [vmem:[%s9231_s2 + $0x30] sm:$0xff]  ;;  %3597 = vmatpush.bf16.msra.mxu1 %v5748_v28  ;;  %v1256_v28 = vpop.f32.mrf.mxu0 }
 0x1c6   :  { %3451 = vmatpush.bf16.msra.mxu0 %v5741_v33  ;;  %v7468_v33 = vpop.eup %5837 }
 0x1c7   :  { %v7417_v35 = vpop.xlane.xlu2 %2132  ;;  %v7419_v44 = vpop.xlane.xlu1 %2100  ;;  %3886 = vmatpush.bf16.msra.mxu3 %v5765_v23  ;;  %v5755_v23 = vld [vmem:[%s9231_s2 + $0xa0] sm:$0xff] }
 0x1c8   :  { %9392 = vst [vmem:[#allocation63_spill] sm:$0xff] %v7417_v35  ;;  %v7424_v34 = vpop.xlane.xlu0 %2164 }
 0x1c9   :  { %9393 = vst [vmem:[#allocation64_spill] sm:$0xff] %v7419_v44  ;;  %v5740_v44 = vld [vmem:[%s9231_s2 + $0x28] sm:$0xff] }
 0x1ca   :  { %3452 = vmatpush.bf16.msra.mxu0 %v5740_v44  ;;  %v5654_v44 = vld [vmem:[%s9230_s0 + $0x178] sm:$0xff] }
 0x1cb   :  { %5206 = vmatmul.msk.bf16.gmra.mxu1 %vm478_vm0, %v5654_v44  ;;  %v5669_v44 = vld [vmem:[%s9230_s0 + $0x1f0] sm:$0xff] }
 0x1cc   :  { %2722 = vadd.xlane.f32.xlu2 %v7429_v31  ;;  %2786 = vadd.xlane.f32.xlu1 %v7436_v50 }
 0x1cd   :  { %2242 = vmax.xlane.f32.xlu0 %v7433_v42  ;;  %v1433_v42 = vpop.f32.mrf.mxu1  ;;  %5349 = vmatmul.msk.bf16.gmra.mxu3 %vm478_vm0, %v5669_v44  ;;  %v2352_v44 = vsub.f32 %v6873_v3, %v7190_v39  ;;  %v1884_v3 = vmul.f32 0.35355338, %v1256_v28  ;;  %v5735_v28 = vld [vmem:[%s9231_s2] sm:$0xff] }
 0x1ce   :  { %v1900_v13 = vmul.f32 0.35355338, %v1433_v42  ;;  %3453 = vmatpush.bf16.msra.mxu0 %v5739_v14  ;;  %v2564_v14 = vmul.f32 1.442695, %v2383_v59  ;;  %v5747_v59 = vld [vmem:[%s9231_s2 + $0x60] sm:$0xff] }
 0x1cf   :  { %v7448_v35 = vpop.xlane.xlu1 %2196  ;;  %v7450_v24 = vpop.xlane.xlu2 %2102  ;;  %3598 = vmatpush.bf16.msra.mxu1 %v5747_v59 }
 0x1d0   :  { %9395 = vst [vmem:[#allocation66_spill] sm:$0xff] %v7450_v24  ;;  %v7458_v61 = vpop.xlane.xlu0 %2134  ;;  %v7521_v16 = vsel %vm1945_vm1, %v1900_v13, -1e+30  ;;  %v5757_v13 = vld [vmem:[%s9231_s2 + $0xb0] sm:$0xff]  ;;  %5845 = vpow2.f32 %v2564_v14  ;;  %v5756_v14 = vld [vmem:[%s9231_s2 + $0xa8] sm:$0xff] }
 0x1d1   :  { %9396 = vst [vmem:[#allocation67_spill] sm:$0xff] %v7458_v61  ;;  %3741 = vmatpush.bf16.msra.mxu2 %v5757_v13  ;;  %v2502_v13 = vmul.f32 1.442695, %v2352_v44  ;;  %v7579_v44 = vsel %vm1945_vm1, %v1884_v3, -1e+30  ;;  %v5744_v3 = vld [vmem:[%s9231_s2 + $0x48] sm:$0xff] }
 0x1d2   :  { %9400 = vst [vmem:[#allocation71_spill] sm:$0xff] %v7521_v16  ;;  %3454 = vmatpush.bf16.msra.mxu0 %v5738_v60  ;;  %v2336_v60 = vsub.f32 %v6854_v56, %v7167_v18  ;;  %v5736_v56 = vld [vmem:[%s9231_s2 + $0x8] sm:$0xff]  ;;  %v5746_v18 = vld [vmem:[%s9231_s2 + $0x58] sm:$0xff] }
 0x1d3   :  { %3599 = vmatpush.bf16.msra.mxu1 %v5746_v18  ;;  %9402 = vst [vmem:[#allocation73_spill] sm:$0xff] %v7579_v44  ;;  %v2368_v18 = vsub.f32 %v6877_v5, %v7192_v30  ;;  %v5670_v5 = vld [vmem:[%s9230_s0 + $0x1f8] sm:$0xff] }
 0x1d4   :  { %2274 = vmax.xlane.f32.xlu1 %v7462_v2  ;;  %2210 = vmax.xlane.f32.xlu2 %v7466_v45  ;;  %v7517_v45 = vpop.eup %5839  ;;  %v2470_v52 = vmul.f32 1.442695, %v2336_v60  ;;  %v5745_v60 = vld [vmem:[%s9231_s2 + $0x50] sm:$0xff]  ;;  %v5762_v30 = vld [vmem:[%s9231_s2 + $0xd8] sm:$0xff] }
 0x1d5   :  { %2818 = vadd.xlane.f32.xlu0 %v7468_v33  ;;  %v7529_v49 = vpop.eup %5841  ;;  %3742 = vmatpush.bf16.msra.mxu2 %v5756_v14 }
 0x1d6   :  { %3455 = vmatpush.bf16.msra.mxu0 %v5737_v4  ;;  %v5764_v4 = vld [vmem:[%s9231_s2 + $0xe8] sm:$0xff]  ;;  %v7562_v59 = vpop.eup %5843  ;;  %5847 = vpow2.f32 %v2470_v52  ;;  %v5754_v52 = vld [vmem:[%s9231_s2 + $0x98] sm:$0xff] }
 0x1d7   :  { %v7494_v47 = vpop.xlane.xlu1 %2166  ;;  %v7496_v55 = vpop.xlane.xlu2 %2198  ;;  %3887 = vmatpush.bf16.msra.mxu3 %v5764_v4  ;;  %5849 = vpow2.f32 %v2502_v13  ;;  %3600 = vmatpush.bf16.msra.mxu1 %v5745_v60 }
 0x1d8   :  { %v7507_v42 = vpop.xlane.xlu0 %2104  ;;  %v1436_v13 = vpop.f32.mrf.mxu1 }
 0x1d9   :  { %9399 = vst [vmem:[#allocation70_spill] sm:$0xff] %v7507_v42  ;;  %v1610_v42 = vpop.f32.mrf.mxu2  ;;  %3743 = vmatpush.bf16.msra.mxu2 %v5755_v23  ;;  %v5743_v23 = vld [vmem:[%s9231_s2 + $0x40] sm:$0xff] }
 0x1da   :  { %3456 = vmatpush.bf16.msra.mxu0 %v5736_v56  ;;  %v5763_v56 = vld [vmem:[%s9231_s2 + $0xe0] sm:$0xff]  ;;  %v1916_v14 = vmul.f32 0.35355338, %v1610_v42  ;;  %v2534_v42 = vmul.f32 1.442695, %v2368_v18 }
 0x1db   :  { %3888 = vmatpush.bf16.msra.mxu3 %v5763_v56  ;;  %3601 = vmatpush.bf16.msra.mxu1 %v5744_v3  ;;  %v5753_v56 = vld [vmem:[%s9231_s2 + $0x90] sm:$0xff]  ;;  %v1901_v3 = vmul.f32 0.35355338, %v1436_v13  ;;  %v5760_v13 = vld [vmem:[%s9231_s2 + $0xc8] sm:$0xff] }
 0x1dc   :  { %2244 = vmax.xlane.f32.xlu1 %v7521_v16  ;;  %2756 = vadd.xlane.f32.xlu2 %v7517_v45  ;;  %v7606_v60 = vsel %vm1945_vm1, %v1916_v14, -1e+30  ;;  %5851 = vpow2.f32 %v2534_v42 }
 0x1dd   :  { %2724 = vadd.xlane.f32.xlu0 %v7529_v49  ;;  %3744 = vmatpush.bf16.msra.mxu2 %v5754_v52  ;;  %9404 = vst [vmem:[#allocation75_spill] sm:$0xff] %v7606_v60  ;;  %v2384_v52 = vsub.f32 %v6881_v8, %v7194_v32 }
 0x1de   :  { %3457 = vmatpush.bf16.msra.mxu0 %v5735_v28  ;;  %5350 = vmatmul.msk.bf16.gmra.mxu3 %vm478_vm0, %v5670_v5  ;;  %v2353_v5 = vsub.f32 %v6892_v21, %v7213_v29  ;;  %v5752_v21 = vld [vmem:[%s9231_s2 + $0x88] sm:$0xff] }
 0x1df   :  { %v7544_v16 = vpop.xlane.xlu1 %2136  ;;  %v7546_v2 = vpop.xlane.xlu2 %2168  ;;  %3889 = vmatpush.bf16.msra.mxu3 %v5762_v30  ;;  %3602 = vmatpush.bf16.msra.mxu1 %v5743_v23  ;;  %v2566_v29 = vmul.f32 1.442695, %v2384_v52  ;;  %v7635_v30 = vsel %vm1945_vm1, %v1901_v3, -1e+30  ;;  %v5751_v23 = vld [vmem:[%s9231_s2 + $0x80] sm:$0xff]  ;;  %v2337_v52 = vsub.f32 %v6896_v25, %v7215_v19 }
 0x1e0   :  { %9401 = vst [vmem:[#allocation72_spill] sm:$0xff] %v7544_v16  ;;  %v7557_v39 = vpop.xlane.xlu0 %2200  ;;  %v7564_v16 = vpop.eup %5845 }
 0x1e1   :  { %v7602_v28 = vpop.eup %5847  ;;  %3745 = vmatpush.bf16.msra.mxu2 %v5753_v56  ;;  %9406 = vst [vmem:[#allocation77_spill] sm:$0xff] %v7635_v30 }
 0x1e2   :  { %v7614_v18 = vpop.eup %5849 }
 0x1e3   :  { %v7647_v56 = vpop.eup %5851 }
 0x1e4   :  { %2820 = vadd.xlane.f32.xlu1 %v7564_v16  ;;  %2788 = vadd.xlane.f32.xlu2 %v7562_v59 }
 0x1e5   :  { %2212 = vmax.xlane.f32.xlu0 %v7579_v44  ;;  %v1259_v44 = vpop.f32.mrf.mxu0  ;;  %3746 = vmatpush.bf16.msra.mxu2 %v5752_v21  ;;  %v2472_v21 = vmul.f32 1.442695, %v2337_v52  ;;  %v1438_v52 = vpop.f32.mrf.mxu1 }
 0x1e6   :  { %v1885_v14 = vmul.f32 0.35355338, %v1259_v44  ;;  %v2504_v44 = vmul.f32 1.442695, %v2353_v5  ;;  %v5759_v5 = vld [vmem:[%s9231_s2 + $0xc0] sm:$0xff] }
 0x1e7   :  { %v2715_v61 = vpop.xlane.xlu1 %2714  ;;  %v7587_v24 = vpop.xlane.xlu2 %2234 }
 0x1e8   :  { %9403 = vst [vmem:[#allocation74_spill] sm:$0xff] %v7587_v24  ;;  %v2747_v4 = vpop.xlane.xlu0 %2746  ;;  %v5761_v24 = vld [vmem:[%s9231_s2 + $0xd0] sm:$0xff]  ;;  %v7639_v42 = vsel %vm1945_vm1, %v1885_v14, -1e+30  ;;  %5853 = vrcp.f32 %v2715_v61  ;;  %v1613_v61 = vpop.f32.mrf.mxu2 }
 0x1e9   :  { %9407 = vst [vmem:[#allocation78_spill] sm:$0xff] %v7639_v42  ;;  %3890 = vmatpush.bf16.msra.mxu3 %v5761_v24  ;;  %5855 = vpow2.f32 %v2566_v29  ;;  %v2369_v24 = vsub.f32 %v6902_v26, %v7217_v10  ;;  %v1917_v14 = vmul.f32 0.35355338, %v1613_v61  ;;  %3747 = vmatpush.bf16.msra.mxu2 %v5751_v23 }
 0x1ea   :  { %5857 = vpow2.f32 %v2504_v44 }
 0x1eb   :  { %v2536_v44 = vmul.f32 1.442695, %v2369_v24  ;;  %v7667_v10 = vsel %vm1945_vm1, %v1917_v14, -1e+30 }
 0x1ec   :  { %2726 = vadd.xlane.f32.xlu1 %v7602_v28  ;;  %2276 = vmax.xlane.f32.xlu2 %v7606_v60  ;;  %9409 = vst [vmem:[#allocation80_spill] sm:$0xff] %v7667_v10 }
 0x1ed   :  { %2758 = vadd.xlane.f32.xlu0 %v7614_v18  ;;  %3891 = vmatpush.bf16.msra.mxu3 %v5760_v13 }
 0x1ee   :  { %v5854_v19 = vpop.eup %5853 }
 0x1ef   :  { %v7626_v8 = vpop.xlane.xlu2 %2810  ;;  %v7628_v32 = vpop.xlane.xlu1 %2202  ;;  %v3098_v23 = vmul.f32 %v5854_v19, %v7154_v27  ;;  %v1902_v19 = vmul.f32 0.35355338, %v1438_v52 }
 0x1f0   :  { %9405 = vst [vmem:[#allocation76_spill] sm:$0xff] %v7628_v32  ;;  %v2779_v60 = vpop.xlane.xlu0 %2778  ;;  %v7663_v26 = vpop.eup %5855 }
 0x1f1   :  { %3892 = vmatpush.bf16.msra.mxu3 %v5759_v5  ;;  %v7669_v13 = vpop.eup %5857  ;;  %v3226_v61 = vpack.c.bf16 %v3098_v23, %v3098_v23  ;;  %v7692_v52 = vsel %vm1945_vm1, %v1902_v19, -1e+30 }
 0x1f3   :  { %v3370_v32 = vunpack.c.l.b16 %v3226_v61 }
 0x1f4   :  { %2246 = vmax.xlane.f32.xlu2 %v7635_v30  ;;  %2214 = vmax.xlane.f32.xlu1 %v7639_v42 }
 0x1f5   :  { %2790 = vadd.xlane.f32.xlu0 %v7647_v56 }
 0x1f7   :  { %v2717_v3 = vpop.xlane.xlu2 %2716  ;;  %v7659_v25 = vpop.xlane.xlu1 %2298 }
 0x1f8   :  { %9408 = vst [vmem:[#allocation79_spill] sm:$0xff] %v7659_v25  ;;  %5859 = vrcp.f32 %v2717_v3  ;;  %v7661_v29 = vpop.xlane.xlu0 %2266 }
 0x1f9   :  { %5861 = vrcp.f32 %v2747_v4  ;;  %v2385_v4 = vsub.f32 %v6915_v40, %v7240_v36  ;;  %v9412_v40 = vld [vmem:[#allocation35_spill] sm:$0xff] }
 0x1fa   :  { %5863 = vpow2.f32 %v2472_v21  ;;  %9413 = vst [vmem:[#allocation35_spill] sm:$0xff] %v7692_v52 }
 0x1fb   :  { %5865 = vpow2.f32 %v2536_v44  ;;  %v2568_v42 = vmul.f32 1.442695, %v2385_v4 }
 0x1fc   :  { %2822 = vadd.xlane.f32.xlu2 %v7663_v26  ;;  %2760 = vadd.xlane.f32.xlu1 %v7669_v13 }
 0x1fd   :  { %2278 = vmax.xlane.f32.xlu0 %v7667_v10 }
 0x1fe   :  { %v5860_v24 = vpop.eup %5859 }
 0x1ff   :  { %v3099_v5 = vmul.f32 %v5860_v24, %v7204_v57  ;;  %v2749_v14 = vpop.xlane.xlu1 %2748  ;;  %v7678_v3 = vpop.xlane.xlu2 %2204 }
 0x200   :  { %9410 = vst [vmem:[#allocation81_spill] sm:$0xff] %v7678_v3  ;;  %v5862_v27 = vpop.eup %5861  ;;  %5867 = vrcp.f32 %v2749_v14  ;;  %v7680_v21 = vpop.xlane.xlu0 %2236 }
 0x201   :  { %9411 = vst [vmem:[#allocation82_spill] sm:$0xff] %v7680_v21  ;;  %v3227_v30 = vpack.c.bf16 %v3099_v5, %v3099_v5  ;;  %v7682_v44 = vpop.eup %5863  ;;  %5869 = vrcp.f32 %v2779_v60  ;;  %v3114_v36 = vmul.f32 %v5862_v27, %v9412_v40  ;;  %v1261_v57 = vpop.f32.mrf.mxu0  ;;  %v9414_v60 = vld [vmem:[#allocation3_spill] sm:$0xff] }
 0x202   :  { %v7684_v10 = vpop.eup %5865  ;;  %5871 = vrcp.f32 %v7626_v8  ;;  %v1615_v24 = vpop.f32.mrf.mxu2  ;;  %v2354_v4 = vsub.f32 %v9414_v60, %v7244_v41  ;;  %v9415_v8 = vld [vmem:[#allocation2_spill] sm:$0xff]  ;;  %v1886_v14 = vmul.f32 0.35355338, %v1261_v57 }
 0x203   :  { %v3371_v23 = vunpack.c.l.b16 %v3227_v30  ;;  %5873 = vpow2.f32 %v2568_v42  ;;  %v2338_v30 = vsub.f32 %v9415_v8, %v7242_v58  ;;  %v3242_v27 = vpack.c.bf16 %v3114_v36, %v3114_v36  ;;  %v9417_v57 = vld [vmem:[#allocation38_spill] sm:$0xff]  ;;  %v9420_v8 = vld [vmem:[#allocation37_spill] sm:$0xff] }
 0x204   :  { %2728 = vadd.xlane.f32.xlu2 %v7682_v44  ;;  %2792 = vadd.xlane.f32.xlu1 %v7684_v10  ;;  %v1918_v21 = vmul.f32 0.35355338, %v1615_v24  ;;  %v7704_v58 = vsel %vm1945_vm1, %v1886_v14, -1e+30 }
 0x205   :  { %v3386_v5 = vpack.c.b16 %v3371_v23, %v3370_v32  ;;  %2248 = vmax.xlane.f32.xlu0 %v7692_v52  ;;  %v2506_v23 = vmul.f32 1.442695, %v2354_v4  ;;  %v2474_v42 = vmul.f32 1.442695, %v2338_v30  ;;  %9416 = vst [vmem:[#allocation3_spill] sm:$0xff] %v7704_v58  ;;  %v3515_v36 = vunpack.c.l.b16 %v3242_v27  ;;  %v1441_v30 = vpop.f32.mrf.mxu1 }
 0x206   :  { %v5868_v61 = vpop.eup %5867 }
 0x207   :  { %v3115_v40 = vmul.f32 %v5868_v61, %v7219_v53  ;;  %3458 = vmatmul.bf16.vlgmr.msra.gmra.mxu0 %v3386_v5  ;;  %v2781_v3 = vpop.xlane.xlu1 %2780  ;;  %v7700_v19 = vpop.xlane.xlu2 %2300  ;;  %v7709_v5 = vsel %vm1945_vm1, %v1918_v21, -1e+30 }
 0x208   :  { %v5870_v25 = vpop.eup %5869  ;;  %5875 = vrcp.f32 %v2781_v3  ;;  %v2813_v41 = vpop.xlane.xlu0 %2812  ;;  %9418 = vst [vmem:[#allocation2_spill] sm:$0xff] %v7709_v5  ;;  %v9419_v3 = vld [vmem:[#allocation4_spill] sm:$0xff] }
 0x209   :  { %v5872_v32 = vpop.eup %5871  ;;  %v3243_v60 = vpack.c.bf16 %v3115_v40, %v3115_v40  ;;  %5877 = vrcp.f32 %v2813_v41  ;;  %v3130_v53 = vmul.f32 %v5870_v25, %v9417_v57  ;;  %v2370_v4 = vsub.f32 %v9419_v3, %v7259_v1  ;;  %v9421_v25 = vld [vmem:[#allocation5_spill] sm:$0xff] }
 0x20a   :  { %v7711_v61 = vpop.eup %5873  ;;  %v3146_v40 = vmul.f32 %v5872_v32, %v9420_v8  ;;  %5879 = vpow2.f32 %v2506_v23  ;;  %v2386_v14 = vsub.f32 %v9421_v25, %v7261_v7  ;;  %v1903_v41 = vmul.f32 0.35355338, %v1441_v30  ;;  %v9422_v23 = vld [vmem:[#allocation44_spill] sm:$0xff] }
 0x20b   :  { %v3516_v24 = vunpack.c.l.b16 %v3243_v60  ;;  %5881 = vpow2.f32 %v2474_v42  ;;  %v3258_v57 = vpack.c.bf16 %v3130_v53, %v3130_v53  ;;  %v2538_v8 = vmul.f32 1.442695, %v2370_v4 }
 0x20c   :  { %2280 = vmax.xlane.f32.xlu1 %v7709_v5  ;;  %2216 = vmax.xlane.f32.xlu2 %v7704_v58  ;;  %v3274_v58 = vpack.c.bf16 %v3146_v40, %v3146_v40  ;;  %v2570_v7 = vmul.f32 1.442695, %v2386_v14  ;;  %v9424_v40 = vld [vmem:[#allocation45_spill] sm:$0xff]  ;;  %v9425_v14 = vld [vmem:[#allocation6_spill] sm:$0xff] }
 0x20d   :  { %v3531_v27 = vpack.c.b16 %v3516_v24, %v3515_v36  ;;  %2824 = vadd.xlane.f32.xlu0 %v7711_v61  ;;  %v7727_v24 = vsel %vm1945_vm1, %v1903_v41, -1e+30  ;;  %v3660_v53 = vunpack.c.l.b16 %v3258_v57  ;;  %5883 = vpow2.f32 %v2538_v8 }
 0x20e   :  { %v5876_v21 = vpop.eup %5875  ;;  %9423 = vst [vmem:[#allocation38_spill] sm:$0xff] %v7727_v24  ;;  %5885 = vpow2.f32 %v2570_v7 }
 0x20f   :  { %v5878_v60 = vpop.eup %5877  ;;  %v3131_v1 = vmul.f32 %v5876_v21, %v7246_v9  ;;  %3603 = vmatmul.bf16.vlgmr.msra.gmra.mxu1 %v3531_v27  ;;  %v7722_v32 = vpop.xlane.xlu1 %2268  ;;  %v3805_v27 = vunpack.c.l.b16 %v3274_v58  ;;  %v2339_v21 = vsub.f32 %v9425_v14, %v9424_v40 }
 0x210   :  { %v2751_v3 = vpop.xlane.xlu2 %2750  ;;  %v3147_v52 = vmul.f32 %v5878_v60, %v9422_v23  ;;  %v2719_v5 = vpop.xlane.xlu0 %2718  ;;  %v9426_v60 = vld [vmem:[#allocation7_spill] sm:$0xff] }
 0x211   :  { %v3259_v36 = vpack.c.bf16 %v3131_v1, %v3131_v1  ;;  %v7729_v30 = vpop.eup %5879  ;;  %v2355_v57 = vsub.f32 %v9426_v60, %v7292_v63  ;;  %v2476_v7 = vmul.f32 1.442695, %v2339_v21  ;;  %5887 = vrcp.f32 %v2751_v3 }
 0x212   :  { %v3275_v42 = vpack.c.bf16 %v3147_v52, %v3147_v52  ;;  %v7731_v25 = vpop.eup %5881  ;;  %v1264_v52 = vpop.f32.mrf.mxu0 }
 0x213   :  { %v3661_v9 = vunpack.c.l.b16 %v3259_v36  ;;  %v1887_v23 = vmul.f32 0.35355338, %v1264_v52  ;;  %v2508_v40 = vmul.f32 1.442695, %v2355_v57  ;;  %5889 = vpow2.f32 %v2476_v7 }
 0x214   :  { %v3806_v4 = vunpack.c.l.b16 %v3275_v42  ;;  %2250 = vmax.xlane.f32.xlu1 %v7727_v24  ;;  %2762 = vadd.xlane.f32.xlu2 %v7729_v30  ;;  %v7744_v42 = vpop.eup %5883 }
 0x215   :  { %v3676_v41 = vpack.c.b16 %v3661_v9, %v3660_v53  ;;  %2730 = vadd.xlane.f32.xlu0 %v7731_v25  ;;  %v7748_v53 = vsel %vm1945_vm1, %v1887_v23, -1e+30  ;;  %v1618_v9 = vpop.f32.mrf.mxu2  ;;  %v7750_v14 = vpop.eup %5885  ;;  %5891 = vpow2.f32 %v2508_v40 }
 0x216   :  { %v3821_v1 = vpack.c.b16 %v3806_v4, %v3805_v27  ;;  %9429 = vst [vmem:[#allocation5_spill] sm:$0xff] %v7748_v53  ;;  %v1919_v63 = vmul.f32 0.35355338, %v1618_v9  ;;  %v9431_v27 = vld [vmem:[#allocation8_spill] sm:$0xff]  ;;  %v1443_v9 = vpop.f32.mrf.mxu1 }
 0x217   :  { %3748 = vmatmul.bf16.vlgmr.msra.gmra.mxu2 %v3676_v41  ;;  %v7740_v58 = vpop.xlane.xlu1 %2238  ;;  %9430 = vst [vmem:[#allocation44_spill] sm:$0xff] %v7750_v14  ;;  %v2371_v4 = vsub.f32 %v9431_v27, %v7294_v12  ;;  %v5888_v60 = vpop.eup %5887  ;;  %v9434_v12 = vld [vmem:[#allocation9_spill] sm:$0xff]  ;;  %v1904_v24 = vmul.f32 0.35355338, %v1443_v9 }
 0x218   :  { %9427 = vst [vmem:[#allocation4_spill] sm:$0xff] %v7740_v58  ;;  %v2783_v8 = vpop.xlane.xlu2 %2782  ;;  %3893 = vmatmul.bf16.vlgmr.msra.gmra.mxu3 %v3821_v1  ;;  %v7742_v36 = vpop.xlane.xlu0 %2206  ;;  %v7763_v3 = vsel %vm1945_vm1, %v1919_v63, -1e+30  ;;  %v2387_v40 = vsub.f32 %v9434_v12, %v7296_v54  ;;  %v9435_v63 = vld [vmem:[#allocation46_spill] sm:$0xff] }
 0x219   :  { %9428 = vst [vmem:[#allocation37_spill] sm:$0xff] %v7742_v36  ;;  %v2540_v57 = vmul.f32 1.442695, %v2371_v4  ;;  %v7765_v1 = vpop.f32.mrf.mxu3  ;;  %v7767_v23 = vpop.eup %5889 }
 0x21a   :  { %9433 = vst [vmem:[#allocation6_spill] sm:$0xff] %v7763_v3  ;;  %v1266_v27 = vpop.f32.mrf.mxu0  ;;  %v2572_v12 = vmul.f32 1.442695, %v2387_v40 }
 0x21b   :  { %v7769_v7 = vpop.eup %5891 }
 0x21c   :  { %2826 = vadd.xlane.f32.xlu1 %v7750_v14  ;;  %2794 = vadd.xlane.f32.xlu2 %v7744_v42 }
 0x21d   :  { %2218 = vmax.xlane.f32.xlu0 %v7748_v53  ;;  %v1888_v53 = vmul.f32 0.35355338, %v1266_v27 }
 0x21f   :  { %v7757_v21 = vpop.xlane.xlu1 %2814  ;;  %v7788_v9 = vsel %vm1945_vm1, %v1888_v53, -1e+30  ;;  %v9440_v53 = vld [vmem:[#allocation10_spill] sm:$0xff] }
 0x220   :  { %v7759_v41 = vpop.xlane.xlu2 %2270  ;;  %v2753_v52 = vpop.xlane.xlu0 %2752  ;;  %9439 = vst [vmem:[#allocation9_spill] sm:$0xff] %v7788_v9 }
 0x221   :  { %9432 = vst [vmem:[#allocation45_spill] sm:$0xff] %v7759_v41  ;;  %5893 = vrcp.f32 %v2753_v52  ;;  %v3116_v52 = vmul.f32 %v5888_v60, %v9435_v63  ;;  %v7796_v27 = vpop.f32.mrf.mxu3 }
 0x222   :  { %5895 = vrcp.f32 %v2719_v5  ;;  %v9436_v5 = vld [vmem:[#allocation11_spill] sm:$0xff] }
 0x223   :  { %5897 = vrcp.f32 %v2783_v8  ;;  %v2340_v4 = vsub.f32 %v9436_v5, %v7317_v0  ;;  %v3244_v14 = vpack.c.bf16 %v3116_v52, %v3116_v52  ;;  %v1620_v0 = vpop.f32.mrf.mxu2 }
 0x224   :  { %2732 = vadd.xlane.f32.xlu1 %v7767_v23  ;;  %2282 = vmax.xlane.f32.xlu2 %v7763_v3  ;;  %5899 = vpow2.f32 %v2540_v57  ;;  %v7784_v57 = vsel %vm1945_vm1, %v1904_v24, -1e+30 }
 0x225   :  { %2764 = vadd.xlane.f32.xlu0 %v7769_v7  ;;  %v2478_v63 = vmul.f32 1.442695, %v2340_v4  ;;  %9438 = vst [vmem:[#allocation8_spill] sm:$0xff] %v7784_v57 }
 0x227   :  { %v5894_v8 = vpop.eup %5893  ;;  %v2721_v58 = vpop.xlane.xlu1 %2720 }
 0x228   :  { %v7779_v36 = vpop.xlane.xlu2 %2302  ;;  %v5896_v54 = vpop.eup %5895  ;;  %5901 = vrcp.f32 %v2721_v58  ;;  %v3117_v3 = vmul.f32 %v5894_v8, %v7331_v46  ;;  %v3517_v46 = vunpack.c.l.b16 %v3244_v14 }
 0x229   :  { %9437 = vst [vmem:[#allocation7_spill] sm:$0xff] %v7779_v36  ;;  %v2785_v41 = vpop.xlane.xlu0 %2784  ;;  %v5898_v60 = vpop.eup %5897  ;;  %v3100_v40 = vmul.f32 %v5896_v54, %v7281_v38  ;;  %v2356_v38 = vsub.f32 %v9440_v53, %v7315_v62 }
 0x22a   :  { %5903 = vrcp.f32 %v2785_v41  ;;  %v3245_v5 = vpack.c.bf16 %v3117_v3, %v3117_v3  ;;  %v7791_v58 = vpop.eup %5899  ;;  %v3132_v3 = vmul.f32 %v5898_v60, %v7306_v51 }
 0x22b   :  { %5905 = vpow2.f32 %v2572_v12  ;;  %v9443_v12 = vld [vmem:[#allocation57_spill] sm:$0xff]  ;;  %v2510_v62 = vmul.f32 1.442695, %v2356_v38  ;;  %v9449_v38 = vld [vmem:[#allocation55_spill] sm:$0xff] }
 0x22c   :  { %2252 = vmax.xlane.f32.xlu2 %v7784_v57  ;;  %2220 = vmax.xlane.f32.xlu1 %v7788_v9  ;;  %v3518_v41 = vunpack.c.l.b16 %v3245_v5  ;;  %5907 = vpow2.f32 %v2478_v63  ;;  %v3228_v5 = vpack.c.bf16 %v3100_v40, %v3100_v40  ;;  %v1920_v57 = vmul.f32 0.35355338, %v1620_v0  ;;  %v9446_v40 = vld [vmem:[#allocation53_spill] sm:$0xff] }
 0x22d   :  { %2796 = vadd.xlane.f32.xlu0 %v7791_v58  ;;  %v3260_v63 = vpack.c.bf16 %v3132_v3, %v3132_v3  ;;  %5909 = vrcp.f32 %v7757_v21  ;;  %v9447_v0 = vld [vmem:[#allocation13_spill] sm:$0xff] }
 0x22e   :  { %v5902_v24 = vpop.eup %5901  ;;  %v3532_v52 = vpack.c.b16 %v3518_v41, %v3517_v46  ;;  %v1269_v46 = vpop.f32.mrf.mxu0  ;;  %5911 = vpow2.f32 %v2510_v62 }
 0x22f   :  { %v7803_v54 = vpop.xlane.xlu1 %2208  ;;  %v3101_v14 = vmul.f32 %v5902_v24, %v9443_v12  ;;  %v1623_v12 = vpop.f32.mrf.mxu2  ;;  %v3662_v3 = vunpack.c.l.b16 %v3260_v63 }
 0x230   :  { %v5904_v4 = vpop.eup %5903  ;;  %v7801_v8 = vpop.xlane.xlu2 %2240  ;;  %9442 = vst [vmem:[#allocation11_spill] sm:$0xff] %v7803_v54  ;;  %3608 = vmatmul.bf16.gmra.mxu1 %v3532_v52  ;;  %v2388_v52 = vsub.f32 %v9447_v0, %v9446_v40 }
 0x231   :  { %9441 = vst [vmem:[#allocation46_spill] sm:$0xff] %v7801_v8  ;;  %v7806_v51 = vpop.xlane.xlu0 %2272  ;;  %v3133_v60 = vmul.f32 %v5904_v4, %v7348_v43  ;;  %v3229_v9 = vpack.c.bf16 %v3101_v14, %v3101_v14  ;;  %v7809_v36 = vpop.eup %5905  ;;  %v3372_v8 = vunpack.c.l.b16 %v3228_v5  ;;  %v7820_v43 = vsel %vm1945_vm1, %v1920_v57, -1e+30  ;;  %v9450_v4 = vld [vmem:[#allocation15_spill] sm:$0xff] }
 0x232   :  { %9444 = vst [vmem:[#allocation10_spill] sm:$0xff] %v7806_v51  ;;  %v7812_v53 = vpop.eup %5907  ;;  %v2357_v14 = vsub.f32 %v9450_v4, %v9449_v38  ;;  %v1889_v5 = vmul.f32 0.35355338, %v1269_v46  ;;  %v7825_v0 = vpop.f32.mrf.mxu3  ;;  %v2574_v57 = vmul.f32 1.442695, %v2388_v52  ;;  %v9454_v46 = vld [vmem:[#allocation52_spill] sm:$0xff] }
 0x233   :  { %v3261_v41 = vpack.c.bf16 %v3133_v60, %v3133_v60  ;;  %9445 = vst [vmem:[#allocation57_spill] sm:$0xff] %v7812_v53  ;;  %v3373_v24 = vunpack.c.l.b16 %v3229_v9  ;;  %v1921_v60 = vmul.f32 0.35355338, %v1623_v12  ;;  %v5910_v51 = vpop.eup %5909  ;;  %v1446_v62 = vpop.f32.mrf.mxu1  ;;  %v9457_v52 = vld [vmem:[#allocation14_spill] sm:$0xff] }
 0x234   :  { %2828 = vadd.xlane.f32.xlu2 %v7809_v36  ;;  %2734 = vadd.xlane.f32.xlu1 %v7812_v53  ;;  %9448 = vst [vmem:[#allocation53_spill] sm:$0xff] %v7820_v43  ;;  %v9458_v4 = vld [vmem:[#allocation50_spill] sm:$0xff] }
 0x235   :  { %v3663_v21 = vunpack.c.l.b16 %v3261_v41  ;;  %2284 = vmax.xlane.f32.xlu0 %v7820_v43  ;;  %v3387_v9 = vpack.c.b16 %v3373_v24, %v3372_v8  ;;  %v2512_v41 = vmul.f32 1.442695, %v2357_v14  ;;  %v7831_v12 = vsel %vm1945_vm1, %v1921_v60, -1e+30  ;;  %v9459_v14 = vld [vmem:[#allocation12_spill] sm:$0xff] }
 0x236   :  { %9452 = vst [vmem:[#allocation55_spill] sm:$0xff] %v7831_v12  ;;  %v7835_v8 = vsel %vm1945_vm1, %v1889_v5, -1e+30  ;;  %v3148_v24 = vmul.f32 %v5910_v51, %v9454_v46  ;;  %v2372_v60 = vsub.f32 %v9459_v14, %v9458_v4 }
 0x237   :  { %v3677_v40 = vpack.c.b16 %v3663_v21, %v3662_v3  ;;  %3463 = vmatmul.bf16.gmra.mxu0 %v3387_v9  ;;  %v2755_v53 = vpop.xlane.xlu1 %2754  ;;  %9453 = vst [vmem:[#allocation15_spill] sm:$0xff] %v7835_v8  ;;  %v7838_v3 = vpop.eup %5911 }
 0x238   :  { %v2817_v54 = vpop.xlane.xlu2 %2816  ;;  %9455 = vst [vmem:[#allocation52_spill] sm:$0xff] %v7838_v3 }
 0x239   :  { %5913 = vrcp.f32 %v2817_v54  ;;  %3753 = vmatmul.bf16.gmra.mxu2 %v3677_v40  ;;  %v7827_v63 = vpop.xlane.xlu0 %2304  ;;  %v9456_v54 = vld [vmem:[#allocation54_spill] sm:$0xff]  ;;  %v3276_v40 = vpack.c.bf16 %v3148_v24, %v3148_v24 }
 0x23a   :  { %9451 = vst [vmem:[#allocation13_spill] sm:$0xff] %v7827_v63  ;;  %5915 = vpow2.f32 %v2574_v57  ;;  %v2341_v21 = vsub.f32 %v9457_v52, %v9456_v54  ;;  %v1905_v57 = vmul.f32 0.35355338, %v1446_v62  ;;  %v9462_v62 = vld [vmem:[#allocation17_spill] sm:$0xff] }
 0x23b   :  { %5917 = vpow2.f32 %v2512_v41  ;;  %v2542_v41 = vmul.f32 1.442695, %v2372_v60  ;;  %v3807_v63 = vunpack.c.l.b16 %v3276_v40  ;;  %v1448_v4 = vpop.f32.mrf.mxu1  ;;  %v2373_v24 = vsub.f32 %v9462_v62, %v7365_v48  ;;  %v1271_v40 = vpop.f32.mrf.mxu0 }
 0x23c   :  { %2286 = vmax.xlane.f32.xlu1 %v7831_v12  ;;  %2222 = vmax.xlane.f32.xlu2 %v7835_v8  ;;  %v7850_v12 = vpop.f32.mrf.mxu3  ;;  %v2480_v8 = vmul.f32 1.442695, %v2341_v21 }
 0x23d   :  { %2766 = vadd.xlane.f32.xlu0 %v7838_v3 }
 0x23e   :  { %5919 = vpow2.f32 %v2480_v8 }
 0x23f   :  { %v5914_v38 = vpop.eup %5913  ;;  %v2787_v5 = vpop.xlane.xlu1 %2786  ;;  %5921 = vpow2.f32 %v2542_v41 }
 0x240   :  { %v2723_v9 = vpop.xlane.xlu2 %2722  ;;  %v3149_v51 = vmul.f32 %v5914_v38, %v7404_v6  ;;  %v7852_v54 = vpop.eup %5915  ;;  %v7860_v6 = vsel %vm1945_vm1, %v1905_v57, -1e+30  ;;  %v1906_v38 = vmul.f32 0.35355338, %v1448_v4  ;;  %5923 = vrcp.f32 %v2755_v53  ;;  %v9466_v53 = vld [vmem:[#allocation18_spill] sm:$0xff] }
 0x241   :  { %v7848_v46 = vpop.xlane.xlu0 %2242  ;;  %v7854_v52 = vpop.eup %5917  ;;  %9461 = vst [vmem:[#allocation14_spill] sm:$0xff] %v7860_v6  ;;  %5925 = vrcp.f32 %v2723_v9  ;;  %v2389_v41 = vsub.f32 %v9466_v53, %v7367_v15  ;;  %v9469_v53 = vld [vmem:[#allocation20_spill] sm:$0xff] }
 0x242   :  { %9460 = vst [vmem:[#allocation54_spill] sm:$0xff] %v7848_v46  ;;  %v3277_v43 = vpack.c.bf16 %v3149_v51, %v3149_v51  ;;  %v2544_v51 = vmul.f32 1.442695, %v2373_v24  ;;  %v7875_v48 = vsel %vm1945_vm1, %v1906_v38, -1e+30 }
 0x243   :  { %9465 = vst [vmem:[#allocation17_spill] sm:$0xff] %v7875_v48  ;;  %v2576_v46 = vmul.f32 1.442695, %v2389_v41 }
 0x244   :  { %v3808_v3 = vunpack.c.l.b16 %v3277_v43  ;;  %2768 = vadd.xlane.f32.xlu1 %v7854_v52  ;;  %2830 = vadd.xlane.f32.xlu2 %v7852_v54  ;;  %v7869_v57 = vpop.f32.mrf.mxu3  ;;  %v7871_v8 = vpop.eup %5919  ;;  %5927 = vpow2.f32 %v2544_v51 }
 0x245   :  { %2254 = vmax.xlane.f32.xlu0 %v7860_v6 }
 0x246   :  { %v3822_v21 = vpack.c.b16 %v3808_v3, %v3807_v63  ;;  %v7877_v63 = vpop.eup %5921  ;;  %v1625_v3 = vpop.f32.mrf.mxu2 }
 0x247   :  { %v7865_v43 = vpop.xlane.xlu1 %2274  ;;  %v1922_v4 = vmul.f32 0.35355338, %v1625_v3  ;;  %v5924_v24 = vpop.eup %5923 }
 0x248   :  { %3898 = vmatmul.bf16.gmra.mxu3 %v3822_v21  ;;  %9463 = vst [vmem:[#allocation50_spill] sm:$0xff] %v7865_v43  ;;  %v7867_v14 = vpop.xlane.xlu2 %2210  ;;  %v1890_v21 = vmul.f32 0.35355338, %v1271_v40  ;;  %v5926_v6 = vpop.eup %5925  ;;  %v3118_v3 = vmul.f32 %v5924_v24, %v7406_v17  ;;  %v2374_v40 = vsub.f32 %v9469_v53, %v7400_v20 }
 0x249   :  { %9464 = vst [vmem:[#allocation12_spill] sm:$0xff] %v7867_v14  ;;  %v2819_v60 = vpop.xlane.xlu0 %2818  ;;  %v1451_v14 = vpop.f32.mrf.mxu1  ;;  %v7890_v15 = vsel %vm1945_vm1, %v1922_v4, -1e+30  ;;  %v3102_v41 = vmul.f32 %v5926_v6, %v7429_v31 }
 0x24a   :  { %v7886_v51 = vpop.eup %5927  ;;  %9468 = vst [vmem:[#allocation83_spill] sm:$0xff] %v7890_v15  ;;  %v1907_v4 = vmul.f32 0.35355338, %v1451_v14  ;;  %v2546_v43 = vmul.f32 1.442695, %v2374_v40 }
 0x24b   :  { %v3230_v6 = vpack.c.bf16 %v3102_v41, %v3102_v41 }
 0x24c   :  { %2256 = vmax.xlane.f32.xlu1 %v7875_v48  ;;  %2736 = vadd.xlane.f32.xlu2 %v7871_v8  ;;  %v1274_v48 = vpop.f32.mrf.mxu0  ;;  %v7911_v14 = vsel %vm1945_vm1, %v1907_v4, -1e+30 }
 0x24d   :  { %2798 = vadd.xlane.f32.xlu0 %v7877_v63  ;;  %9472 = vst [vmem:[#allocation85_spill] sm:$0xff] %v7911_v14  ;;  %v3374_v41 = vunpack.c.l.b16 %v3230_v6 }
 0x24f   :  { %v7884_v62 = vpop.xlane.xlu1 %2244 }
 0x250   :  { %9467 = vst [vmem:[#allocation18_spill] sm:$0xff] %v7884_v62  ;;  %v2757_v9 = vpop.xlane.xlu2 %2756 }
 0x251   :  { %5929 = vrcp.f32 %v2757_v9  ;;  %v2725_v38 = vpop.xlane.xlu0 %2724  ;;  %v1891_v9 = vmul.f32 0.35355338, %v1274_v48 }
 0x252   :  { %5931 = vrcp.f32 %v2725_v38 }
 0x253   :  { %5933 = vrcp.f32 %v2819_v60  ;;  %v7899_v60 = vsel %vm1945_vm1, %v1890_v21, -1e+30 }
 0x254   :  { %5935 = vrcp.f32 %v2787_v5  ;;  %2800 = vadd.xlane.f32.xlu1 %v7886_v51  ;;  %2288 = vmax.xlane.f32.xlu2 %v7890_v15  ;;  %9470 = vst [vmem:[#allocation20_spill] sm:$0xff] %v7899_v60  ;;  %v7902_v5 = vpop.f32.mrf.mxu3  ;;  %v3246_v15 = vpack.c.bf16 %v3118_v3, %v3118_v3  ;;  %v1628_v3 = vpop.f32.mrf.mxu2 }
 0x255   :  { %2224 = vmax.xlane.f32.xlu0 %v7899_v60  ;;  %5937 = vpow2.f32 %v2576_v46  ;;  %v7915_v46 = vsel %vm1945_vm1, %v1891_v9, -1e+30  ;;  %v9474_v9 = vld [vmem:[#allocation24_spill] sm:$0xff] }
 0x256   :  { %9473 = vst [vmem:[#allocation86_spill] sm:$0xff] %v7915_v46  ;;  %v3519_v40 = vunpack.c.l.b16 %v3246_v15 }
 0x257   :  { %v5930_v17 = vpop.eup %5929  ;;  %v2821_v20 = vpop.xlane.xlu1 %2820 }
 0x258   :  { %v5932_v24 = vpop.eup %5931  ;;  %v2789_v38 = vpop.xlane.xlu2 %2788  ;;  %v3119_v53 = vmul.f32 %v5930_v17, %v7517_v45  ;;  %5939 = vrcp.f32 %v2821_v20 }
 0x259   :  { %v5934_v62 = vpop.eup %5933  ;;  %v7906_v21 = vpop.xlane.xlu0 %2212  ;;  %v3103_v31 = vmul.f32 %v5932_v24, %v7529_v49  ;;  %5941 = vrcp.f32 %v2789_v38  ;;  %v2375_v38 = vsub.f32 %v9474_v9, %v7424_v34 }
 0x25a   :  { %9471 = vst [vmem:[#allocation84_spill] sm:$0xff] %v7906_v21  ;;  %v5936_v48 = vpop.eup %5935  ;;  %v3247_v45 = vpack.c.bf16 %v3119_v53, %v3119_v53  ;;  %v3150_v60 = vmul.f32 %v5934_v62, %v7468_v33  ;;  %v1276_v49 = vpop.f32.mrf.mxu0  ;;  %5943 = vpow2.f32 %v2546_v43  ;;  %v1923_v43 = vmul.f32 0.35355338, %v1628_v3 }
 0x25b   :  { %v3231_v17 = vpack.c.bf16 %v3103_v31, %v3103_v31  ;;  %v7918_v21 = vpop.eup %5937  ;;  %v3134_v24 = vmul.f32 %v5936_v48, %v7436_v50 }
 0x25c   :  { %v3520_v20 = vunpack.c.l.b16 %v3247_v45  ;;  %2258 = vmax.xlane.f32.xlu2 %v7911_v14  ;;  %2226 = vmax.xlane.f32.xlu1 %v7915_v46  ;;  %v7926_v62 = vpop.f32.mrf.mxu3  ;;  %v1892_v45 = vmul.f32 0.35355338, %v1276_v49  ;;  %v3278_v50 = vpack.c.bf16 %v3150_v60, %v3150_v60  ;;  %v1630_v3 = vpop.f32.mrf.mxu2 }
 0x25d   :  { %v3375_v4 = vunpack.c.l.b16 %v3231_v17  ;;  %2832 = vadd.xlane.f32.xlu0 %v7918_v21  ;;  %v3262_v17 = vpack.c.bf16 %v3134_v24, %v3134_v24 }
 0x25e   :  { %v3533_v15 = vpack.c.b16 %v3520_v20, %v3519_v40  ;;  %v5940_v53 = vpop.eup %5939  ;;  %v2548_v40 = vmul.f32 1.442695, %v2375_v38  ;;  %v7936_v49 = vsel %vm1945_vm1, %v1892_v45, -1e+30  ;;  %v3809_v9 = vunpack.c.l.b16 %v3278_v50 }
 0x25f   :  { %v3388_v33 = vpack.c.b16 %v3375_v4, %v3374_v41  ;;  %v5942_v31 = vpop.eup %5941  ;;  %v2727_v14 = vpop.xlane.xlu1 %2726  ;;  %v3151_v6 = vmul.f32 %v5940_v53, %v7564_v16  ;;  %9475 = vst [vmem:[#allocation24_spill] sm:$0xff] %v7936_v49  ;;  %v9476_v16 = vld [vmem:[#allocation16_spill] sm:$0xff]  ;;  %v3664_v24 = vunpack.c.l.b16 %v3262_v17  ;;  %v9478_v53 = vld [vmem:[#allocation27_spill] sm:$0xff] }
 0x260   :  { %3613 = vmatmul.bf16.gmra.mxu1 %v3533_v15  ;;  %v7928_v46 = vpop.xlane.xlu2 %2276  ;;  %v3135_v34 = vmul.f32 %v5942_v31, %v7562_v59  ;;  %v7932_v4 = vpop.eup %5943  ;;  %v2342_v60 = vsub.f32 %v9476_v16, %v7369_v37  ;;  %v7944_v59 = vsel %vm1945_vm1, %v1923_v43, -1e+30  ;;  %5945 = vpow2.f32 %v2548_v40 }
 0x261   :  { %3468 = vmatmul.bf16.gmra.mxu0 %v3388_v33  ;;  %v2759_v48 = vpop.xlane.xlu0 %2758  ;;  %v3279_v20 = vpack.c.bf16 %v3151_v6, %v3151_v6  ;;  %9477 = vst [vmem:[#allocation16_spill] sm:$0xff] %v7944_v59  ;;  %v2391_v33 = vsub.f32 %v9478_v53, %v7448_v35  ;;  %v1453_v31 = vpop.f32.mrf.mxu1  ;;  %v1924_v6 = vmul.f32 0.35355338, %v1630_v3 }
 0x262   :  { %v3263_v41 = vpack.c.bf16 %v3135_v34, %v3135_v34  ;;  %v1908_v43 = vmul.f32 0.35355338, %v1453_v31  ;;  %5947 = vrcp.f32 %v2759_v48 }
 0x263   :  { %v3810_v15 = vunpack.c.l.b16 %v3279_v20  ;;  %v2482_v20 = vmul.f32 1.442695, %v2342_v60  ;;  %v2580_v40 = vmul.f32 1.442695, %v2391_v33  ;;  %v7959_v35 = vsel %vm1945_vm1, %v1924_v6, -1e+30 }
 0x264   :  { %2802 = vadd.xlane.f32.xlu1 %v7932_v4  ;;  %2228 = vmax.xlane.f32.xlu2 %v7936_v49  ;;  %v3665_v38 = vunpack.c.l.b16 %v3263_v41  ;;  %v7953_v41 = vpop.f32.mrf.mxu3  ;;  %9481 = vst [vmem:[#allocation88_spill] sm:$0xff] %v7959_v35  ;;  %v9483_v60 = vld [vmem:[#allocation21_spill] sm:$0xff] }
 0x265   :  { %2290 = vmax.xlane.f32.xlu0 %v7944_v59  ;;  %v3823_v45 = vpack.c.b16 %v3810_v15, %v3809_v9  ;;  %5949 = vpow2.f32 %v2482_v20  ;;  %v7965_v9 = vsel %vm1945_vm1, %v1908_v43, -1e+30  ;;  %v1279_v15 = vpop.f32.mrf.mxu0  ;;  %v2390_v48 = vsub.f32 %v9483_v60, %v7402_v11  ;;  %v1633_v20 = vpop.f32.mrf.mxu2  ;;  %v9486_v60 = vld [vmem:[#allocation64_spill] sm:$0xff] }
 0x266   :  { %v3678_v37 = vpack.c.b16 %v3665_v38, %v3664_v24  ;;  %v7955_v16 = vpop.eup %5945  ;;  %9482 = vst [vmem:[#allocation89_spill] sm:$0xff] %v7965_v9  ;;  %5951 = vpow2.f32 %v2580_v40  ;;  %v1893_v3 = vmul.f32 0.35355338, %v1279_v15 }
 0x267   :  { %3903 = vmatmul.bf16.gmra.mxu3 %v3823_v45  ;;  %v7951_v34 = vpop.xlane.xlu1 %2214 }
 0x268   :  { %v7949_v50 = vpop.xlane.xlu2 %2246  ;;  %9480 = vst [vmem:[#allocation87_spill] sm:$0xff] %v7951_v34  ;;  %3758 = vmatmul.bf16.gmra.mxu2 %v3678_v37  ;;  %v5948_v33 = vpop.eup %5947  ;;  %v2578_v37 = vmul.f32 1.442695, %v2390_v48  ;;  %v7976_v6 = vsel %vm1945_vm1, %v1893_v3, -1e+30  ;;  %v9487_v48 = vld [vmem:[#allocation23_spill] sm:$0xff] }
 0x269   :  { %9479 = vst [vmem:[#allocation27_spill] sm:$0xff] %v7949_v50  ;;  %v2791_v17 = vpop.xlane.xlu0 %2790  ;;  %v1456_v31 = vpop.f32.mrf.mxu1  ;;  %v3120_v40 = vmul.f32 %v5948_v33, %v7614_v18  ;;  %v2343_v3 = vsub.f32 %v9487_v48, %v9486_v60 }
 0x26a   :  { %9484 = vst [vmem:[#allocation21_spill] sm:$0xff] %v7976_v6  ;;  %v1909_v15 = vmul.f32 0.35355338, %v1456_v31  ;;  %v9491_v31 = vld [vmem:[#allocation61_spill] sm:$0xff] }
 0x26b   :  { %v7972_v45 = vpop.eup %5949  ;;  %v3248_v50 = vpack.c.bf16 %v3120_v40, %v3120_v40  ;;  %v2484_v60 = vmul.f32 1.442695, %v2343_v3  ;;  %v9495_v3 = vld [vmem:[#allocation22_spill] sm:$0xff] }
 0x26c   :  { %2292 = vmax.xlane.f32.xlu1 %v7959_v35  ;;  %2804 = vadd.xlane.f32.xlu2 %v7955_v16  ;;  %v7978_v43 = vpop.f32.mrf.mxu3  ;;  %v7980_v11 = vpop.eup %5951  ;;  %v7993_v18 = vsel %vm1945_vm1, %v1909_v15, -1e+30 }
 0x26d   :  { %2260 = vmax.xlane.f32.xlu0 %v7965_v9  ;;  %9485 = vst [vmem:[#allocation90_spill] sm:$0xff] %v7978_v43  ;;  %v1281_v48 = vpop.f32.mrf.mxu0  ;;  %v3521_v15 = vunpack.c.l.b16 %v3248_v50 }
 0x26e   :  { %9489 = vst [vmem:[#allocation23_spill] sm:$0xff] %v7993_v18 }
 0x26f   :  { %v2761_v38 = vpop.xlane.xlu1 %2760 }
 0x270   :  { %v2823_v24 = vpop.xlane.xlu2 %2822  ;;  %5953 = vrcp.f32 %v2761_v38 }
 0x271   :  { %v7970_v53 = vpop.xlane.xlu0 %2278  ;;  %5955 = vrcp.f32 %v2727_v14  ;;  %v1925_v14 = vmul.f32 0.35355338, %v1633_v20 }
 0x272   :  { %5957 = vrcp.f32 %v2791_v17 }
 0x273   :  { %5959 = vpow2.f32 %v2578_v37  ;;  %v7997_v33 = vsel %vm1945_vm1, %v1925_v14, -1e+30  ;;  %v9492_v37 = vld [vmem:[#allocation19_spill] sm:$0xff] }
 0x274   :  { %2836 = vadd.xlane.f32.xlu1 %v7980_v11  ;;  %2738 = vadd.xlane.f32.xlu2 %v7972_v45  ;;  %9490 = vst [vmem:[#allocation91_spill] sm:$0xff] %v7997_v33  ;;  %v2358_v20 = vsub.f32 %v9492_v37, %v9491_v31  ;;  %v8006_v14 = vpop.f32.mrf.mxu3  ;;  %v9494_v31 = vld [vmem:[#allocation63_spill] sm:$0xff] }
 0x275   :  { %2230 = vmax.xlane.f32.xlu0 %v7976_v6  ;;  %9493 = vst [vmem:[#allocation61_spill] sm:$0xff] %v8006_v14 }
 0x276   :  { %v5954_v38 = vpop.eup %5953 }
 0x277   :  { %v2793_v9 = vpop.xlane.xlu1 %2792  ;;  %v5956_v35 = vpop.eup %5955  ;;  %v3121_v59 = vmul.f32 %v5954_v38, %v7669_v13 }
 0x278   :  { %v2729_v49 = vpop.xlane.xlu2 %2728  ;;  %v5958_v34 = vpop.eup %5957  ;;  %v3104_v13 = vmul.f32 %v5956_v35, %v7602_v28  ;;  %v2514_v28 = vmul.f32 1.442695, %v2358_v20 }
 0x279   :  { %5961 = vrcp.f32 %v2729_v49  ;;  %v7988_v17 = vpop.xlane.xlu0 %2248  ;;  %v3249_v49 = vpack.c.bf16 %v3121_v59, %v3121_v59  ;;  %v8002_v40 = vpop.eup %5959  ;;  %v3136_v6 = vmul.f32 %v5958_v34, %v7647_v56  ;;  %v2359_v59 = vsub.f32 %v9495_v3, %v9494_v31 }
 0x27a   :  { %9488 = vst [vmem:[#allocation64_spill] sm:$0xff] %v7988_v17  ;;  %5963 = vrcp.f32 %v2793_v9  ;;  %v1458_v9 = vpop.f32.mrf.mxu1  ;;  %v1894_v17 = vmul.f32 0.35355338, %v1281_v48 }
 0x27b   :  { %5965 = vrcp.f32 %v2823_v24  ;;  %v3522_v38 = vunpack.c.l.b16 %v3249_v49  ;;  %v3264_v31 = vpack.c.bf16 %v3136_v6, %v3136_v6  ;;  %v2516_v14 = vmul.f32 1.442695, %v2359_v59 }
 0x27c   :  { %2262 = vmax.xlane.f32.xlu1 %v7993_v18  ;;  %2294 = vmax.xlane.f32.xlu2 %v7997_v33  ;;  %5967 = vpow2.f32 %v2484_v60  ;;  %v1910_v18 = vmul.f32 0.35355338, %v1458_v9  ;;  %v3232_v33 = vpack.c.bf16 %v3104_v13, %v3104_v13  ;;  %v8024_v9 = vsel %vm1945_vm1, %v1894_v17, -1e+30 }
 0x27d   :  { %2834 = vadd.xlane.f32.xlu0 %v8002_v40  ;;  %v3534_v35 = vpack.c.b16 %v3522_v38, %v3521_v15  ;;  %9497 = vst [vmem:[#allocation63_spill] sm:$0xff] %v8024_v9  ;;  %v3666_v6 = vunpack.c.l.b16 %v3264_v31 }
 0x27e   :  { %v8020_v48 = vsel %vm1945_vm1, %v1910_v18, -1e+30  ;;  %v9498_v18 = vld [vmem:[#allocation28_spill] sm:$0xff] }
 0x27f   :  { %v5962_v24 = vpop.eup %5961  ;;  %v8012_v43 = vpop.xlane.xlu1 %2280  ;;  %3618 = vmatmul.bf16.gmra.mxu1 %v3534_v35  ;;  %9496 = vst [vmem:[#allocation19_spill] sm:$0xff] %v8020_v48 }
 0x280   :  { %v5964_v37 = vpop.eup %5963  ;;  %v8014_v50 = vpop.xlane.xlu2 %2216  ;;  %v3105_v49 = vmul.f32 %v5962_v24, %v7682_v44  ;;  %v3376_v44 = vunpack.c.l.b16 %v3232_v33  ;;  %v2376_v24 = vsub.f32 %v9498_v18, %v7494_v47 }
 0x281   :  { %v2825_v56 = vpop.xlane.xlu0 %2824  ;;  %v3137_v34 = vmul.f32 %v5964_v37, %v7684_v10  ;;  %v5966_v3 = vpop.eup %5965 }
 0x282   :  { %5969 = vrcp.f32 %v2825_v56  ;;  %v3233_v20 = vpack.c.bf16 %v3105_v49, %v3105_v49  ;;  %v8026_v15 = vpop.eup %5967  ;;  %v3152_v59 = vmul.f32 %v5966_v3, %v7663_v26  ;;  %v8036_v49 = vpop.f32.mrf.mxu3 }
 0x283   :  { %5971 = vpow2.f32 %v2514_v28  ;;  %v3265_v60 = vpack.c.bf16 %v3137_v34, %v3137_v34  ;;  %v9499_v28 = vld [vmem:[#allocation32_spill] sm:$0xff]  ;;  %v1931_v34 = vmul.f32 0.35355338, %v7765_v1 }
 0x284   :  { %v3377_v13 = vunpack.c.l.b16 %v3233_v20  ;;  %2264 = vmax.xlane.f32.xlu2 %v8020_v48  ;;  %v3459_v10 = vpop.f32.mrf.mxu0  ;;  %2232 = vmax.xlane.f32.xlu1 %v8024_v9  ;;  %5973 = vpow2.f32 %v2516_v14  ;;  %v2377_v35 = vsub.f32 %v9499_v28, %v7546_v2  ;;  %v3280_v3 = vpack.c.bf16 %v3152_v59, %v3152_v59 }
 0x285   :  { %v3667_v38 = vunpack.c.l.b16 %v3265_v60  ;;  %v4514_v17 = vpack.c.bf16 %v3459_v10, %v3459_v10  ;;  %2740 = vadd.xlane.f32.xlu0 %v8026_v15  ;;  %v2550_v20 = vmul.f32 1.442695, %v2376_v24  ;;  %v9501_v10 = vld [vmem:[#allocation29_spill] sm:$0xff]  ;;  %v8056_v1 = vsel %vm1945_vm1, %v1931_v34, -1e+30 }
 0x286   :  { %v3389_v33 = vpack.c.b16 %v3377_v13, %v3376_v44  ;;  %v2552_v60 = vmul.f32 1.442695, %v2377_v35  ;;  %v9502_v24 = vld [vmem:[#allocation33_spill] sm:$0xff] }
 0x287   :  { %v3679_v37 = vpack.c.b16 %v3667_v38, %v3666_v6  ;;  %4643 = vst.msk [vmem:[%s9232_s3] sm:$0xf] %vm4642_vm2, %v4514_v17  ;;  %v8042_v26 = vpop.xlane.xlu1 %2250  ;;  %v2392_v6 = vsub.f32 %v9501_v10, %v7496_v55  ;;  %5975 = vpow2.f32 %v2550_v20  ;;  %v2393_v17 = vsub.f32 %v9502_v24, %v7557_v39  ;;  %v9503_v55 = vld [vmem:[#allocation66_spill] sm:$0xff]  ;;  %v9504_v35 = vld [vmem:[#allocation25_spill] sm:$0xff]  ;;  %v8078_v10 = vpop.f32.mrf.mxu2 }
 0x288   :  { %v5970_v56 = vpop.eup %5969  ;;  %3473 = vmatmul.bf16.gmra.mxu0 %v3389_v33  ;;  %9500 = vst [vmem:[#allocation22_spill] sm:$0xff] %v8042_v26  ;;  %v2763_v47 = vpop.xlane.xlu2 %2762  ;;  %5977 = vpow2.f32 %v2552_v60  ;;  %v9516_v26 = vld [vmem:[#allocation79_spill] sm:$0xff] }
 0x289   :  { %v8044_v14 = vpop.eup %5971  ;;  %3763 = vmatmul.bf16.gmra.mxu2 %v3679_v37  ;;  %v2731_v31 = vpop.xlane.xlu0 %2730  ;;  %v3153_v2 = vmul.f32 %v5970_v56, %v7711_v61  ;;  %v3811_v61 = vunpack.c.l.b16 %v3280_v3  ;;  %v2344_v37 = vsub.f32 %v9504_v35, %v9503_v55  ;;  %v2582_v39 = vmul.f32 1.442695, %v2392_v6  ;;  %v9511_v55 = vld [vmem:[#allocation72_spill] sm:$0xff]  ;;  %v9512_v35 = vld [vmem:[#allocation31_spill] sm:$0xff] }
 0x28a   :  { %v8048_v13 = vpop.eup %5973  ;;  %v2584_v60 = vmul.f32 1.442695, %v2393_v17  ;;  %5979 = vrcp.f32 %v2731_v31  ;;  %v9510_v31 = vld [vmem:[#allocation30_spill] sm:$0xff] }
 0x28b   :  { %v3281_v44 = vpack.c.bf16 %v3153_v2, %v3153_v2  ;;  %v1932_v2 = vmul.f32 0.35355338, %v7796_v27  ;;  %v2486_v27 = vmul.f32 1.442695, %v2344_v37  ;;  %5981 = vrcp.f32 %v2763_v47 }
 0x28c   :  { %v3604_v38 = vpop.f32.mrf.mxu1  ;;  %2772 = vadd.xlane.f32.xlu2 %v8048_v13  ;;  %v3461_v18 = vpop.f32.mrf.mxu0  ;;  %2770 = vadd.xlane.f32.xlu1 %v8044_v14  ;;  %5983 = vpow2.f32 %v2582_v39  ;;  %v2361_v37 = vsub.f32 %v9512_v35, %v9511_v55 }
 0x28d   :  { %v3812_v59 = vunpack.c.l.b16 %v3281_v44  ;;  %v4530_v33 = vpack.c.bf16 %v3604_v38, %v3604_v38  ;;  %v4515_v28 = vpack.c.bf16 %v3461_v18, %v3461_v18  ;;  %2306 = vmax.xlane.f32.xlu0 %v8056_v1  ;;  %v8076_v44 = vpop.f32.mrf.mxu3  ;;  %v8080_v38 = vpop.eup %5975  ;;  %v8084_v6 = vsel %vm1945_vm1, %v1932_v2, -1e+30 }
 0x28e   :  { %9506 = vst [vmem:[#allocation32_spill] sm:$0xff] %v8076_v44  ;;  %v8086_v18 = vpop.eup %5977  ;;  %5985 = vpow2.f32 %v2584_v60 }
 0x28f   :  { %v3824_v56 = vpack.c.b16 %v3812_v59, %v3811_v61  ;;  %4659 = vst.msk [vmem:[%s9232_s3 + $0x40] sm:$0xf] %vm4642_vm2, %v4530_v33  ;;  %v8068_v34 = vpop.xlane.xlu1 %2826  ;;  %v9507_v61 = vld [vmem:[#allocation67_spill] sm:$0xff]  ;;  %v9508_v59 = vld [vmem:[#allocation26_spill] sm:$0xff]  ;;  %5987 = vpow2.f32 %v2486_v27  ;;  %v2520_v27 = vmul.f32 1.442695, %v2361_v37 }
 0x290   :  { %v2795_v3 = vpop.xlane.xlu2 %2794  ;;  %4644 = vst.msk [vmem:[%s9232_s3 + $0x4] sm:$0xf] %vm4642_vm2, %v4515_v28  ;;  %v2360_v24 = vsub.f32 %v9508_v59, %v9507_v61  ;;  %v9509_v33 = vld [vmem:[#allocation70_spill] sm:$0xff]  ;;  %v5980_v39 = vpop.eup %5979 }
 0x291   :  { %3908 = vmatmul.bf16.gmra.mxu3 %v3824_v56  ;;  %v8074_v20 = vpop.xlane.xlu0 %2218  ;;  %v2345_v28 = vsub.f32 %v9510_v31, %v9509_v33  ;;  %v5982_v60 = vpop.eup %5981 }
 0x292   :  { %9505 = vst [vmem:[#allocation28_spill] sm:$0xff] %v8074_v20  ;;  %v2518_v61 = vmul.f32 1.442695, %v2360_v24  ;;  %v8103_v33 = vpop.eup %5983 }
 0x294   :  { %v3606_v17 = vpop.f32.mrf.mxu1  ;;  %2806 = vadd.xlane.f32.xlu2 %v8080_v38  ;;  %2308 = vmax.xlane.f32.xlu1 %v8084_v6  ;;  %v8105_v55 = vpop.eup %5985 }
 0x295   :  { %v4531_v47 = vpack.c.bf16 %v3606_v17, %v3606_v17  ;;  %2808 = vadd.xlane.f32.xlu0 %v8086_v18  ;;  %v2488_v17 = vmul.f32 1.442695, %v2345_v28  ;;  %v8108_v9 = vpop.eup %5987  ;;  %v3122_v28 = vmul.f32 %v5982_v60, %v7729_v30 }
 0x297   :  { %4660 = vst.msk [vmem:[%s9232_s3 + $0x44] sm:$0xf] %vm4642_vm2, %v4531_v47  ;;  %v2733_v56 = vpop.xlane.xlu1 %2732  ;;  %v3106_v47 = vmul.f32 %v5980_v39, %v7731_v25  ;;  %v9513_v25 = vld [vmem:[#allocation40_spill] sm:$0xff] }
 0x298   :  { %v8101_v2 = vpop.xlane.xlu2 %2282  ;;  %5989 = vrcp.f32 %v2733_v56  ;;  %v2426_v37 = vsub.f32 %v9513_v25, %v7661_v29 }
 0x299   :  { %v2765_v59 = vpop.xlane.xlu0 %2764 }
 0x29a   :  { %5991 = vrcp.f32 %v2765_v59  ;;  %v3749_v31 = vpop.f32.mrf.mxu2 }
 0x29b   :  { %5993 = vrcp.f32 %v2795_v3  ;;  %v4546_v35 = vpack.c.bf16 %v3749_v31, %v3749_v31  ;;  %v3894_v48 = vpop.f32.mrf.mxu3 }
 0x29c   :  { %5995 = vpow2.f32 %v2518_v61  ;;  %v4562_v24 = vpack.c.bf16 %v3894_v48, %v3894_v48  ;;  %2840 = vadd.xlane.f32.xlu2 %v8105_v55  ;;  %2838 = vadd.xlane.f32.xlu1 %v8103_v33  ;;  %v3234_v61 = vpack.c.bf16 %v3106_v47, %v3106_v47 }
 0x29d   :  { %5997 = vpow2.f32 %v2488_v17  ;;  %4675 = vst.msk [vmem:[%s9232_s3 + $0x80] sm:$0xf] %vm4642_vm2, %v4546_v35  ;;  %2742 = vadd.xlane.f32.xlu0 %v8108_v9  ;;  %v3250_v17 = vpack.c.bf16 %v3122_v28, %v3122_v28  ;;  %v2650_v35 = vmul.f32 1.442695, %v2426_v37 }
 0x29e   :  { %v5990_v3 = vpop.eup %5989  ;;  %5999 = vpow2.f32 %v2520_v27  ;;  %4691 = vst.msk [vmem:[%s9232_s3 + $0xc0] sm:$0xf] %vm4642_vm2, %v4562_v24  ;;  %v3378_v20 = vunpack.c.l.b16 %v3234_v61 }
 0x29f   :  { %v8126_v56 = vpop.xlane.xlu1 %2220  ;;  %v3107_v39 = vmul.f32 %v5990_v3, %v7767_v23  ;;  %v3523_v37 = vunpack.c.l.b16 %v3250_v17  ;;  %v9519_v17 = vld [vmem:[#allocation43_spill] sm:$0xff] }
 0x2a0   :  { %v5992_v48 = vpop.eup %5991  ;;  %v8124_v30 = vpop.xlane.xlu2 %2252  ;;  %9515 = vst [vmem:[#allocation33_spill] sm:$0xff] %v8126_v56  ;;  %v9517_v56 = vld [vmem:[#allocation39_spill] sm:$0xff] }
 0x2a1   :  { %9514 = vst [vmem:[#allocation29_spill] sm:$0xff] %v8124_v30  ;;  %v2797_v59 = vpop.xlane.xlu0 %2796  ;;  %v3123_v60 = vmul.f32 %v5992_v48, %v7769_v7  ;;  %v5994_v27 = vpop.eup %5993  ;;  %v3235_v29 = vpack.c.bf16 %v3107_v39, %v3107_v39  ;;  %v2442_v23 = vsub.f32 %v9517_v56, %v9516_v26  ;;  %v1933_v26 = vmul.f32 0.35355338, %v7825_v0 }
 0x2a2   :  { %6001 = vrcp.f32 %v2797_v59  ;;  %v8130_v31 = vpop.eup %5995  ;;  %v3751_v24 = vpop.f32.mrf.mxu2  ;;  %v3138_v39 = vmul.f32 %v5994_v27, %v7744_v42  ;;  %v9518_v59 = vld [vmem:[#allocation47_spill] sm:$0xff]  ;;  %v1934_v56 = vmul.f32 0.35355338, %v7850_v12 }
 0x2a3   :  { %6003 = vrcp.f32 %v8068_v34  ;;  %v3251_v25 = vpack.c.bf16 %v3123_v60, %v3123_v60  ;;  %v8133_v30 = vpop.eup %5997  ;;  %v4547_v47 = vpack.c.bf16 %v3751_v24, %v3751_v24  ;;  %v3896_v3 = vpop.f32.mrf.mxu3  ;;  %v3379_v7 = vunpack.c.l.b16 %v3235_v29 }
 0x2a4   :  { %v8137_v28 = vpop.eup %5999  ;;  %v4563_v48 = vpack.c.bf16 %v3896_v3, %v3896_v3  ;;  %2774 = vadd.xlane.f32.xlu2 %v8130_v31  ;;  %2744 = vadd.xlane.f32.xlu1 %v8133_v30  ;;  %v2427_v60 = vsub.f32 %v9518_v59, %v7722_v32  ;;  %6005 = vpow2.f32 %v2650_v35  ;;  %v2443_v29 = vsub.f32 %v9519_v17, %v7700_v19  ;;  %v9521_v59 = vld [vmem:[#allocation76_spill] sm:$0xff] }
 0x2a5   :  { %v3524_v34 = vunpack.c.l.b16 %v3251_v25  ;;  %4676 = vst.msk [vmem:[%s9232_s3 + $0x84] sm:$0xf] %vm4642_vm2, %v4547_v47  ;;  %2776 = vadd.xlane.f32.xlu0 %v8137_v28  ;;  %v3390_v61 = vpack.c.b16 %v3379_v7, %v3378_v20  ;;  %v2682_v24 = vmul.f32 1.442695, %v2442_v23  ;;  %v3266_v19 = vpack.c.bf16 %v3138_v39, %v3138_v39 }
 0x2a6   :  { %4692 = vst.msk [vmem:[%s9232_s3 + $0xc4] sm:$0xf] %vm4642_vm2, %v4563_v48  ;;  %v2652_v25 = vmul.f32 1.442695, %v2427_v60  ;;  %v8164_v47 = vsel %vm1945_vm1, %v1934_v56, -1e+30 }
 0x2a7   :  { %v3535_v32 = vpack.c.b16 %v3524_v34, %v3523_v37  ;;  %3478 = vmatmul.bf16.gmra.mxu0 %v3390_v61  ;;  %v8157_v12 = vpop.xlane.xlu1 %2734  ;;  %v8168_v3 = vsel %vm1945_vm1, %v1933_v26, -1e+30  ;;  %v2684_v7 = vmul.f32 1.442695, %v2443_v29  ;;  %v9520_v37 = vld [vmem:[#allocation44_spill] sm:$0xff]  ;;  %v9523_v60 = vld [vmem:[#allocation81_spill] sm:$0xff] }
 0x2a8   :  { %v6002_v42 = vpop.eup %6001  ;;  %v2829_v0 = vpop.xlane.xlu2 %2828  ;;  %v9522_v61 = vld [vmem:[#allocation36_spill] sm:$0xff]  ;;  %v9524_v56 = vld [vmem:[#allocation41_spill] sm:$0xff] }
 0x2a9   :  { %v6004_v27 = vpop.eup %6003  ;;  %6007 = vrcp.f32 %v2829_v0  ;;  %3623 = vmatmul.bf16.gmra.mxu1 %v3535_v32  ;;  %v8159_v20 = vpop.xlane.xlu0 %2284  ;;  %v3139_v35 = vmul.f32 %v6002_v42, %v7791_v58  ;;  %v2394_v17 = vsub.f32 %v9522_v61, %v9521_v59  ;;  %v3668_v58 = vunpack.c.l.b16 %v3266_v19  ;;  %v9525_v42 = vld [vmem:[#allocation74_spill] sm:$0xff] }
 0x2aa   :  { %v3154_v23 = vmul.f32 %v6004_v27, %v9520_v37  ;;  %v8171_v34 = vpop.eup %6005  ;;  %6009 = vpow2.f32 %v2682_v24  ;;  %v2395_v26 = vsub.f32 %v9524_v56, %v9523_v60  ;;  %v9526_v0 = vld [vmem:[#allocation34_spill] sm:$0xff] }
 0x2ab   :  { %v3267_v48 = vpack.c.bf16 %v3139_v35, %v3139_v35  ;;  %6011 = vpow2.f32 %v2652_v25  ;;  %v2410_v27 = vsub.f32 %v9526_v0, %v9525_v42  ;;  %v2586_v61 = vmul.f32 1.442695, %v2394_v17  ;;  %v9529_v17 = vld [vmem:[#allocation82_spill] sm:$0xff] }
 0x2ac   :  { %2312 = vmax.xlane.f32.xlu2 %v8164_v47  ;;  %2310 = vmax.xlane.f32.xlu1 %v8168_v3  ;;  %6013 = vpow2.f32 %v2684_v7  ;;  %v2588_v60 = vmul.f32 1.442695, %v2395_v26  ;;  %v9530_v26 = vld [vmem:[#allocation42_spill] sm:$0xff] }
 0x2ad   :  { %v3669_v39 = vunpack.c.l.b16 %v3267_v48  ;;  %v3609_v29 = vpop.f32.mrf.mxu1  ;;  %2906 = vadd.xlane.f32.xlu0 %v8171_v34  ;;  %v3282_v48 = vpack.c.bf16 %v3154_v23, %v3154_v23 }
 0x2ae   :  { %v4532_v35 = vpack.c.bf16 %v3609_v29, %v3609_v29 }
 0x2af   :  { %v6008_v32 = vpop.eup %6007  ;;  %v3680_v24 = vpack.c.b16 %v3669_v39, %v3668_v58  ;;  %v8182_v37 = vpop.xlane.xlu1 %2286  ;;  %v2618_v58 = vmul.f32 1.442695, %v2410_v27  ;;  %v3813_v29 = vunpack.c.l.b16 %v3282_v48 }
 0x2b0   :  { %9527 = vst [vmem:[#allocation66_spill] sm:$0xff] %v8182_v37  ;;  %v8184_v59 = vpop.xlane.xlu2 %2222  ;;  %v3155_v19 = vmul.f32 %v6008_v32, %v7809_v36  ;;  %v8191_v7 = vpop.eup %6009  ;;  %v2411_v32 = vsub.f32 %v9530_v26, %v9529_v17  ;;  %v9535_v26 = vld [vmem:[#allocation45_spill] sm:$0xff]  ;;  %v9540_v37 = vld [vmem:[#allocation56_spill] sm:$0xff] }
 0x2b1   :  { %9528 = vst [vmem:[#allocation25_spill] sm:$0xff] %v8184_v59  ;;  %3768 = vmatmul.bf16.gmra.mxu2 %v3680_v24  ;;  %v2767_v25 = vpop.xlane.xlu0 %2766  ;;  %v8193_v39 = vpop.eup %6011 }
 0x2b2   :  { %4661 = vst.msk [vmem:[%s9232_s3 + $0x48] sm:$0xf] %vm4642_vm2, %v4532_v35  ;;  %v3283_v56 = vpack.c.bf16 %v3155_v19, %v3155_v19  ;;  %6015 = vrcp.f32 %v2767_v25  ;;  %v8195_v36 = vpop.eup %6013 }
 0x2b3   :  { %6017 = vpow2.f32 %v2586_v61 }
 0x2b4   :  { %v3814_v42 = vunpack.c.l.b16 %v3283_v56  ;;  %2938 = vadd.xlane.f32.xlu2 %v8191_v7  ;;  %v3464_v23 = vpop.f32.mrf.mxu0  ;;  %2908 = vadd.xlane.f32.xlu1 %v8193_v39  ;;  %6019 = vpow2.f32 %v2588_v60  ;;  %v2620_v60 = vmul.f32 1.442695, %v2411_v32  ;;  %v9538_v32 = vld [vmem:[#allocation60_spill] sm:$0xff] }
 0x2b5   :  { %v4516_v0 = vpack.c.bf16 %v3464_v23, %v3464_v23  ;;  %v3611_v35 = vpop.f32.mrf.mxu1  ;;  %2940 = vadd.xlane.f32.xlu0 %v8195_v36  ;;  %6021 = vpow2.f32 %v2618_v58 }
 0x2b6   :  { %v3825_v27 = vpack.c.b16 %v3814_v42, %v3813_v29  ;;  %v4533_v24 = vpack.c.bf16 %v3611_v35, %v3611_v35  ;;  %v9533_v42 = vld [vmem:[#allocation52_spill] sm:$0xff] }
 0x2b7   :  { %4645 = vst.msk [vmem:[%s9232_s3 + $0x8] sm:$0xf] %vm4642_vm2, %v4516_v0  ;;  %v2769_v19 = vpop.xlane.xlu1 %2768  ;;  %v9536_v0 = vld [vmem:[#allocation51_spill] sm:$0xff] }
 0x2b8   :  { %3913 = vmatmul.bf16.gmra.mxu3 %v3825_v27  ;;  %v8206_v48 = vpop.xlane.xlu2 %2830  ;;  %v6016_v61 = vpop.eup %6015  ;;  %4662 = vst.msk [vmem:[%s9232_s3 + $0x4c] sm:$0xf] %vm4642_vm2, %v4533_v24  ;;  %6023 = vrcp.f32 %v2769_v19  ;;  %v2428_v35 = vsub.f32 %v9536_v0, %v9535_v26 }
 0x2b9   :  { %v8212_v25 = vpop.xlane.xlu0 %2254  ;;  %6025 = vrcp.f32 %v8157_v12  ;;  %v8215_v56 = vpop.eup %6017  ;;  %v3124_v23 = vmul.f32 %v6016_v61, %v9533_v42  ;;  %v9537_v12 = vld [vmem:[#allocation10_spill] sm:$0xff]  ;;  %v9539_v42 = vld [vmem:[#allocation7_spill] sm:$0xff] }
 0x2ba   :  { %9531 = vst [vmem:[#allocation67_spill] sm:$0xff] %v8212_v25  ;;  %v8217_v58 = vpop.eup %6019  ;;  %6027 = vpow2.f32 %v2620_v60  ;;  %v2429_v19 = vsub.f32 %v9538_v32, %v9537_v12  ;;  %v1935_v25 = vmul.f32 0.35355338, %v7869_v57  ;;  %v2444_v44 = vsub.f32 %v9540_v37, %v9539_v42 }
 0x2bb   :  { %9532 = vst [vmem:[#allocation26_spill] sm:$0xff] %v8215_v56  ;;  %v8220_v17 = vpop.eup %6021  ;;  %v2654_v37 = vmul.f32 1.442695, %v2428_v35 }
 0x2bc   :  { %v3754_v29 = vpop.f32.mrf.mxu2  ;;  %9534 = vst [vmem:[#allocation70_spill] sm:$0xff] %v8220_v17  ;;  %2844 = vadd.xlane.f32.xlu2 %v8217_v58  ;;  %v3466_v24 = vpop.f32.mrf.mxu0  ;;  %2842 = vadd.xlane.f32.xlu1 %v8215_v56  ;;  %v2656_v12 = vmul.f32 1.442695, %v2429_v19  ;;  %v8246_v32 = vsel %vm1945_vm1, %v1935_v25, -1e+30  ;;  %v9545_v19 = vld [vmem:[#allocation49_spill] sm:$0xff] }
 0x2bd   :  { %v4548_v27 = vpack.c.bf16 %v3754_v29, %v3754_v29  ;;  %v4517_v59 = vpack.c.bf16 %v3466_v24, %v3466_v24  ;;  %2874 = vadd.xlane.f32.xlu0 %v8220_v17  ;;  %v1936_v29 = vmul.f32 0.35355338, %v7902_v5  ;;  %v3252_v24 = vpack.c.bf16 %v3124_v23, %v3124_v23 }
 0x2be   :  { %v6024_v61 = vpop.eup %6023  ;;  %v2686_v42 = vmul.f32 1.442695, %v2444_v44  ;;  %v9546_v44 = vld [vmem:[#allocation13_spill] sm:$0xff] }
 0x2bf   :  { %4677 = vst.msk [vmem:[%s9232_s3 + $0x88] sm:$0xf] %vm4642_vm2, %v4548_v27  ;;  %v6026_v60 = vpop.eup %6025  ;;  %v8241_v57 = vpop.xlane.xlu1 %2256  ;;  %v3125_v0 = vmul.f32 %v6024_v61, %v7854_v52  ;;  %v3525_v23 = vunpack.c.l.b16 %v3252_v24  ;;  %v9544_v61 = vld [vmem:[#allocation37_spill] sm:$0xff]  ;;  %v9548_v24 = vld [vmem:[#allocation11_spill] sm:$0xff] }
 0x2c0   :  { %4646 = vst.msk [vmem:[%s9232_s3 + $0xc] sm:$0xf] %vm4642_vm2, %v4517_v59  ;;  %v2737_v26 = vpop.xlane.xlu2 %2736  ;;  %v8250_v59 = vsel %vm1945_vm1, %v1936_v29, -1e+30  ;;  %v8253_v56 = vpop.eup %6027  ;;  %v9547_v29 = vld [vmem:[#allocation62_spill] sm:$0xff] }
 0x2c1   :  { %9541 = vst [vmem:[#allocation30_spill] sm:$0xff] %v8241_v57  ;;  %6029 = vrcp.f32 %v2737_v26  ;;  %v2799_v5 = vpop.xlane.xlu0 %2798  ;;  %v3253_v27 = vpack.c.bf16 %v3125_v0, %v3125_v0  ;;  %v9542_v57 = vld [vmem:[#allocation57_spill] sm:$0xff]  ;;  %v2396_v26 = vsub.f32 %v9545_v19, %v9544_v61  ;;  %v2445_v0 = vsub.f32 %v9547_v29, %v9546_v44 }
 0x2c2   :  { %6031 = vrcp.f32 %v2799_v5  ;;  %v3108_v17 = vmul.f32 %v6026_v60, %v9542_v57  ;;  %9543 = vst [vmem:[#allocation72_spill] sm:$0xff] %v8253_v56  ;;  %v9549_v5 = vld [vmem:[#allocation59_spill] sm:$0xff] }
 0x2c3   :  { %v3526_v35 = vunpack.c.l.b16 %v3253_v27  ;;  %6033 = vpow2.f32 %v2654_v37  ;;  %v2397_v27 = vsub.f32 %v9549_v5, %v9548_v24  ;;  %v2590_v44 = vmul.f32 1.442695, %v2396_v26  ;;  %v9551_v26 = vld [vmem:[#allocation4_spill] sm:$0xff] }
 0x2c4   :  { %v3756_v52 = vpop.f32.mrf.mxu2  ;;  %2314 = vmax.xlane.f32.xlu2 %v8246_v32  ;;  %2876 = vadd.xlane.f32.xlu1 %v8253_v56  ;;  %6035 = vpow2.f32 %v2656_v12  ;;  %v3236_v37 = vpack.c.bf16 %v3108_v17, %v3108_v17 }
 0x2c5   :  { %v4549_v25 = vpack.c.bf16 %v3756_v52, %v3756_v52  ;;  %2316 = vmax.xlane.f32.xlu0 %v8250_v59  ;;  %v3536_v60 = vpack.c.b16 %v3526_v35, %v3525_v23  ;;  %6037 = vpow2.f32 %v2686_v42  ;;  %v2688_v42 = vmul.f32 1.442695, %v2445_v0  ;;  %v9553_v0 = vld [vmem:[#allocation46_spill] sm:$0xff] }
 0x2c6   :  { %v2592_v24 = vmul.f32 1.442695, %v2397_v27  ;;  %v3380_v56 = vunpack.c.l.b16 %v3236_v37  ;;  %v9554_v27 = vld [vmem:[#allocation58_spill] sm:$0xff] }
 0x2c7   :  { %v6030_v57 = vpop.eup %6029  ;;  %4678 = vst.msk [vmem:[%s9232_s3 + $0x8c] sm:$0xf] %vm4642_vm2, %v4549_v25  ;;  %3628 = vmatmul.bf16.gmra.mxu1 %v3536_v60  ;;  %v2801_v52 = vpop.xlane.xlu1 %2800  ;;  %v2413_v37 = vsub.f32 %v9554_v27, %v9553_v0 }
 0x2c8   :  { %v8268_v12 = vpop.xlane.xlu2 %2288  ;;  %v3109_v61 = vmul.f32 %v6030_v57, %v7871_v8  ;;  %v6032_v19 = vpop.eup %6031  ;;  %6039 = vrcp.f32 %v2801_v52  ;;  %v9552_v52 = vld [vmem:[#allocation48_spill] sm:$0xff] }
 0x2c9   :  { %v8271_v23 = vpop.xlane.xlu0 %2224  ;;  %v8273_v29 = vpop.eup %6033  ;;  %6041 = vrcp.f32 %v8206_v48  ;;  %v3140_v8 = vmul.f32 %v6032_v19, %v7877_v63 }
 0x2ca   :  { %9550 = vst [vmem:[#allocation31_spill] sm:$0xff] %v8271_v23  ;;  %v3237_v35 = vpack.c.bf16 %v3109_v61, %v3109_v61  ;;  %v8275_v25 = vpop.eup %6035  ;;  %v2412_v23 = vsub.f32 %v9552_v52, %v9551_v26  ;;  %6043 = vpow2.f32 %v2590_v44  ;;  %v2624_v52 = vmul.f32 1.442695, %v2413_v37 }
 0x2cb   :  { %v3899_v5 = vpop.f32.mrf.mxu3  ;;  %v8279_v57 = vpop.eup %6037  ;;  %6045 = vpow2.f32 %v2688_v42 }
 0x2cc   :  { %v4564_v17 = vpack.c.bf16 %v3899_v5, %v3899_v5  ;;  %v3381_v60 = vunpack.c.l.b16 %v3237_v35  ;;  %2912 = vadd.xlane.f32.xlu2 %v8275_v25  ;;  %2910 = vadd.xlane.f32.xlu1 %v8273_v29  ;;  %6047 = vpow2.f32 %v2592_v24  ;;  %v3268_v35 = vpack.c.bf16 %v3140_v8, %v3140_v8  ;;  %v9558_v8 = vld [vmem:[#allocation68_spill] sm:$0xff] }
 0x2cd   :  { %2942 = vadd.xlane.f32.xlu0 %v8279_v57  ;;  %v2622_v5 = vmul.f32 1.442695, %v2412_v23  ;;  %v9557_v23 = vld [vmem:[#allocation50_spill] sm:$0xff] }
 0x2ce   :  { %4693 = vst.msk [vmem:[%s9232_s3 + $0xc8] sm:$0xf] %vm4642_vm2, %v4564_v17  ;;  %v3391_v63 = vpack.c.b16 %v3381_v60, %v3380_v56  ;;  %v6040_v48 = vpop.eup %6039  ;;  %v3670_v60 = vunpack.c.l.b16 %v3268_v35  ;;  %v2430_v37 = vsub.f32 %v9558_v8, %v9557_v23 }
 0x2cf   :  { %v8294_v19 = vpop.xlane.xlu1 %2226  ;;  %v3141_v44 = vmul.f32 %v6040_v48, %v7886_v51  ;;  %v6042_v26 = vpop.eup %6041 }
 0x2d0   :  { %3483 = vmatmul.bf16.gmra.mxu0 %v3391_v63  ;;  %v8292_v61 = vpop.xlane.xlu2 %2258  ;;  %9556 = vst [vmem:[#allocation79_spill] sm:$0xff] %v8294_v19  ;;  %v8297_v17 = vpop.eup %6043  ;;  %v3156_v51 = vmul.f32 %v6042_v26, %v7852_v54  ;;  %v2658_v23 = vmul.f32 1.442695, %v2430_v37 }
 0x2d1   :  { %9555 = vst [vmem:[#allocation40_spill] sm:$0xff] %v8292_v61  ;;  %v2833_v42 = vpop.xlane.xlu0 %2832  ;;  %v3269_v0 = vpack.c.bf16 %v3141_v44, %v3141_v44  ;;  %v8299_v56 = vpop.eup %6045  ;;  %v9559_v44 = vld [vmem:[#allocation75_spill] sm:$0xff] }
 0x2d2   :  { %6049 = vrcp.f32 %v2833_v42  ;;  %v8301_v61 = vpop.eup %6047  ;;  %v2431_v35 = vsub.f32 %v9559_v44, %v7928_v46 }
 0x2d3   :  { %v3901_v27 = vpop.f32.mrf.mxu3  ;;  %v3671_v63 = vunpack.c.l.b16 %v3269_v0  ;;  %6051 = vpow2.f32 %v2622_v5  ;;  %v1937_v5 = vmul.f32 0.35355338, %v7926_v62 }
 0x2d4   :  { %v4565_v24 = vpack.c.bf16 %v3901_v27, %v3901_v27  ;;  %2846 = vadd.xlane.f32.xlu2 %v8297_v17  ;;  %2944 = vadd.xlane.f32.xlu1 %v8299_v56  ;;  %6053 = vpow2.f32 %v2624_v52  ;;  %v3284_v27 = vpack.c.bf16 %v3156_v51, %v3156_v51  ;;  %v2660_v8 = vmul.f32 1.442695, %v2431_v35  ;;  %v9561_v35 = vld [vmem:[#allocation12_spill] sm:$0xff] }
 0x2d5   :  { %2848 = vadd.xlane.f32.xlu0 %v8301_v61  ;;  %v3681_v48 = vpack.c.b16 %v3671_v63, %v3670_v60  ;;  %v8325_v46 = vsel %vm1945_vm1, %v1937_v5, -1e+30  ;;  %v1938_v51 = vmul.f32 0.35355338, %v7953_v41  ;;  %v9562_v5 = vld [vmem:[#allocation69_spill] sm:$0xff] }
 0x2d6   :  { %4694 = vst.msk [vmem:[%s9232_s3 + $0xcc] sm:$0xf] %vm4642_vm2, %v4565_v24 }
 0x2d7   :  { %3773 = vmatmul.bf16.gmra.mxu2 %v3681_v48  ;;  %v2803_v54 = vpop.xlane.xlu1 %2802  ;;  %v3815_v48 = vunpack.c.l.b16 %v3284_v27 }
 0x2d8   :  { %v6050_v42 = vpop.eup %6049  ;;  %v8316_v26 = vpop.xlane.xlu2 %2228  ;;  %6055 = vrcp.f32 %v2803_v54 }
 0x2d9   :  { %9560 = vst [vmem:[#allocation39_spill] sm:$0xff] %v8316_v26  ;;  %v8318_v52 = vpop.xlane.xlu0 %2290  ;;  %v3157_v0 = vmul.f32 %v6050_v42, %v7918_v21  ;;  %v8321_v24 = vpop.eup %6051  ;;  %6057 = vpow2.f32 %v2658_v23  ;;  %v2398_v42 = vsub.f32 %v9562_v5, %v9561_v35 }
 0x2da   :  { %v8327_v60 = vpop.eup %6053  ;;  %6059 = vpow2.f32 %v2660_v8  ;;  %v8349_v8 = vsel %vm1945_vm1, %v1938_v51, -1e+30  ;;  %v9567_v51 = vld [vmem:[#allocation18_spill] sm:$0xff] }
 0x2db   :  { %v3285_v62 = vpack.c.bf16 %v3157_v0, %v3157_v0 }
 0x2dc   :  { %2880 = vadd.xlane.f32.xlu2 %v8327_v60  ;;  %2878 = vadd.xlane.f32.xlu1 %v8321_v24 }
 0x2dd   :  { %v3614_v63 = vpop.f32.mrf.mxu1  ;;  %v3816_v21 = vunpack.c.l.b16 %v3285_v62  ;;  %2318 = vmax.xlane.f32.xlu0 %v8325_v46 }
 0x2de   :  { %v4534_v37 = vpack.c.bf16 %v3614_v63, %v3614_v63  ;;  %v3469_v44 = vpop.f32.mrf.mxu0  ;;  %v6056_v62 = vpop.eup %6055  ;;  %v2594_v63 = vmul.f32 1.442695, %v2398_v42 }
 0x2df   :  { %v4518_v54 = vpack.c.bf16 %v3469_v44, %v3469_v44  ;;  %v3826_v0 = vpack.c.b16 %v3816_v21, %v3815_v48  ;;  %v8339_v27 = vpop.xlane.xlu1 %2292  ;;  %v8351_v48 = vpop.eup %6057  ;;  %v3142_v21 = vmul.f32 %v6056_v62, %v7932_v4 }
 0x2e0   :  { %4663 = vst.msk [vmem:[%s9232_s3 + $0x50] sm:$0xf] %vm4642_vm2, %v4534_v37  ;;  %v2805_v23 = vpop.xlane.xlu2 %2804  ;;  %v8354_v37 = vpop.eup %6059 }
 0x2e1   :  { %9563 = vst [vmem:[#allocation47_spill] sm:$0xff] %v8339_v27  ;;  %6061 = vrcp.f32 %v2805_v23  ;;  %3918 = vmatmul.bf16.gmra.mxu3 %v3826_v0  ;;  %v8345_v41 = vpop.xlane.xlu0 %2260  ;;  %v9568_v0 = vld [vmem:[#allocation71_spill] sm:$0xff] }
 0x2e2   :  { %4647 = vst.msk [vmem:[%s9232_s3 + $0x10] sm:$0xf] %vm4642_vm2, %v4518_v54  ;;  %6063 = vpow2.f32 %v2594_v63  ;;  %v2415_v42 = vsub.f32 %v9568_v0, %v9567_v51 }
 0x2e3   :  { %9564 = vst [vmem:[#allocation43_spill] sm:$0xff] %v8345_v41  ;;  %v3270_v41 = vpack.c.bf16 %v3142_v21, %v3142_v21 }
 0x2e4   :  { %9565 = vst [vmem:[#allocation44_spill] sm:$0xff] %v8351_v48  ;;  %2914 = vadd.xlane.f32.xlu2 %v8351_v48  ;;  %2320 = vmax.xlane.f32.xlu1 %v8349_v8  ;;  %v2628_v51 = vmul.f32 1.442695, %v2415_v42 }
 0x2e5   :  { %9566 = vst [vmem:[#allocation76_spill] sm:$0xff] %v8354_v37  ;;  %v3616_v44 = vpop.f32.mrf.mxu1  ;;  %2916 = vadd.xlane.f32.xlu0 %v8354_v37  ;;  %v3672_v27 = vunpack.c.l.b16 %v3270_v41 }
 0x2e6   :  { %v4535_v35 = vpack.c.bf16 %v3616_v44, %v3616_v44  ;;  %v3471_v5 = vpop.f32.mrf.mxu0 }
 0x2e7   :  { %v6062_v54 = vpop.eup %6061  ;;  %v4519_v23 = vpack.c.bf16 %v3471_v5, %v3471_v5  ;;  %v2837_v4 = vpop.xlane.xlu1 %2836 }
 0x2e8   :  { %4664 = vst.msk [vmem:[%s9232_s3 + $0x54] sm:$0xf] %vm4642_vm2, %v4535_v35  ;;  %v2739_v62 = vpop.xlane.xlu2 %2738  ;;  %v3143_v26 = vmul.f32 %v6062_v54, %v7955_v16  ;;  %6065 = vrcp.f32 %v2837_v4  ;;  %v8372_v37 = vpop.eup %6063 }
 0x2e9   :  { %4648 = vst.msk [vmem:[%s9232_s3 + $0x14] sm:$0xf] %vm4642_vm2, %v4519_v23  ;;  %v8370_v63 = vpop.xlane.xlu0 %2230  ;;  %6067 = vpow2.f32 %v2628_v51 }
 0x2ea   :  { %v3271_v44 = vpack.c.bf16 %v3143_v26, %v3143_v26  ;;  %v3904_v5 = vpop.f32.mrf.mxu3  ;;  %v9569_v26 = vld [vmem:[#allocation80_spill] sm:$0xff] }
 0x2eb   :  { %v3759_v0 = vpop.f32.mrf.mxu2  ;;  %v4566_v19 = vpack.c.bf16 %v3904_v5, %v3904_v5  ;;  %v2432_v21 = vsub.f32 %v9569_v26, %v7970_v53 }
 0x2ec   :  { %v3673_v35 = vunpack.c.l.b16 %v3271_v44  ;;  %v4550_v48 = vpack.c.bf16 %v3759_v0, %v3759_v0 }
 0x2ed   :  { %4695 = vst.msk [vmem:[%s9232_s3 + $0xd0] sm:$0xf] %vm4642_vm2, %v4566_v19  ;;  %2850 = vadd.xlane.f32.xlu0 %v8372_v37  ;;  %v2662_v19 = vmul.f32 1.442695, %v2432_v21 }
 0x2ee   :  { %v3682_v16 = vpack.c.b16 %v3673_v35, %v3672_v27  ;;  %4679 = vst.msk [vmem:[%s9232_s3 + $0x90] sm:$0xf] %vm4642_vm2, %v4550_v48  ;;  %v6066_v23 = vpop.eup %6065 }
 0x2ef   :  { %v8385_v41 = vpop.xlane.xlu1 %2262  ;;  %v8389_v51 = vpop.eup %6067  ;;  %v3159_v5 = vmul.f32 %v6066_v23, %v7980_v11  ;;  %v5790_v11 = vld [vmem:[%s9231_s2 + $0x1b8] sm:$0xff] }
 0x2f0   :  { %3778 = vmatmul.bf16.gmra.mxu2 %v3682_v16  ;;  %v8387_v54 = vpop.xlane.xlu2 %2294 }
 0x2f1   :  { %v2835_v42 = vpop.xlane.xlu0 %2834  ;;  %v3287_v26 = vpack.c.bf16 %v3159_v5, %v3159_v5  ;;  %4320 = vmatpush.bf16.msrb.mxu2 %v5790_v11  ;;  %v5797_v5 = vld [vmem:[%s9231_s2 + $0x1f0] sm:$0xff] }
 0x2f2   :  { %6069 = vrcp.f32 %v2835_v42  ;;  %v3906_v4 = vpop.f32.mrf.mxu3  ;;  %v5798_v42 = vld [vmem:[%s9231_s2 + $0x1f8] sm:$0xff] }
 0x2f3   :  { %6071 = vrcp.f32 %v2739_v62  ;;  %v3761_v27 = vpop.f32.mrf.mxu2  ;;  %v4567_v44 = vpack.c.bf16 %v3906_v4, %v3906_v4  ;;  %4465 = vmatpush.bf16.msrb.mxu3 %v5798_v42 }
 0x2f4   :  { %v4551_v53 = vpack.c.bf16 %v3761_v27, %v3761_v27  ;;  %6073 = vpow2.f32 %v2662_v19  ;;  %v5789_v19 = vld [vmem:[%s9231_s2 + $0x1b0] sm:$0xff] }
 0x2f5   :  { %4696 = vst.msk [vmem:[%s9232_s3 + $0xd4] sm:$0xf] %vm4642_vm2, %v4567_v44  ;;  %2884 = vadd.xlane.f32.xlu0 %v8389_v51  ;;  %v3818_v44 = vunpack.c.l.b16 %v3287_v26  ;;  %4321 = vmatpush.bf16.msrb.mxu2 %v5789_v19  ;;  %v5774_v26 = vld [vmem:[%s9231_s2 + $0x138] sm:$0xff] }
 0x2f6   :  { %4680 = vst.msk [vmem:[%s9232_s3 + $0x94] sm:$0xf] %vm4642_vm2, %v4551_v53  ;;  %4030 = vmatpush.bf16.msrb.mxu0 %v5774_v26 }
 0x2f7   :  { %v8403_v0 = vpop.xlane.xlu1 %2232  ;;  %4466 = vmatpush.bf16.msrb.mxu3 %v5797_v5 }
 0x2f8   :  { %v6070_v48 = vpop.eup %6069  ;;  %v8401_v62 = vpop.xlane.xlu2 %2264 }
 0x2f9   :  { %9570 = vst [vmem:[#allocation36_spill] sm:$0xff] %v8401_v62  ;;  %v2741_v35 = vpop.xlane.xlu0 %2740  ;;  %v3158_v16 = vmul.f32 %v6070_v48, %v8002_v40  ;;  %v6072_v21 = vpop.eup %6071 }
 0x2fa   :  { %6075 = vrcp.f32 %v2741_v35  ;;  %v8415_v4 = vpop.eup %6073  ;;  %v3110_v40 = vmul.f32 %v6072_v21, %v7972_v45  ;;  %v5788_v45 = vld [vmem:[%s9231_s2 + $0x1a8] sm:$0xff] }
 0x2fb   :  { %v3286_v23 = vpack.c.bf16 %v3158_v16, %v3158_v16  ;;  %4322 = vmatpush.bf16.msrb.mxu2 %v5788_v45 }
 0x2fc   :  { %v3619_v53 = vpop.f32.mrf.mxu1  ;;  %v3238_v19 = vpack.c.bf16 %v3110_v40, %v3110_v40 }
 0x2fd   :  { %v3817_v27 = vunpack.c.l.b16 %v3286_v23  ;;  %2918 = vadd.xlane.f32.xlu0 %v8415_v4  ;;  %v4536_v48 = vpack.c.bf16 %v3619_v53, %v3619_v53 }
 0x2ff   :  { %v3827_v11 = vpack.c.b16 %v3818_v44, %v3817_v27  ;;  %v2771_v42 = vpop.xlane.xlu1 %2770  ;;  %4665 = vst.msk [vmem:[%s9232_s3 + $0x58] sm:$0xf] %vm4642_vm2, %v4536_v48  ;;  %v5796_v44 = vld [vmem:[%s9231_s2 + $0x1e8] sm:$0xff]  ;;  %v5773_v48 = vld [vmem:[%s9231_s2 + $0x130] sm:$0xff] }
 0x300   :  { %v6076_v35 = vpop.eup %6075  ;;  %v2773_v16 = vpop.xlane.xlu2 %2772  ;;  %4467 = vmatpush.bf16.msrb.mxu3 %v5796_v44  ;;  %4031 = vmatpush.bf16.msrb.mxu0 %v5773_v48  ;;  %v5772_v48 = vld [vmem:[%s9231_s2 + $0x128] sm:$0xff] }
 0x301   :  { %6077 = vrcp.f32 %v2773_v16  ;;  %3923 = vmatmul.bf16.gmra.mxu3 %v3827_v11  ;;  %v2307_v21 = vpop.xlane.xlu0 %2306  ;;  %v3111_v23 = vmul.f32 %v6076_v35, %v8026_v15  ;;  %v5787_v15 = vld [vmem:[%s9231_s2 + $0x1a0] sm:$0xff]  ;;  %v3382_v11 = vunpack.c.l.b16 %v3238_v19  ;;  %v9571_v35 = vld [vmem:[#allocation84_spill] sm:$0xff]  ;;  %v9572_v16 = vld [vmem:[#allocation73_spill] sm:$0xff] }
 0x302   :  { %6079 = vrcp.f32 %v2771_v42  ;;  %v2446_v27 = vsub.f32 %v8056_v1, %v2307_v21  ;;  %v2399_v42 = vsub.f32 %v9572_v16, %v9571_v35  ;;  %4323 = vmatpush.bf16.msrb.mxu2 %v5787_v15  ;;  %v5795_v21 = vld [vmem:[%s9231_s2 + $0x1e0] sm:$0xff]  ;;  %v5782_v15 = vld [vmem:[%s9231_s2 + $0x178] sm:$0xff] }
 0x303   :  { %v3239_v53 = vpack.c.bf16 %v3111_v23, %v3111_v23  ;;  %4175 = vmatpush.bf16.msrb.mxu1 %v5782_v15 }
 0x304   :  { %v2690_v5 = vmul.f32 1.442695, %v2446_v27  ;;  %v3621_v45 = vpop.f32.mrf.mxu1  ;;  %4468 = vmatpush.bf16.msrb.mxu3 %v5795_v21  ;;  %v2596_v35 = vmul.f32 1.442695, %v2399_v42  ;;  %4032 = vmatpush.bf16.msrb.mxu0 %v5772_v48  ;;  %v9574_v21 = vld [vmem:[#allocation65_spill] sm:$0xff]  ;;  %v5785_v42 = vld [vmem:[%s9231_s2 + $0x190] sm:$0xff] }
 0x305   :  { %v3474_v40 = vpop.f32.mrf.mxu0  ;;  %v3383_v1 = vunpack.c.l.b16 %v3239_v53  ;;  %v4537_v27 = vpack.c.bf16 %v3621_v45, %v3621_v45  ;;  %v9573_v45 = vld [vmem:[#allocation54_spill] sm:$0xff] }
 0x306   :  { %6081 = vpow2.f32 %v2690_v5  ;;  %v4520_v26 = vpack.c.bf16 %v3474_v40, %v3474_v40  ;;  %v5786_v40 = vld [vmem:[%s9231_s2 + $0x198] sm:$0xff] }
 0x307   :  { %v6078_v23 = vpop.eup %6077  ;;  %v3392_v44 = vpack.c.b16 %v3383_v1, %v3382_v11  ;;  %v2309_v53 = vpop.xlane.xlu1 %2308  ;;  %4666 = vst.msk [vmem:[%s9232_s3 + $0x5c] sm:$0xf] %vm4642_vm2, %v4537_v27  ;;  %4324 = vmatpush.bf16.msrb.mxu2 %v5786_v40 }
 0x308   :  { %v6080_v62 = vpop.eup %6079  ;;  %4649 = vst.msk [vmem:[%s9232_s3 + $0x18] sm:$0xf] %vm4642_vm2, %v4520_v26  ;;  %v2807_v19 = vpop.xlane.xlu2 %2806  ;;  %v3127_v5 = vmul.f32 %v6078_v23, %v8048_v13  ;;  %v2447_v13 = vsub.f32 %v8084_v6, %v2309_v53  ;;  %v5794_v26 = vld [vmem:[%s9231_s2 + $0x1d8] sm:$0xff]  ;;  %v2414_v23 = vsub.f32 %v9574_v21, %v9573_v45 }
 0x309   :  { %6083 = vrcp.f32 %v2807_v19  ;;  %3488 = vmatmul.bf16.gmra.mxu0 %v3392_v44  ;;  %v2809_v11 = vpop.xlane.xlu0 %2808  ;;  %v3126_v1 = vmul.f32 %v6080_v62, %v8044_v14  ;;  %4469 = vmatpush.bf16.msrb.mxu3 %v5794_v26  ;;  %v5771_v14 = vld [vmem:[%s9231_s2 + $0x120] sm:$0xff]  ;;  %v5781_v62 = vld [vmem:[%s9231_s2 + $0x170] sm:$0xff] }
 0x30a   :  { %6085 = vrcp.f32 %v2809_v11  ;;  %v3255_v16 = vpack.c.bf16 %v3127_v5, %v3127_v5  ;;  %v2692_v27 = vmul.f32 1.442695, %v2447_v13  ;;  %4033 = vmatpush.bf16.msrb.mxu0 %v5771_v14  ;;  %4176 = vmatpush.bf16.msrb.mxu1 %v5781_v62  ;;  %v5793_v13 = vld [vmem:[%s9231_s2 + $0x1d0] sm:$0xff]  ;;  %v5792_v14 = vld [vmem:[%s9231_s2 + $0x1c8] sm:$0xff] }
 0x30b   :  { %v3254_v19 = vpack.c.bf16 %v3126_v1, %v3126_v1  ;;  %v2626_v1 = vmul.f32 1.442695, %v2414_v23  ;;  %4325 = vmatpush.bf16.msrb.mxu2 %v5785_v42  ;;  %v5770_v23 = vld [vmem:[%s9231_s2 + $0x118] sm:$0xff] }
 0x30c   :  { %v8473_v6 = vpop.eup %6081  ;;  %v3764_v44 = vpop.f32.mrf.mxu2  ;;  %v3528_v53 = vunpack.c.l.b16 %v3255_v16  ;;  %6087 = vpow2.f32 %v2692_v27  ;;  %v5780_v27 = vld [vmem:[%s9231_s2 + $0x168] sm:$0xff] }
 0x30d   :  { %v4552_v5 = vpack.c.bf16 %v3764_v44, %v3764_v44  ;;  %v3476_v48 = vpop.f32.mrf.mxu0  ;;  %2946 = vadd.xlane.f32.xlu1 %v8473_v6  ;;  %v3527_v15 = vunpack.c.l.b16 %v3254_v19  ;;  %6089 = vpow2.f32 %v2596_v35  ;;  %4470 = vmatpush.bf16.msrb.mxu3 %v5793_v13  ;;  %v5784_v19 = vld [vmem:[%s9231_s2 + $0x188] sm:$0xff]  ;;  %v5783_v13 = vld [vmem:[%s9231_s2 + $0x180] sm:$0xff] }
 0x30e   :  { %v4521_v40 = vpack.c.bf16 %v3476_v48, %v3476_v48  ;;  %4034 = vmatpush.bf16.msrb.mxu0 %v5770_v23  ;;  %4177 = vmatpush.bf16.msrb.mxu1 %v5780_v27 }
 0x30f   :  { %v6084_v11 = vpop.eup %6083  ;;  %4681 = vst.msk [vmem:[%s9232_s3 + $0x98] sm:$0xf] %vm4642_vm2, %v4552_v5  ;;  %v3537_v16 = vpack.c.b16 %v3528_v53, %v3527_v15  ;;  %v2839_v45 = vpop.xlane.xlu1 %2838  ;;  %4326 = vmatpush.bf16.msrb.mxu2 %v5784_v19  ;;  %v5769_v15 = vld [vmem:[%s9231_s2 + $0x110] sm:$0xff] }
 0x310   :  { %v6086_v26 = vpop.eup %6085  ;;  %4650 = vst.msk [vmem:[%s9232_s3 + $0x1c] sm:$0xf] %vm4642_vm2, %v4521_v40  ;;  %v2841_v35 = vpop.xlane.xlu2 %2840  ;;  %v3144_v21 = vmul.f32 %v6084_v11, %v8080_v38  ;;  %v5779_v40 = vld [vmem:[%s9231_s2 + $0x160] sm:$0xff] }
 0x311   :  { %6091 = vrcp.f32 %v2841_v35  ;;  %3633 = vmatmul.bf16.gmra.mxu1 %v3537_v16  ;;  %v2743_v44 = vpop.xlane.xlu0 %2742  ;;  %v3145_v53 = vmul.f32 %v6086_v26, %v8086_v18  ;;  %4471 = vmatpush.bf16.msrb.mxu3 %v5792_v14  ;;  %v9575_v35 = vld [vmem:[#allocation2_spill] sm:$0xff] }
 0x312   :  { %6093 = vrcp.f32 %v2839_v45  ;;  %v3272_v38 = vpack.c.bf16 %v3144_v21, %v3144_v21  ;;  %v8510_v62 = vpop.eup %6087  ;;  %v2433_v45 = vsub.f32 %v9575_v35, %v8012_v43  ;;  %4035 = vmatpush.bf16.msrb.mxu0 %v5769_v15  ;;  %4178 = vmatpush.bf16.msrb.mxu1 %v5779_v40  ;;  %v5791_v21 = vld [vmem:[%s9231_s2 + $0x1c0] sm:$0xff] }
 0x313   :  { %6095 = vpow2.f32 %v2626_v1  ;;  %v3273_v42 = vpack.c.bf16 %v3145_v53, %v3145_v53  ;;  %v8512_v5 = vpop.eup %6089  ;;  %2948 = vadd.xlane.f32.xlu2 %v8510_v62  ;;  %4327 = vmatpush.bf16.msrb.mxu2 %v5783_v13 }
 0x314   :  { %6097 = vrcp.f32 %v2743_v44  ;;  %v3766_v48 = vpop.f32.mrf.mxu2  ;;  %v3909_v18 = vpop.f32.mrf.mxu3  ;;  %v3674_v16 = vunpack.c.l.b16 %v3272_v38  ;;  %v9576_v44 = vld [vmem:[#allocation90_spill] sm:$0xff] }
 0x315   :  { %v4553_v11 = vpack.c.bf16 %v3766_v48, %v3766_v48  ;;  %v4568_v1 = vpack.c.bf16 %v3909_v18, %v3909_v18  ;;  %2852 = vadd.xlane.f32.xlu1 %v8512_v5  ;;  %v3675_v26 = vunpack.c.l.b16 %v3273_v42  ;;  %v1939_v53 = vmul.f32 0.35355338, %v9576_v44  ;;  %4472 = vmatpush.bf16.msrb.mxu3 %v5791_v21  ;;  %v5768_v42 = vld [vmem:[%s9231_s2 + $0x108] sm:$0xff]  ;;  %v5778_v48 = vld [vmem:[%s9231_s2 + $0x158] sm:$0xff] }
 0x316   :  { %4036 = vmatpush.bf16.msrb.mxu0 %v5768_v42  ;;  %4179 = vmatpush.bf16.msrb.mxu1 %v5778_v48 }
 0x317   :  { %v6092_v23 = vpop.eup %6091  ;;  %4682 = vst.msk [vmem:[%s9232_s3 + $0x9c] sm:$0xf] %vm4642_vm2, %v4553_v11  ;;  %v3683_v27 = vpack.c.b16 %v3675_v26, %v3674_v16  ;;  %v2745_v38 = vpop.xlane.xlu1 %2744  ;;  %v9577_v11 = vld [vmem:[#allocation87_spill] sm:$0xff]  ;;  %v2664_v16 = vmul.f32 1.442695, %v2433_v45  ;;  %v5777_v45 = vld [vmem:[%s9231_s2 + $0x150] sm:$0xff] }
 0x318   :  { %v6094_v19 = vpop.eup %6093  ;;  %4697 = vst.msk [vmem:[%s9232_s3 + $0xd8] sm:$0xf] %vm4642_vm2, %v4568_v1  ;;  %v2775_v43 = vpop.xlane.xlu2 %2774  ;;  %v3161_v14 = vmul.f32 %v6092_v23, %v8105_v55  ;;  %v9578_v1 = vld [vmem:[#allocation78_spill] sm:$0xff]  ;;  %v8554_v23 = vsel %vm1945_vm1, %v1939_v53, -1e+30 }
 0x319   :  { %v8546_v18 = vpop.eup %6095  ;;  %6099 = vrcp.f32 %v2775_v43  ;;  %3783 = vmatmul.bf16.gmra.mxu2 %v3683_v27  ;;  %v2777_v15 = vpop.xlane.xlu0 %2776  ;;  %v3160_v40 = vmul.f32 %v6094_v19, %v8103_v33  ;;  %v2400_v55 = vsub.f32 %v9578_v1, %v9577_v11  ;;  %v5767_v33 = vld [vmem:[%s9231_s2 + $0x100] sm:$0xff] }
 0x31a   :  { %v6098_v13 = vpop.eup %6097  ;;  %6101 = vrcp.f32 %v2745_v38  ;;  %v3289_v26 = vpack.c.bf16 %v3161_v14, %v3161_v14  ;;  %4037 = vmatpush.bf16.msrb.mxu0 %v5767_v33  ;;  %4180 = vmatpush.bf16.msrb.mxu1 %v5777_v45  ;;  %v9579_v14 = vld [vmem:[#allocation61_spill] sm:$0xff] }
 0x31b   :  { %6103 = vrcp.f32 %v2777_v15  ;;  %v3288_v35 = vpack.c.bf16 %v3160_v40, %v3160_v40  ;;  %2882 = vadd.xlane.f32.xlu2 %v8546_v18  ;;  %v3112_v43 = vmul.f32 %v6098_v13, %v8108_v9  ;;  %v2598_v38 = vmul.f32 1.442695, %v2400_v55  ;;  %v5776_v9 = vld [vmem:[%s9231_s2 + $0x148] sm:$0xff] }
 0x31c   :  { %v3911_v21 = vpop.f32.mrf.mxu3  ;;  %v3820_v27 = vunpack.c.l.b16 %v3289_v26  ;;  %6105 = vpow2.f32 %v2664_v16  ;;  %v1940_v42 = vmul.f32 0.35355338, %v9579_v14 }
 0x31d   :  { %v4569_v19 = vpack.c.bf16 %v3911_v21, %v3911_v21  ;;  %2322 = vmax.xlane.f32.xlu1 %v8554_v23  ;;  %v3819_v44 = vunpack.c.l.b16 %v3288_v35  ;;  %v3240_v21 = vpack.c.bf16 %v3112_v43, %v3112_v43  ;;  %6107 = vpow2.f32 %v2598_v38  ;;  %v5775_v38 = vld [vmem:[%s9231_s2 + $0x140] sm:$0xff] }
 0x31e   :  { %4181 = vmatpush.bf16.msrb.mxu1 %v5776_v9 }
 0x31f   :  { %v6100_v53 = vpop.eup %6099  ;;  %4698 = vst.msk [vmem:[%s9232_s3 + $0xdc] sm:$0xf] %vm4642_vm2, %v4569_v19  ;;  %v3828_v48 = vpack.c.b16 %v3820_v27, %v3819_v44  ;;  %v2311_v11 = vpop.xlane.xlu1 %2310  ;;  %v8579_v19 = vsel %vm1945_vm1, %v1940_v42, -1e+30  ;;  %v9584_v42 = vld [vmem:[#allocation3_spill] sm:$0xff] }
 0x320   :  { %v6102_v15 = vpop.eup %6101  ;;  %v2313_v40 = vpop.xlane.xlu2 %2312  ;;  %v3128_v1 = vmul.f32 %v6100_v53, %v8130_v31  ;;  %v2448_v16 = vsub.f32 %v8168_v3, %v2311_v11  ;;  %v9580_v53 = vld [vmem:[#allocation27_spill] sm:$0xff]  ;;  %v9581_v3 = vld [vmem:[#allocation77_spill] sm:$0xff]  ;;  %v3384_v11 = vunpack.c.l.b16 %v3240_v21 }
 0x321   :  { %v6104_v13 = vpop.eup %6103  ;;  %v2449_v55 = vsub.f32 %v8164_v47, %v2313_v40  ;;  %3928 = vmatmul.bf16.gmra.mxu3 %v3828_v48  ;;  %v2907_v26 = vpop.xlane.xlu0 %2906  ;;  %v3113_v35 = vmul.f32 %v6102_v15, %v8133_v30  ;;  %v2416_v14 = vsub.f32 %v9581_v3, %v9580_v53  ;;  %v9582_v48 = vld [vmem:[#allocation64_spill] sm:$0xff]  ;;  %v9583_v30 = vld [vmem:[#allocation35_spill] sm:$0xff]  ;;  %v2401_v15 = vsub.f32 %v9584_v42, %v8014_v50 }
 0x322   :  { %v3129_v27 = vmul.f32 %v6104_v13, %v8137_v28  ;;  %v3256_v33 = vpack.c.bf16 %v3128_v1, %v3128_v1  ;;  %v2694_v45 = vmul.f32 1.442695, %v2448_v16  ;;  %v8581_v47 = vpop.eup %6105  ;;  %v2417_v43 = vsub.f32 %v9583_v30, %v9582_v48  ;;  %4182 = vmatpush.bf16.msrb.mxu1 %v5775_v38 }
 0x323   :  { %v2696_v31 = vmul.f32 1.442695, %v2449_v55  ;;  %v3241_v44 = vpack.c.bf16 %v3113_v35, %v3113_v35  ;;  %6109 = vrcp.f32 %v2907_v26  ;;  %2324 = vmax.xlane.f32.xlu2 %v8579_v19  ;;  %v2630_v53 = vmul.f32 1.442695, %v2416_v14 }
 0x324   :  { %v3257_v28 = vpack.c.bf16 %v3129_v27, %v3129_v27  ;;  %v3479_v40 = vpop.f32.mrf.mxu0  ;;  %v3529_v55 = vunpack.c.l.b16 %v3256_v33  ;;  %v8594_v27 = vpop.eup %6107  ;;  %v2600_v3 = vmul.f32 1.442695, %v2401_v15 }
 0x325   :  { %6111 = vpow2.f32 %v2696_v31  ;;  %2920 = vadd.xlane.f32.xlu1 %v8581_v47  ;;  %v3385_v1 = vunpack.c.l.b16 %v3241_v44  ;;  %v4522_v9 = vpack.c.bf16 %v3479_v40, %v3479_v40  ;;  %v2632_v44 = vmul.f32 1.442695, %v2417_v43 }
 0x326   :  { %6113 = vpow2.f32 %v2694_v45  ;;  %v3624_v13 = vpop.f32.mrf.mxu1  ;;  %v3530_v16 = vunpack.c.l.b16 %v3257_v28 }
 0x327   :  { %v4538_v26 = vpack.c.bf16 %v3624_v13, %v3624_v13  ;;  %v3393_v35 = vpack.c.b16 %v3385_v1, %v3384_v11  ;;  %4651 = vst.msk [vmem:[%s9232_s3 + $0x20] sm:$0xf] %vm4642_vm2, %v4522_v9  ;;  %v2909_v31 = vpop.xlane.xlu1 %2908 }
 0x328   :  { %v2939_v50 = vpop.xlane.xlu2 %2938  ;;  %v3538_v21 = vpack.c.b16 %v3530_v16, %v3529_v55 }
 0x329   :  { %4667 = vst.msk [vmem:[%s9232_s3 + $0x60] sm:$0xf] %vm4642_vm2, %v4538_v26  ;;  %6115 = vrcp.f32 %v2939_v50  ;;  %3493 = vmatmul.bf16.gmra.mxu0 %v3393_v35  ;;  %v2941_v33 = vpop.xlane.xlu0 %2940  ;;  %v6110_v45 = vpop.eup %6109  ;;  %v9585_v50 = vld [vmem:[#allocation6_spill] sm:$0xff] }
 0x32a   :  { %6117 = vrcp.f32 %v2909_v31  ;;  %3638 = vmatmul.bf16.gmra.mxu1 %v3538_v21  ;;  %v3194_v30 = vmul.f32 %v6110_v45, %v8171_v34  ;;  %v2434_v31 = vsub.f32 %v9585_v50, %v8101_v2  ;;  %v1926_v2 = vmul.f32 0.35355338, %v8078_v10 }
 0x32b   :  { %v8604_v14 = vpop.eup %6111  ;;  %6119 = vrcp.f32 %v2941_v33 }
 0x32c   :  { %v8606_v48 = vpop.eup %6113  ;;  %6121 = vpow2.f32 %v2630_v53  ;;  %2952 = vadd.xlane.f32.xlu0 %v8604_v14  ;;  %v3481_v43 = vpop.f32.mrf.mxu0  ;;  %v3322_v13 = vpack.c.bf16 %v3194_v30, %v3194_v30  ;;  %v1941_v30 = vmul.f32 0.35355338, %v8036_v49 }
 0x32d   :  { %6123 = vpow2.f32 %v2632_v44  ;;  %2950 = vadd.xlane.f32.xlu2 %v8606_v48  ;;  %2854 = vadd.xlane.f32.xlu1 %v8594_v27  ;;  %v4523_v28 = vpack.c.bf16 %v3481_v43, %v3481_v43  ;;  %v9586_v44 = vld [vmem:[#allocation53_spill] sm:$0xff] }
 0x32e   :  { %6125 = vpow2.f32 %v2600_v3  ;;  %v3626_v38 = vpop.f32.mrf.mxu1  ;;  %v2435_v33 = vsub.f32 %v9586_v44, %v8159_v20 }
 0x32f   :  { %v6116_v42 = vpop.eup %6115  ;;  %v4539_v15 = vpack.c.bf16 %v3626_v38, %v3626_v38  ;;  %4652 = vst.msk [vmem:[%s9232_s3 + $0x24] sm:$0xf] %vm4642_vm2, %v4523_v28  ;;  %v2843_v34 = vpop.xlane.xlu1 %2842 }
 0x330   :  { %v6118_v40 = vpop.eup %6117  ;;  %v3210_v11 = vmul.f32 %v6116_v42, %v8191_v7  ;;  %v2845_v1 = vpop.xlane.xlu2 %2844 }
 0x331   :  { %v6120_v9 = vpop.eup %6119  ;;  %v3195_v55 = vmul.f32 %v6118_v40, %v8193_v39  ;;  %4668 = vst.msk [vmem:[%s9232_s3 + $0x64] sm:$0xf] %vm4642_vm2, %v4539_v15  ;;  %6127 = vrcp.f32 %v2845_v1  ;;  %v2875_v16 = vpop.xlane.xlu0 %2874  ;;  %v2666_v40 = vmul.f32 1.442695, %v2434_v31 }
 0x332   :  { %v8622_v26 = vpop.eup %6121  ;;  %v3338_v7 = vpack.c.bf16 %v3210_v11, %v3210_v11  ;;  %v3211_v35 = vmul.f32 %v6120_v9, %v8195_v36  ;;  %6129 = vrcp.f32 %v2843_v34  ;;  %v4240_v36 = vunpack.c.l.b16 %v3322_v13  ;;  %v9587_v11 = vld [vmem:[#allocation32_spill] sm:$0xff] }
 0x333   :  { %v8625_v53 = vpop.eup %6123  ;;  %v3323_v21 = vpack.c.bf16 %v3195_v55, %v3195_v55  ;;  %6131 = vrcp.f32 %v2875_v16  ;;  %v1942_v1 = vmul.f32 0.35355338, %v9587_v11  ;;  %v2668_v34 = vmul.f32 1.442695, %v2435_v33 }
 0x334   :  { %v8629_v39 = vpop.eup %6125  ;;  %v3339_v45 = vpack.c.bf16 %v3211_v35, %v3211_v35  ;;  %2886 = vadd.xlane.f32.xlu0 %v8622_v26  ;;  %v3769_v3 = vpop.f32.mrf.mxu2  ;;  %v4385_v38 = vunpack.c.l.b16 %v3338_v7  ;;  %v9588_v7 = vld [vmem:[#allocation26_spill] sm:$0xff]  ;;  %v8652_v33 = vsel %vm1945_vm1, %v1926_v2, -1e+30  ;;  %v9592_v2 = vld [vmem:[#allocation33_spill] sm:$0xff] }
 0x335   :  { %v4241_v43 = vunpack.c.l.b16 %v3323_v21  ;;  %2856 = vadd.xlane.f32.xlu2 %v8629_v39  ;;  %v4554_v28 = vpack.c.bf16 %v3769_v3, %v3769_v3  ;;  %2888 = vadd.xlane.f32.xlu1 %v8625_v53  ;;  %v8648_v21 = vsel %vm1945_vm1, %v1941_v30, -1e+30 }
 0x336   :  { %v4386_v42 = vunpack.c.l.b16 %v3339_v45  ;;  %v9590_v45 = vld [vmem:[#allocation5_spill] sm:$0xff] }
 0x337   :  { %v6128_v15 = vpop.eup %6127  ;;  %v4256_v20 = vpack.c.b16 %v4241_v43, %v4240_v36  ;;  %4683 = vst.msk [vmem:[%s9232_s3 + $0xa0] sm:$0xf] %vm4642_vm2, %v4554_v28  ;;  %v2877_v16 = vpop.xlane.xlu1 %2876 }
 0x338   :  { %v6130_v49 = vpop.eup %6129  ;;  %v4401_v9 = vpack.c.b16 %v4386_v42, %v4385_v38  ;;  %v3163_v13 = vmul.f32 %v6128_v15, %v8217_v58  ;;  %v2315_v55 = vpop.xlane.xlu2 %2314  ;;  %6133 = vrcp.f32 %v2877_v16  ;;  %v9589_v58 = vld [vmem:[#allocation28_spill] sm:$0xff]  ;;  %v9591_v38 = vld [vmem:[#allocation70_spill] sm:$0xff] }
 0x339   :  { %v6132_v10 = vpop.eup %6131  ;;  %v3162_v35 = vmul.f32 %v6130_v49, %v9588_v7  ;;  %v2450_v50 = vsub.f32 %v8246_v32, %v2315_v55  ;;  %4328 = vmatmul.bf16.vlgmr.msrb.gmra.mxu2 %v4256_v20  ;;  %v2317_v31 = vpop.xlane.xlu0 %2316  ;;  %v2402_v3 = vsub.f32 %v9590_v45, %v9589_v58  ;;  %6135 = vpow2.f32 %v2666_v40  ;;  %v9593_v49 = vld [vmem:[#allocation9_spill] sm:$0xff]  ;;  %v9594_v16 = vld [vmem:[#allocation72_spill] sm:$0xff] }
 0x33a   :  { %v3291_v44 = vpack.c.bf16 %v3163_v13, %v3163_v13  ;;  %4473 = vmatmul.bf16.vlgmr.msrb.gmra.mxu3 %v4401_v9  ;;  %v3178_v42 = vmul.f32 %v6132_v10, %v9591_v38  ;;  %v8660_v20 = vsel %vm1945_vm1, %v1942_v1, -1e+30  ;;  %v2403_v11 = vsub.f32 %v9593_v49, %v9592_v2  ;;  %v9598_v2 = vld [vmem:[#allocation8_spill] sm:$0xff] }
 0x33b   :  { %v3290_v36 = vpack.c.bf16 %v3162_v35, %v3162_v35  ;;  %v2698_v43 = vmul.f32 1.442695, %v2450_v50  ;;  %v3914_v32 = vpop.f32.mrf.mxu3  ;;  %6137 = vpow2.f32 %v2668_v34  ;;  %v2451_v13 = vsub.f32 %v8250_v59, %v2317_v31 }
 0x33c   :  { %v3951_v28 = vunpack.c.l.b16 %v3291_v44  ;;  %v4570_v15 = vpack.c.bf16 %v3914_v32, %v3914_v32  ;;  %2326 = vmax.xlane.f32.xlu0 %v8648_v21  ;;  %v3771_v30 = vpop.f32.mrf.mxu2  ;;  %v2602_v1 = vmul.f32 1.442695, %v2402_v3  ;;  %v3306_v34 = vpack.c.bf16 %v3178_v42, %v3178_v42  ;;  %v9595_v3 = vld [vmem:[#allocation22_spill] sm:$0xff] }
 0x33d   :  { %v3950_v9 = vunpack.c.l.b16 %v3290_v36  ;;  %2296 = vmax.xlane.f32.xlu2 %v8652_v33  ;;  %v4555_v40 = vpack.c.bf16 %v3771_v30, %v3771_v30  ;;  %2328 = vmax.xlane.f32.xlu1 %v8660_v20  ;;  %6139 = vpow2.f32 %v2698_v43  ;;  %v2604_v59 = vmul.f32 1.442695, %v2403_v11  ;;  %v9596_v36 = vld [vmem:[#allocation38_spill] sm:$0xff]  ;;  %v9597_v30 = vld [vmem:[#allocation29_spill] sm:$0xff] }
 0x33e   :  { %4699 = vst.msk [vmem:[%s9232_s3 + $0xe0] sm:$0xf] %vm4642_vm2, %v4570_v15  ;;  %v6134_v22 = vpop.eup %6133  ;;  %v2700_v58 = vmul.f32 1.442695, %v2451_v13  ;;  %v2418_v43 = vsub.f32 %v9596_v36, %v9595_v3  ;;  %v4095_v38 = vunpack.c.l.b16 %v3306_v34  ;;  %v2419_v49 = vsub.f32 %v9598_v2, %v9597_v30 }
 0x33f   :  { %v3966_v55 = vpack.c.b16 %v3951_v28, %v3950_v9  ;;  %4684 = vst.msk [vmem:[%s9232_s3 + $0xa4] sm:$0xf] %vm4642_vm2, %v4555_v40  ;;  %v3179_v10 = vmul.f32 %v6134_v22, %v9594_v16  ;;  %v2911_v35 = vpop.xlane.xlu1 %2910  ;;  %v8676_v50 = vpop.eup %6135  ;;  %v9599_v9 = vld [vmem:[#allocation66_spill] sm:$0xff]  ;;  %v9600_v40 = vld [vmem:[#allocation55_spill] sm:$0xff] }
 0x340   :  { %v2913_v7 = vpop.xlane.xlu2 %2912  ;;  %v2436_v13 = vsub.f32 %v9600_v40, %v9599_v9  ;;  %v2634_v16 = vmul.f32 1.442695, %v2418_v43 }
 0x341   :  { %6141 = vrcp.f32 %v2913_v7  ;;  %4038 = vmatmul.bf16.vlgmr.msrb.gmra.mxu0 %v3966_v55  ;;  %v2943_v31 = vpop.xlane.xlu0 %2942  ;;  %v3307_v44 = vpack.c.bf16 %v3179_v10, %v3179_v10  ;;  %v8678_v45 = vpop.eup %6137 }
 0x342   :  { %6143 = vrcp.f32 %v2911_v35  ;;  %v2670_v36 = vmul.f32 1.442695, %v2436_v13 }
 0x343   :  { %6145 = vpow2.f32 %v2602_v1  ;;  %v3916_v32 = vpop.f32.mrf.mxu3  ;;  %v8682_v28 = vpop.eup %6139  ;;  %v4096_v42 = vunpack.c.l.b16 %v3307_v44 }
 0x344   :  { %6147 = vrcp.f32 %v2943_v31  ;;  %v4571_v15 = vpack.c.bf16 %v3916_v32, %v3916_v32  ;;  %2924 = vadd.xlane.f32.xlu0 %v8678_v45  ;;  %v3629_v11 = vpop.f32.mrf.mxu1  ;;  %v2636_v31 = vmul.f32 1.442695, %v2419_v49 }
 0x345   :  { %6149 = vpow2.f32 %v2604_v59  ;;  %2922 = vadd.xlane.f32.xlu2 %v8676_v50  ;;  %2954 = vadd.xlane.f32.xlu1 %v8682_v28  ;;  %v4111_v22 = vpack.c.b16 %v4096_v42, %v4095_v38  ;;  %v4540_v1 = vpack.c.bf16 %v3629_v11, %v3629_v11 }
 0x346   :  { %6151 = vpow2.f32 %v2700_v58  ;;  %4700 = vst.msk [vmem:[%s9232_s3 + $0xe4] sm:$0xf] %vm4642_vm2, %v4571_v15  ;;  %v9601_v15 = vld [vmem:[#allocation83_spill] sm:$0xff] }
 0x347   :  { %v6142_v55 = vpop.eup %6141  ;;  %4669 = vst.msk [vmem:[%s9232_s3 + $0x68] sm:$0xf] %vm4642_vm2, %v4540_v1  ;;  %4183 = vmatmul.bf16.vlgmr.msrb.gmra.mxu1 %v4111_v22  ;;  %v2945_v7 = vpop.xlane.xlu1 %2944  ;;  %v2437_v30 = vsub.f32 %v9601_v15, %v8268_v12 }
 0x348   :  { %v6144_v34 = vpop.eup %6143  ;;  %v2847_v10 = vpop.xlane.xlu2 %2846  ;;  %v3197_v35 = vmul.f32 %v6142_v55, %v8275_v25 }
 0x349   :  { %v8700_v59 = vpop.eup %6145  ;;  %6153 = vrcp.f32 %v2847_v10  ;;  %v2849_v44 = vpop.xlane.xlu0 %2848  ;;  %v3196_v58 = vmul.f32 %v6144_v34, %v8273_v29  ;;  %v2672_v10 = vmul.f32 1.442695, %v2437_v30 }
 0x34a   :  { %v6148_v3 = vpop.eup %6147  ;;  %6155 = vrcp.f32 %v2945_v7  ;;  %v3325_v43 = vpack.c.bf16 %v3197_v35, %v3197_v35 }
 0x34b   :  { %v8703_v32 = vpop.eup %6149  ;;  %6157 = vrcp.f32 %v2849_v44  ;;  %v3324_v38 = vpack.c.bf16 %v3196_v58, %v3196_v58  ;;  %v3212_v11 = vmul.f32 %v6148_v3, %v8279_v57 }
 0x34c   :  { %v8705_v42 = vpop.eup %6151  ;;  %6159 = vpow2.f32 %v2634_v16  ;;  %2858 = vadd.xlane.f32.xlu0 %v8700_v59  ;;  %v4243_v25 = vunpack.c.l.b16 %v3325_v43  ;;  %v3631_v2 = vpop.f32.mrf.mxu1 }
 0x34d   :  { %6161 = vpow2.f32 %v2636_v31  ;;  %2956 = vadd.xlane.f32.xlu2 %v8705_v42  ;;  %v3484_v29 = vpop.f32.mrf.mxu0  ;;  %2860 = vadd.xlane.f32.xlu1 %v8703_v32  ;;  %v4242_v49 = vunpack.c.l.b16 %v3324_v38  ;;  %v4541_v40 = vpack.c.bf16 %v3631_v2, %v3631_v2  ;;  %v3340_v35 = vpack.c.bf16 %v3212_v11, %v3212_v11  ;;  %v9602_v38 = vld [vmem:[#allocation25_spill] sm:$0xff]  ;;  %v9605_v2 = vld [vmem:[#allocation20_spill] sm:$0xff] }
 0x34e   :  { %6163 = vpow2.f32 %v2670_v36  ;;  %v4524_v9 = vpack.c.bf16 %v3484_v29, %v3484_v29  ;;  %v9604_v29 = vld [vmem:[#allocation31_spill] sm:$0xff] }
 0x34f   :  { %v6154_v13 = vpop.eup %6153  ;;  %v4257_v22 = vpack.c.b16 %v4243_v25, %v4242_v49  ;;  %v2879_v55 = vpop.xlane.xlu1 %2878  ;;  %4670 = vst.msk [vmem:[%s9232_s3 + $0x6c] sm:$0xf] %vm4642_vm2, %v4541_v40  ;;  %v9603_v25 = vld [vmem:[#allocation15_spill] sm:$0xff]  ;;  %v2405_v49 = vsub.f32 %v9605_v2, %v9604_v29  ;;  %v9608_v2 = vld [vmem:[#allocation30_spill] sm:$0xff] }
 0x350   :  { %v6156_v1 = vpop.eup %6155  ;;  %4653 = vst.msk [vmem:[%s9232_s3 + $0x28] sm:$0xf] %vm4642_vm2, %v4524_v9  ;;  %v2881_v12 = vpop.xlane.xlu2 %2880  ;;  %v3164_v34 = vmul.f32 %v6154_v13, %v8297_v17  ;;  %v2404_v15 = vsub.f32 %v9603_v25, %v9602_v38  ;;  %v9606_v38 = vld [vmem:[#allocation67_spill] sm:$0xff]  ;;  %v9607_v25 = vld [vmem:[#allocation14_spill] sm:$0xff] }
 0x351   :  { %v6158_v16 = vpop.eup %6157  ;;  %6165 = vrcp.f32 %v2881_v12  ;;  %4333 = vmatmul.bf16.gmra.mxu2 %v4257_v22  ;;  %v2319_v57 = vpop.xlane.xlu0 %2318  ;;  %v3213_v7 = vmul.f32 %v6156_v1, %v8299_v56 }
 0x352   :  { %v8723_v31 = vpop.eup %6159  ;;  %6167 = vrcp.f32 %v2879_v55  ;;  %v2452_v44 = vsub.f32 %v8325_v46, %v2319_v57  ;;  %v3165_v17 = vmul.f32 %v6158_v16, %v8301_v61  ;;  %v3292_v58 = vpack.c.bf16 %v3164_v34, %v3164_v34 }
 0x353   :  { %v8727_v3 = vpop.eup %6161  ;;  %v3341_v36 = vpack.c.bf16 %v3213_v7, %v3213_v7  ;;  %6169 = vpow2.f32 %v2672_v10  ;;  %v4387_v46 = vunpack.c.l.b16 %v3340_v35  ;;  %v2606_v55 = vmul.f32 1.442695, %v2404_v15 }
 0x354   :  { %v8729_v43 = vpop.eup %6163  ;;  %v2702_v30 = vmul.f32 1.442695, %v2452_v44  ;;  %2892 = vadd.xlane.f32.xlu0 %v8727_v3  ;;  %v3293_v56 = vpack.c.bf16 %v3165_v17, %v3165_v17  ;;  %v3952_v40 = vunpack.c.l.b16 %v3292_v58  ;;  %v2608_v17 = vmul.f32 1.442695, %v2405_v49 }
 0x355   :  { %2890 = vadd.xlane.f32.xlu2 %v8723_v31  ;;  %v3486_v61 = vpop.f32.mrf.mxu0  ;;  %2926 = vadd.xlane.f32.xlu1 %v8729_v43  ;;  %v4388_v11 = vunpack.c.l.b16 %v3341_v36  ;;  %v2420_v15 = vsub.f32 %v9607_v25, %v9606_v38 }
 0x356   :  { %6171 = vpow2.f32 %v2702_v30  ;;  %v4525_v9 = vpack.c.bf16 %v3486_v61, %v3486_v61  ;;  %v3953_v13 = vunpack.c.l.b16 %v3293_v56 }
 0x357   :  { %v6166_v22 = vpop.eup %6165  ;;  %v4402_v1 = vpack.c.b16 %v4388_v11, %v4387_v46  ;;  %v2321_v16 = vpop.xlane.xlu1 %2320  ;;  %v9610_v11 = vld [vmem:[#allocation16_spill] sm:$0xff] }
 0x358   :  { %v6168_v12 = vpop.eup %6167  ;;  %4654 = vst.msk [vmem:[%s9232_s3 + $0x2c] sm:$0xf] %vm4642_vm2, %v4525_v9  ;;  %v2915_v34 = vpop.xlane.xlu2 %2914  ;;  %v3967_v10 = vpack.c.b16 %v3953_v13, %v3952_v40  ;;  %v3181_v57 = vmul.f32 %v6166_v22, %v8327_v60  ;;  %v2453_v7 = vsub.f32 %v8349_v8, %v2321_v16  ;;  %v9609_v8 = vld [vmem:[#allocation17_spill] sm:$0xff]  ;;  %v2438_v9 = vsub.f32 %v9610_v11, %v8318_v52  ;;  %v9612_v16 = vld [vmem:[#allocation76_spill] sm:$0xff] }
 0x359   :  { %6173 = vrcp.f32 %v2915_v34  ;;  %4478 = vmatmul.bf16.gmra.mxu3 %v4402_v1  ;;  %v2917_v35 = vpop.xlane.xlu0 %2916  ;;  %v3180_v44 = vmul.f32 %v6168_v12, %v8321_v24  ;;  %v8745_v36 = vpop.eup %6169  ;;  %v2421_v61 = vsub.f32 %v9609_v8, %v9608_v2  ;;  %v2638_v13 = vmul.f32 1.442695, %v2420_v15  ;;  %v9613_v15 = vld [vmem:[#allocation47_spill] sm:$0xff] }
 0x35a   :  { %6175 = vrcp.f32 %v2917_v35  ;;  %4043 = vmatmul.bf16.gmra.mxu0 %v3967_v10  ;;  %v3309_v58 = vpack.c.bf16 %v3181_v57, %v3181_v57  ;;  %v2704_v30 = vmul.f32 1.442695, %v2453_v7  ;;  %v3774_v56 = vpop.f32.mrf.mxu2  ;;  %v2674_v7 = vmul.f32 1.442695, %v2438_v9 }
 0x35b   :  { %v3308_v29 = vpack.c.bf16 %v3180_v44, %v3180_v44  ;;  %6177 = vpow2.f32 %v2606_v55  ;;  %v4556_v46 = vpack.c.bf16 %v3774_v56, %v3774_v56  ;;  %v2640_v12 = vmul.f32 1.442695, %v2421_v61  ;;  %v9611_v55 = vld [vmem:[#allocation44_spill] sm:$0xff] }
 0x35c   :  { %v8749_v60 = vpop.eup %6171  ;;  %v4098_v24 = vunpack.c.l.b16 %v3309_v58  ;;  %6179 = vpow2.f32 %v2704_v30  ;;  %v9614_v30 = vld [vmem:[#allocation88_spill] sm:$0xff] }
 0x35d   :  { %2928 = vadd.xlane.f32.xlu2 %v8745_v36  ;;  %2958 = vadd.xlane.f32.xlu0 %v8749_v60  ;;  %v4097_v49 = vunpack.c.l.b16 %v3308_v29  ;;  %6181 = vpow2.f32 %v2608_v17  ;;  %4685 = vst.msk [vmem:[%s9232_s3 + $0xa8] sm:$0xf] %vm4642_vm2, %v4556_v46  ;;  %v2439_v56 = vsub.f32 %v9614_v30, %v9613_v15 }
 0x35e   :  { %6183 = vpow2.f32 %v2638_v13  ;;  %v9616_v13 = vld [vmem:[#allocation86_spill] sm:$0xff] }
 0x35f   :  { %v6174_v40 = vpop.eup %6173  ;;  %v4112_v22 = vpack.c.b16 %v4098_v24, %v4097_v49  ;;  %6185 = vpow2.f32 %v2640_v12  ;;  %v2676_v24 = vmul.f32 1.442695, %v2439_v56 }
 0x360   :  { %v6176_v1 = vpop.eup %6175  ;;  %v3198_v34 = vmul.f32 %v6174_v40, %v9611_v55  ;;  %6187 = vpow2.f32 %v2674_v7  ;;  %v9615_v40 = vld [vmem:[#allocation79_spill] sm:$0xff]  ;;  %v9618_v7 = vld [vmem:[#allocation89_spill] sm:$0xff] }
 0x361   :  { %4188 = vmatmul.bf16.gmra.mxu1 %v4112_v22  ;;  %v3199_v10 = vmul.f32 %v6176_v1, %v9612_v16  ;;  %v8763_v57 = vpop.eup %6177  ;;  %v2406_v22 = vsub.f32 %v9616_v13, %v9615_v40  ;;  %6189 = vpow2.f32 %v2676_v24 }
 0x362   :  { %v3326_v35 = vpack.c.bf16 %v3198_v34, %v3198_v34  ;;  %v8765_v52 = vpop.eup %6179  ;;  %v3776_v44 = vpop.f32.mrf.mxu2 }
 0x363   :  { %v3327_v17 = vpack.c.bf16 %v3199_v10, %v3199_v10  ;;  %v8767_v58 = vpop.eup %6181  ;;  %v4557_v38 = vpack.c.bf16 %v3776_v44, %v3776_v44  ;;  %2960 = vadd.xlane.f32.xlu1 %v8765_v52  ;;  %v2610_v12 = vmul.f32 1.442695, %v2406_v22  ;;  %v9617_v10 = vld [vmem:[#allocation43_spill] sm:$0xff] }
 0x364   :  { %v3919_v25 = vpop.f32.mrf.mxu3  ;;  %v4244_v2 = vunpack.c.l.b16 %v3326_v35  ;;  %v8782_v46 = vpop.eup %6183  ;;  %v2423_v35 = vsub.f32 %v9618_v7, %v9617_v10 }
 0x365   :  { %2862 = vadd.xlane.f32.xlu2 %v8763_v57  ;;  %v4572_v29 = vpack.c.bf16 %v3919_v25, %v3919_v25  ;;  %2864 = vadd.xlane.f32.xlu0 %v8767_v58  ;;  %v4245_v8 = vunpack.c.l.b16 %v3327_v17  ;;  %4686 = vst.msk [vmem:[%s9232_s3 + $0xac] sm:$0xf] %vm4642_vm2, %v4557_v38  ;;  %v8784_v49 = vpop.eup %6185  ;;  %6191 = vpow2.f32 %v2610_v12  ;;  %v2851_v17 = vpop.xlane.xlu0 %2850 }
 0x366   :  { %v8786_v11 = vpop.eup %6187  ;;  %v2644_v44 = vmul.f32 1.442695, %v2423_v35 }
 0x367   :  { %4701 = vst.msk [vmem:[%s9232_s3 + $0xe8] sm:$0xf] %vm4642_vm2, %v4572_v29  ;;  %v4258_v61 = vpack.c.b16 %v4245_v8, %v4244_v2  ;;  %v8797_v55 = vpop.eup %6189 }
 0x368   :  { %6193 = vpow2.f32 %v2644_v44 }
 0x369   :  { %4338 = vmatmul.bf16.gmra.mxu2 %v4258_v61 }
 0x36b   :  { %2894 = vadd.xlane.f32.xlu1 %v8782_v46  ;;  %v8806_v38 = vpop.eup %6191 }
 0x36c   :  { %v3921_v9 = vpop.f32.mrf.mxu3 }
 0x36d   :  { %2896 = vadd.xlane.f32.xlu2 %v8784_v49  ;;  %v4573_v1 = vpack.c.bf16 %v3921_v9, %v3921_v9  ;;  %2930 = vadd.xlane.f32.xlu0 %v8786_v11  ;;  %v2885_v29 = vpop.xlane.xlu0 %2884 }
 0x36e   :  { %v8813_v56 = vpop.eup %6193 }
 0x36f   :  { %4702 = vst.msk [vmem:[%s9232_s3 + $0xec] sm:$0xf] %vm4642_vm2, %v4573_v1 }
 0x373   :  { %v3779_v34 = vpop.f32.mrf.mxu2  ;;  %2932 = vadd.xlane.f32.xlu1 %v8797_v55 }
 0x374   :  { %v4558_v16 = vpack.c.bf16 %v3779_v34, %v3779_v34 }
 0x376   :  { %4687 = vst.msk [vmem:[%s9232_s3 + $0xb0] sm:$0xf] %vm4642_vm2, %v4558_v16 }
 0x37b   :  { %v3781_v25 = vpop.f32.mrf.mxu2  ;;  %2866 = vadd.xlane.f32.xlu1 %v8806_v38 }
 0x37c   :  { %v4559_v15 = vpack.c.bf16 %v3781_v25, %v3781_v25 }
 0x37e   :  { %4688 = vst.msk [vmem:[%s9232_s3 + $0xb4] sm:$0xf] %vm4642_vm2, %v4559_v15 }
 0x380   :  { %v2947_v30 = vpop.xlane.xlu1 %2946 }
 0x381   :  { %6195 = vrcp.f32 %v2947_v30 }
 0x382   :  { %6197 = vrcp.f32 %v2851_v17 }
 0x383   :  { %2900 = vadd.xlane.f32.xlu1 %v8813_v56  ;;  %6199 = vrcp.f32 %v2885_v29 }
 0x384   :  { %v3924_v2 = vpop.f32.mrf.mxu3 }
 0x385   :  { %v4574_v8 = vpack.c.bf16 %v3924_v2, %v3924_v2  ;;  %v2919_v2 = vpop.xlane.xlu0 %2918 }
 0x386   :  { %v3489_v61 = vpop.f32.mrf.mxu0  ;;  %v2949_v9 = vpop.xlane.xlu2 %2948 }
 0x387   :  { %4703 = vst.msk [vmem:[%s9232_s3 + $0xf0] sm:$0xf] %vm4642_vm2, %v4574_v8  ;;  %v4526_v24 = vpack.c.bf16 %v3489_v61, %v3489_v61  ;;  %v6196_v40 = vpop.eup %6195  ;;  %6201 = vrcp.f32 %v2949_v9 }
 0x388   :  { %v2853_v13 = vpop.xlane.xlu1 %2852  ;;  %v6198_v22 = vpop.eup %6197  ;;  %v3214_v1 = vmul.f32 %v6196_v40, %v8473_v6 }
 0x389   :  { %4655 = vst.msk [vmem:[%s9232_s3 + $0x30] sm:$0xf] %vm4642_vm2, %v4526_v24  ;;  %6203 = vrcp.f32 %v2853_v13  ;;  %v3166_v34 = vmul.f32 %v6198_v22, %v8372_v37  ;;  %v6200_v16 = vpop.eup %6199 }
 0x38a   :  { %v3342_v6 = vpack.c.bf16 %v3214_v1, %v3214_v1  ;;  %v3183_v40 = vmul.f32 %v6200_v16, %v8389_v51 }
 0x38b   :  { %v3294_v61 = vpack.c.bf16 %v3166_v34, %v3166_v34  ;;  %v9619_v34 = vld [vmem:[#allocation39_spill] sm:$0xff] }
 0x38c   :  { %v3926_v12 = vpop.f32.mrf.mxu3  ;;  %v3311_v51 = vpack.c.bf16 %v3183_v40, %v3183_v40 }
 0x38d   :  { %v4575_v10 = vpack.c.bf16 %v3926_v12, %v3926_v12  ;;  %v6202_v7 = vpop.eup %6201  ;;  %v3954_v1 = vunpack.c.l.b16 %v3294_v61 }
 0x38e   :  { %v3634_v35 = vpop.f32.mrf.mxu1  ;;  %v3491_v44 = vpop.f32.mrf.mxu0  ;;  %v3215_v29 = vmul.f32 %v6202_v7, %v8510_v62 }
 0x38f   :  { %v6204_v17 = vpop.eup %6203  ;;  %v4542_v25 = vpack.c.bf16 %v3634_v35, %v3634_v35  ;;  %4704 = vst.msk [vmem:[%s9232_s3 + $0xf4] sm:$0xf] %vm4642_vm2, %v4575_v10  ;;  %v4527_v15 = vpack.c.bf16 %v3491_v44, %v3491_v44  ;;  %v2883_v30 = vpop.xlane.xlu2 %2882  ;;  %v9620_v10 = vld [vmem:[#allocation24_spill] sm:$0xff] }
 0x390   :  { %6205 = vrcp.f32 %v2883_v30  ;;  %v2323_v37 = vpop.xlane.xlu1 %2322  ;;  %v3167_v8 = vmul.f32 %v6204_v17, %v8512_v5  ;;  %v3343_v9 = vpack.c.bf16 %v3215_v29, %v3215_v29  ;;  %v4389_v5 = vunpack.c.l.b16 %v3342_v6 }
 0x391   :  { %4671 = vst.msk [vmem:[%s9232_s3 + $0x70] sm:$0xf] %vm4642_vm2, %v4542_v25  ;;  %v2454_v24 = vsub.f32 %v8554_v23, %v2323_v37  ;;  %6207 = vrcp.f32 %v2919_v2  ;;  %v2407_v7 = vsub.f32 %v9620_v10, %v9619_v34 }
 0x392   :  { %4656 = vst.msk [vmem:[%s9232_s3 + $0x34] sm:$0xf] %vm4642_vm2, %v4527_v15  ;;  %v3295_v62 = vpack.c.bf16 %v3167_v8, %v3167_v8  ;;  %v4390_v22 = vunpack.c.l.b16 %v3343_v9  ;;  %v4100_v9 = vunpack.c.l.b16 %v3311_v51 }
 0x393   :  { %v2706_v13 = vmul.f32 1.442695, %v2454_v24  ;;  %v2612_v2 = vmul.f32 1.442695, %v2407_v7 }
 0x394   :  { %v3955_v12 = vunpack.c.l.b16 %v3295_v62  ;;  %v4403_v23 = vpack.c.b16 %v4390_v22, %v4389_v5  ;;  %v9622_v62 = vld [vmem:[#allocation85_spill] sm:$0xff]  ;;  %v9623_v5 = vld [vmem:[#allocation91_spill] sm:$0xff] }
 0x395   :  { %6209 = vpow2.f32 %v2706_v13  ;;  %v2440_v22 = vsub.f32 %v9623_v5, %v8387_v54 }
 0x396   :  { %v6206_v35 = vpop.eup %6205  ;;  %v3636_v44 = vpop.f32.mrf.mxu1  ;;  %v3968_v17 = vpack.c.b16 %v3955_v12, %v3954_v1  ;;  %4483 = vmatmul.bf16.gmra.mxu3 %v4403_v23 }
 0x397   :  { %v4543_v25 = vpack.c.bf16 %v3636_v44, %v3636_v44  ;;  %v2325_v30 = vpop.xlane.xlu2 %2324  ;;  %v3182_v15 = vmul.f32 %v6206_v35, %v8546_v18  ;;  %v6208_v6 = vpop.eup %6207  ;;  %v9621_v18 = vld [vmem:[#allocation40_spill] sm:$0xff] }
 0x398   :  { %v2455_v16 = vsub.f32 %v8579_v19, %v2325_v30  ;;  %4048 = vmatmul.bf16.gmra.mxu0 %v3968_v17  ;;  %v2921_v29 = vpop.xlane.xlu1 %2920  ;;  %v2422_v40 = vsub.f32 %v9622_v62, %v9621_v18  ;;  %v3200_v13 = vmul.f32 %v6208_v6, %v8415_v4  ;;  %v2678_v17 = vmul.f32 1.442695, %v2440_v22 }
 0x399   :  { %4672 = vst.msk [vmem:[%s9232_s3 + $0x74] sm:$0xf] %vm4642_vm2, %v4543_v25  ;;  %6211 = vrcp.f32 %v2921_v29  ;;  %v3310_v37 = vpack.c.bf16 %v3182_v15, %v3182_v15 }
 0x39a   :  { %v2708_v8 = vmul.f32 1.442695, %v2455_v16  ;;  %v2642_v7 = vmul.f32 1.442695, %v2422_v40  ;;  %v3328_v44 = vpack.c.bf16 %v3200_v13, %v3200_v13 }
 0x39b   :  { %v8850_v61 = vpop.eup %6209  ;;  %v4099_v24 = vunpack.c.l.b16 %v3310_v37 }
 0x39c   :  { %6213 = vpow2.f32 %v2708_v8  ;;  %v3784_v19 = vpop.f32.mrf.mxu2  ;;  %2962 = vadd.xlane.f32.xlu2 %v8850_v61  ;;  %v4246_v16 = vunpack.c.l.b16 %v3328_v44 }
 0x39d   :  { %6215 = vpow2.f32 %v2612_v2  ;;  %v4560_v1 = vpack.c.bf16 %v3784_v19, %v3784_v19  ;;  %v4113_v12 = vpack.c.b16 %v4100_v9, %v4099_v24 }
 0x39f   :  { %v6212_v34 = vpop.eup %6211  ;;  %4689 = vst.msk [vmem:[%s9232_s3 + $0xb8] sm:$0xf] %vm4642_vm2, %v4560_v1  ;;  %v2953_v10 = vpop.xlane.xlu0 %2952  ;;  %4193 = vmatmul.bf16.gmra.mxu1 %v4113_v12 }
 0x3a0   :  { %6217 = vrcp.f32 %v2953_v10  ;;  %v2951_v23 = vpop.xlane.xlu2 %2950  ;;  %v2855_v35 = vpop.xlane.xlu1 %2854  ;;  %v3201_v4 = vmul.f32 %v6212_v34, %v8581_v47 }
 0x3a1   :  { %6219 = vrcp.f32 %v2951_v23 }
 0x3a2   :  { %v8863_v54 = vpop.eup %6213  ;;  %v3329_v25 = vpack.c.bf16 %v3201_v4, %v3201_v4  ;;  %6221 = vrcp.f32 %v2855_v35 }
 0x3a3   :  { %v8865_v30 = vpop.eup %6215  ;;  %2964 = vadd.xlane.f32.xlu0 %v8863_v54  ;;  %6223 = vpow2.f32 %v2642_v7 }
 0x3a4   :  { %v3929_v15 = vpop.f32.mrf.mxu3  ;;  %v3786_v51 = vpop.f32.mrf.mxu2  ;;  %2868 = vadd.xlane.f32.xlu2 %v8865_v30  ;;  %v4247_v29 = vunpack.c.l.b16 %v3329_v25  ;;  %6225 = vpow2.f32 %v2678_v17 }
 0x3a5   :  { %v4576_v47 = vpack.c.bf16 %v3929_v15, %v3929_v15  ;;  %v4561_v6 = vpack.c.bf16 %v3786_v51, %v3786_v51 }
 0x3a6   :  { %v6218_v2 = vpop.eup %6217  ;;  %v3494_v37 = vpop.f32.mrf.mxu0  ;;  %v4259_v8 = vpack.c.b16 %v4247_v29, %v4246_v16 }
 0x3a7   :  { %v6220_v24 = vpop.eup %6219  ;;  %4705 = vst.msk [vmem:[%s9232_s3 + $0xf8] sm:$0xf] %vm4642_vm2, %v4576_v47  ;;  %v4528_v9 = vpack.c.bf16 %v3494_v37, %v3494_v37  ;;  %v2887_v18 = vpop.xlane.xlu0 %2886  ;;  %v3217_v40 = vmul.f32 %v6218_v2, %v8604_v14 }
 0x3a8   :  { %v3639_v62 = vpop.f32.mrf.mxu1  ;;  %4690 = vst.msk [vmem:[%s9232_s3 + $0xbc] sm:$0xf] %vm4642_vm2, %v4561_v6  ;;  %6227 = vrcp.f32 %v2887_v18  ;;  %v2857_v13 = vpop.xlane.xlu2 %2856  ;;  %4343 = vmatmul.bf16.gmra.mxu2 %v4259_v8  ;;  %v3216_v22 = vmul.f32 %v6220_v24, %v8606_v48 }
 0x3a9   :  { %v4544_v19 = vpack.c.bf16 %v3639_v62, %v3639_v62  ;;  %v2889_v5 = vpop.xlane.xlu1 %2888  ;;  %v6222_v1 = vpop.eup %6221  ;;  %4657 = vst.msk [vmem:[%s9232_s3 + $0x38] sm:$0xf] %vm4642_vm2, %v4528_v9  ;;  %6229 = vrcp.f32 %v2857_v13  ;;  %v3345_v14 = vpack.c.bf16 %v3217_v40, %v3217_v40 }
 0x3aa   :  { %v8883_v12 = vpop.eup %6223  ;;  %6231 = vrcp.f32 %v2889_v5  ;;  %v3344_v34 = vpack.c.bf16 %v3216_v22, %v3216_v22  ;;  %v3168_v35 = vmul.f32 %v6222_v1, %v8594_v27  ;;  %v9624_v22 = vld [vmem:[#allocation63_spill] sm:$0xff] }
 0x3ab   :  { %4673 = vst.msk [vmem:[%s9232_s3 + $0x78] sm:$0xf] %vm4642_vm2, %v4544_v19  ;;  %v8889_v10 = vpop.eup %6225  ;;  %2898 = vadd.xlane.f32.xlu0 %v8883_v12  ;;  %v4392_v48 = vunpack.c.l.b16 %v3345_v14  ;;  %v2409_v1 = vsub.f32 %v9624_v22, %v8403_v0 }
 0x3ac   :  { %v3931_v7 = vpop.f32.mrf.mxu3  ;;  %2934 = vadd.xlane.f32.xlu2 %v8889_v10  ;;  %v4391_v23 = vunpack.c.l.b16 %v3344_v34  ;;  %v3296_v9 = vpack.c.bf16 %v3168_v35, %v3168_v35 }
 0x3ad   :  { %v4577_v4 = vpack.c.bf16 %v3931_v7, %v3931_v7  ;;  %v9626_v7 = vld [vmem:[#allocation23_spill] sm:$0xff] }
 0x3ae   :  { %v6228_v44 = vpop.eup %6227  ;;  %v3496_v17 = vpop.f32.mrf.mxu0  ;;  %v4404_v25 = vpack.c.b16 %v4392_v48, %v4391_v23  ;;  %v2424_v23 = vsub.f32 %v9626_v7, %v8385_v41 }
 0x3af   :  { %v6230_v15 = vpop.eup %6229  ;;  %4706 = vst.msk [vmem:[%s9232_s3 + $0xfc] sm:$0xf] %vm4642_vm2, %v4577_v4  ;;  %v4529_v51 = vpack.c.bf16 %v3496_v17, %v3496_v17  ;;  %v2327_v16 = vpop.xlane.xlu0 %2326  ;;  %v3184_v47 = vmul.f32 %v6228_v44, %v8622_v26  ;;  %v2616_v17 = vmul.f32 1.442695, %v2409_v1 }
 0x3b0   :  { %v3641_v29 = vpop.f32.mrf.mxu1  ;;  %v6232_v6 = vpop.eup %6231  ;;  %v2456_v2 = vsub.f32 %v8648_v21, %v2327_v16  ;;  %4488 = vmatmul.bf16.gmra.mxu3 %v4404_v25  ;;  %v3169_v24 = vmul.f32 %v6230_v15, %v8629_v39 }
 0x3b1   :  { %v4545_v37 = vpack.c.bf16 %v3641_v29, %v3641_v29  ;;  %v2297_v27 = vpop.xlane.xlu2 %2296  ;;  %v2329_v8 = vpop.xlane.xlu1 %2328  ;;  %4658 = vst.msk [vmem:[%s9232_s3 + $0x3c] sm:$0xf] %vm4642_vm2, %v4529_v51  ;;  %v3185_v26 = vmul.f32 %v6232_v6, %v8625_v53  ;;  %v3312_v40 = vpack.c.bf16 %v3184_v47, %v3184_v47  ;;  %v9627_v47 = vld [vmem:[#allocation36_spill] sm:$0xff]  ;;  %v9628_v6 = vld [vmem:[#allocation19_spill] sm:$0xff] }
 0x3b2   :  { %v2441_v18 = vsub.f32 %v8652_v33, %v2297_v27  ;;  %v2457_v62 = vsub.f32 %v8660_v20, %v2329_v8  ;;  %v2710_v21 = vmul.f32 1.442695, %v2456_v2  ;;  %v3297_v39 = vpack.c.bf16 %v3169_v24, %v3169_v24  ;;  %v9625_v20 = vld [vmem:[#allocation21_spill] sm:$0xff] }
 0x3b3   :  { %4674 = vst.msk [vmem:[%s9232_s3 + $0x7c] sm:$0xf] %vm4642_vm2, %v4545_v37  ;;  %v3313_v5 = vpack.c.bf16 %v3185_v26, %v3185_v26  ;;  %v3956_v33 = vunpack.c.l.b16 %v3296_v9  ;;  %v2408_v53 = vsub.f32 %v9625_v20, %v8370_v63  ;;  %v4101_v34 = vunpack.c.l.b16 %v3312_v40 }
 0x3b4   :  { %v2680_v19 = vmul.f32 1.442695, %v2441_v18  ;;  %v2712_v13 = vmul.f32 1.442695, %v2457_v62  ;;  %6233 = vpow2.f32 %v2710_v21  ;;  %v3957_v14 = vunpack.c.l.b16 %v3297_v39 }
 0x3b5   :  { %v4102_v48 = vunpack.c.l.b16 %v3313_v5  ;;  %v2614_v15 = vmul.f32 1.442695, %v2408_v53  ;;  %v2646_v63 = vmul.f32 1.442695, %v2424_v23  ;;  %v2425_v2 = vsub.f32 %v9628_v6, %v9627_v47 }
 0x3b6   :  { %6235 = vpow2.f32 %v2680_v19  ;;  %v3969_v35 = vpack.c.b16 %v3957_v14, %v3956_v33 }
 0x3b7   :  { %6237 = vpow2.f32 %v2712_v13  ;;  %v2925_v4 = vpop.xlane.xlu0 %2924  ;;  %v4114_v44 = vpack.c.b16 %v4102_v48, %v4101_v34  ;;  %v2648_v5 = vmul.f32 1.442695, %v2425_v2 }
 0x3b8   :  { %6239 = vrcp.f32 %v2925_v4  ;;  %4053 = vmatmul.bf16.gmra.mxu0 %v3969_v35 }
 0x3b9   :  { %v2923_v25 = vpop.xlane.xlu2 %2922  ;;  %v2955_v0 = vpop.xlane.xlu1 %2954  ;;  %4198 = vmatmul.bf16.gmra.mxu1 %v4114_v44 }
 0x3ba   :  { %6241 = vrcp.f32 %v2923_v25  ;;  %v8918_v51 = vpop.eup %6233 }
 0x3bb   :  { %6243 = vrcp.f32 %v2955_v0  ;;  %2966 = vadd.xlane.f32.xlu1 %v8918_v51 }
 0x3bc   :  { %v8920_v16 = vpop.eup %6235  ;;  %6245 = vpow2.f32 %v2616_v17  ;;  %v4329_v29 = vpop.f32.mrf.mxu2 }
 0x3bd   :  { %v8923_v41 = vpop.eup %6237  ;;  %2936 = vadd.xlane.f32.xlu0 %v8920_v16  ;;  %6247 = vpow2.f32 %v2614_v15  ;;  %v4610_v37 = vpack.c.bf16 %v4329_v29, %v4329_v29  ;;  %v4474_v27 = vpop.f32.mrf.mxu3 }
 0x3be   :  { %2968 = vadd.xlane.f32.xlu2 %v8923_v41  ;;  %v6240_v8 = vpop.eup %6239  ;;  %6249 = vpow2.f32 %v2646_v63  ;;  %v4039_v24 = vpop.f32.mrf.mxu0  ;;  %v4626_v9 = vpack.c.bf16 %v4474_v27, %v4474_v27 }
 0x3bf   :  { %4739 = vst.msk [vmem:[%s9232_s3 + $0x180] sm:$0xf] %vm4642_vm2, %v4610_v37  ;;  %v4578_v62 = vpack.c.bf16 %v4039_v24, %v4039_v24  ;;  %v2859_v26 = vpop.xlane.xlu0 %2858  ;;  %v3203_v40 = vmul.f32 %v6240_v8, %v8678_v45 }
 0x3c0   :  { %v6242_v18 = vpop.eup %6241  ;;  %4755 = vst.msk [vmem:[%s9232_s3 + $0x1c0] sm:$0xf] %vm4642_vm2, %v4626_v9  ;;  %6251 = vrcp.f32 %v2859_v26 }
 0x3c1   :  { %v2957_v21 = vpop.xlane.xlu2 %2956  ;;  %v2861_v39 = vpop.xlane.xlu1 %2860  ;;  %v3202_v19 = vmul.f32 %v6242_v18, %v8676_v50  ;;  %4707 = vst.msk [vmem:[%s9232_s3 + $0x100] sm:$0xf] %vm4642_vm2, %v4578_v62  ;;  %v3331_v22 = vpack.c.bf16 %v3203_v40, %v3203_v40 }
 0x3c2   :  { %v6244_v13 = vpop.eup %6243  ;;  %6253 = vrcp.f32 %v2957_v21 }
 0x3c3   :  { %v8943_v45 = vpop.eup %6245  ;;  %6255 = vrcp.f32 %v2861_v39  ;;  %v3330_v1 = vpack.c.bf16 %v3202_v19, %v3202_v19  ;;  %v4249_v14 = vunpack.c.l.b16 %v3331_v22  ;;  %v3218_v34 = vmul.f32 %v6244_v13, %v8682_v28 }
 0x3c4   :  { %v8945_v33 = vpop.eup %6247  ;;  %2872 = vadd.xlane.f32.xlu1 %v8943_v45  ;;  %v4331_v50 = vpop.f32.mrf.mxu2  ;;  %6257 = vpow2.f32 %v2648_v5 }
 0x3c5   :  { %v8948_v20 = vpop.eup %6249  ;;  %2870 = vadd.xlane.f32.xlu0 %v8945_v33  ;;  %v4248_v53 = vunpack.c.l.b16 %v3330_v1  ;;  %v4611_v48 = vpack.c.bf16 %v4331_v50, %v4331_v50  ;;  %v4184_v7 = vpop.f32.mrf.mxu1  ;;  %v3346_v37 = vpack.c.bf16 %v3218_v34, %v3218_v34 }
 0x3c6   :  { %v4476_v23 = vpop.f32.mrf.mxu3  ;;  %2902 = vadd.xlane.f32.xlu2 %v8948_v20  ;;  %v6252_v35 = vpop.eup %6251  ;;  %v4594_v44 = vpack.c.bf16 %v4184_v7, %v4184_v7 }
 0x3c7   :  { %v4041_v4 = vpop.f32.mrf.mxu0  ;;  %v4627_v17 = vpack.c.bf16 %v4476_v23, %v4476_v23  ;;  %v4260_v25 = vpack.c.b16 %v4249_v14, %v4248_v53  ;;  %4740 = vst.msk [vmem:[%s9232_s3 + $0x184] sm:$0xf] %vm4642_vm2, %v4611_v48  ;;  %v2893_v63 = vpop.xlane.xlu0 %2892  ;;  %v3170_v28 = vmul.f32 %v6252_v35, %v8700_v59  ;;  %v4393_v9 = vunpack.c.l.b16 %v3346_v37 }
 0x3c8   :  { %v6254_v0 = vpop.eup %6253  ;;  %v4579_v15 = vpack.c.bf16 %v4041_v4, %v4041_v4  ;;  %4723 = vst.msk [vmem:[%s9232_s3 + $0x140] sm:$0xf] %vm4642_vm2, %v4594_v44  ;;  %6259 = vrcp.f32 %v2893_v63 }
 0x3c9   :  { %v6256_v29 = vpop.eup %6255  ;;  %v2891_v47 = vpop.xlane.xlu2 %2890  ;;  %4348 = vmatmul.bf16.gmra.mxu2 %v4260_v25  ;;  %v3219_v2 = vmul.f32 %v6254_v0, %v8705_v42  ;;  %v3298_v27 = vpack.c.bf16 %v3170_v28, %v3170_v28  ;;  %4756 = vst.msk [vmem:[%s9232_s3 + $0x1c4] sm:$0xf] %vm4642_vm2, %v4627_v17 }
 0x3ca   :  { %v2927_v6 = vpop.xlane.xlu1 %2926  ;;  %4708 = vst.msk [vmem:[%s9232_s3 + $0x104] sm:$0xf] %vm4642_vm2, %v4579_v15  ;;  %6261 = vrcp.f32 %v2891_v47  ;;  %v3171_v59 = vmul.f32 %v6256_v29, %v8703_v32  ;;  %v8972_v24 = vpop.eup %6257 }
 0x3cb   :  { %v3347_v8 = vpack.c.bf16 %v3219_v2, %v3219_v2  ;;  %6263 = vrcp.f32 %v2927_v6  ;;  %v3958_v26 = vunpack.c.l.b16 %v3298_v27 }
 0x3cc   :  { %v3299_v42 = vpack.c.bf16 %v3171_v59, %v3171_v59 }
 0x3cd   :  { %2904 = vadd.xlane.f32.xlu0 %v8972_v24  ;;  %v4394_v18 = vunpack.c.l.b16 %v3347_v8  ;;  %v4186_v62 = vpop.f32.mrf.mxu1 }
 0x3ce   :  { %v3959_v40 = vunpack.c.l.b16 %v3299_v42  ;;  %v6260_v21 = vpop.eup %6259  ;;  %v4595_v32 = vpack.c.bf16 %v4186_v62, %v4186_v62 }
 0x3cf   :  { %v4405_v39 = vpack.c.b16 %v4394_v18, %v4393_v9  ;;  %v3187_v5 = vmul.f32 %v6260_v21, %v8727_v3 }
 0x3d0   :  { %v6262_v19 = vpop.eup %6261  ;;  %v3970_v13 = vpack.c.b16 %v3959_v40, %v3958_v26  ;;  %4724 = vst.msk [vmem:[%s9232_s3 + $0x144] sm:$0xf] %vm4642_vm2, %v4595_v32  ;;  %v2959_v1 = vpop.xlane.xlu0 %2958 }
 0x3d1   :  { %v2929_v22 = vpop.xlane.xlu2 %2928  ;;  %4493 = vmatmul.bf16.gmra.mxu3 %v4405_v39  ;;  %v3186_v14 = vmul.f32 %v6262_v19, %v8723_v31  ;;  %v6264_v50 = vpop.eup %6263  ;;  %v3315_v53 = vpack.c.bf16 %v3187_v5, %v3187_v5 }
 0x3d2   :  { %6265 = vrcp.f32 %v2929_v22  ;;  %4058 = vmatmul.bf16.gmra.mxu0 %v3970_v13  ;;  %v3204_v3 = vmul.f32 %v6264_v50, %v8729_v43 }
 0x3d3   :  { %6267 = vrcp.f32 %v2959_v1  ;;  %v3314_v34 = vpack.c.bf16 %v3186_v14, %v3186_v14  ;;  %v4104_v48 = vunpack.c.l.b16 %v3315_v53 }
 0x3d4   :  { %v4334_v7 = vpop.f32.mrf.mxu2  ;;  %v3332_v29 = vpack.c.bf16 %v3204_v3, %v3204_v3 }
 0x3d5   :  { %v4103_v23 = vunpack.c.l.b16 %v3314_v34  ;;  %v4612_v35 = vpack.c.bf16 %v4334_v7, %v4334_v7 }
 0x3d6   :  { %v2961_v17 = vpop.xlane.xlu1 %2960  ;;  %v4250_v37 = vunpack.c.l.b16 %v3332_v29 }
 0x3d7   :  { %v4115_v4 = vpack.c.b16 %v4104_v48, %v4103_v23  ;;  %4741 = vst.msk [vmem:[%s9232_s3 + $0x188] sm:$0xf] %vm4642_vm2, %v4612_v35  ;;  %v4044_v31 = vpop.f32.mrf.mxu0  ;;  %6269 = vrcp.f32 %v2961_v17 }
 0x3d8   :  { %v6266_v44 = vpop.eup %6265  ;;  %v4580_v15 = vpack.c.bf16 %v4044_v31, %v4044_v31  ;;  %v2865_v63 = vpop.xlane.xlu0 %2864 }
 0x3d9   :  { %v6268_v25 = vpop.eup %6267  ;;  %v2863_v0 = vpop.xlane.xlu2 %2862  ;;  %4203 = vmatmul.bf16.gmra.mxu1 %v4115_v4  ;;  %v3205_v28 = vmul.f32 %v6266_v44, %v8745_v36 }
 0x3da   :  { %6271 = vrcp.f32 %v2863_v0  ;;  %4709 = vst.msk [vmem:[%s9232_s3 + $0x108] sm:$0xf] %vm4642_vm2, %v4580_v15  ;;  %v3220_v47 = vmul.f32 %v6268_v25, %v8749_v60 }
 0x3db   :  { %6273 = vrcp.f32 %v2865_v63  ;;  %v3333_v43 = vpack.c.bf16 %v3205_v28, %v3205_v28 }
 0x3dc   :  { %v4336_v6 = vpop.f32.mrf.mxu2  ;;  %v4479_v2 = vpop.f32.mrf.mxu3  ;;  %v3348_v21 = vpack.c.bf16 %v3220_v47, %v3220_v47 }
 0x3dd   :  { %v4251_v59 = vunpack.c.l.b16 %v3333_v43  ;;  %v4613_v27 = vpack.c.bf16 %v4336_v6, %v4336_v6  ;;  %v4628_v8 = vpack.c.bf16 %v4479_v2, %v4479_v2  ;;  %v6270_v42 = vpop.eup %6269 }
 0x3de   :  { %v4189_v9 = vpop.f32.mrf.mxu1  ;;  %v2895_v40 = vpop.xlane.xlu1 %2894  ;;  %v3221_v60 = vmul.f32 %v6270_v42, %v8765_v52  ;;  %v4395_v14 = vunpack.c.l.b16 %v3348_v21 }
 0x3df   :  { %v4261_v36 = vpack.c.b16 %v4251_v59, %v4250_v37  ;;  %4742 = vst.msk [vmem:[%s9232_s3 + $0x18c] sm:$0xf] %vm4642_vm2, %v4613_v27  ;;  %v4596_v62 = vpack.c.bf16 %v4189_v9, %v4189_v9  ;;  %v4046_v26 = vpop.f32.mrf.mxu0  ;;  %6275 = vrcp.f32 %v2895_v40 }
 0x3e0   :  { %v6272_v18 = vpop.eup %6271  ;;  %4757 = vst.msk [vmem:[%s9232_s3 + $0x1c8] sm:$0xf] %vm4642_vm2, %v4628_v8  ;;  %v4581_v19 = vpack.c.bf16 %v4046_v26, %v4046_v26  ;;  %v2931_v13 = vpop.xlane.xlu0 %2930  ;;  %v3349_v52 = vpack.c.bf16 %v3221_v60, %v3221_v60 }
 0x3e1   :  { %v6274_v32 = vpop.eup %6273  ;;  %v2897_v39 = vpop.xlane.xlu2 %2896  ;;  %4353 = vmatmul.bf16.gmra.mxu2 %v4261_v36  ;;  %v3172_v5 = vmul.f32 %v6272_v18, %v8763_v57  ;;  %4725 = vst.msk [vmem:[%s9232_s3 + $0x148] sm:$0xf] %vm4642_vm2, %v4596_v62 }
 0x3e2   :  { %6277 = vrcp.f32 %v2897_v39  ;;  %v3173_v22 = vmul.f32 %v6274_v32, %v8767_v58  ;;  %4710 = vst.msk [vmem:[%s9232_s3 + $0x10c] sm:$0xf] %vm4642_vm2, %v4581_v19  ;;  %v4396_v50 = vunpack.c.l.b16 %v3349_v52 }
 0x3e3   :  { %6279 = vrcp.f32 %v2931_v13  ;;  %v3300_v1 = vpack.c.bf16 %v3172_v5, %v3172_v5 }
 0x3e4   :  { %v3301_v53 = vpack.c.bf16 %v3173_v22, %v3173_v22  ;;  %v4481_v57 = vpop.f32.mrf.mxu3  ;;  %v4406_v48 = vpack.c.b16 %v4396_v50, %v4395_v14 }
 0x3e5   :  { %v4629_v34 = vpack.c.bf16 %v4481_v57, %v4481_v57  ;;  %v3960_v7 = vunpack.c.l.b16 %v3300_v1  ;;  %v6276_v3 = vpop.eup %6275 }
 0x3e6   :  { %v3961_v23 = vunpack.c.l.b16 %v3301_v53  ;;  %v4191_v35 = vpop.f32.mrf.mxu1  ;;  %4498 = vmatmul.bf16.gmra.mxu3 %v4406_v48  ;;  %v2933_v44 = vpop.xlane.xlu1 %2932  ;;  %v3188_v17 = vmul.f32 %v6276_v3, %v8782_v46 }
 0x3e7   :  { %4758 = vst.msk [vmem:[%s9232_s3 + $0x1cc] sm:$0xf] %vm4642_vm2, %v4629_v34  ;;  %v4597_v58 = vpack.c.bf16 %v4191_v35, %v4191_v35  ;;  %6281 = vrcp.f32 %v2933_v44 }
 0x3e8   :  { %v6278_v4 = vpop.eup %6277  ;;  %v3971_v31 = vpack.c.b16 %v3961_v23, %v3960_v7  ;;  %v3316_v15 = vpack.c.bf16 %v3188_v17, %v3188_v17 }
 0x3e9   :  { %v6280_v25 = vpop.eup %6279  ;;  %v3189_v0 = vmul.f32 %v6278_v4, %v8784_v49  ;;  %4726 = vst.msk [vmem:[%s9232_s3 + $0x14c] sm:$0xf] %vm4642_vm2, %v4597_v58 }
 0x3ea   :  { %4063 = vmatmul.bf16.gmra.mxu0 %v3971_v31  ;;  %v4105_v28 = vunpack.c.l.b16 %v3316_v15  ;;  %v3206_v29 = vmul.f32 %v6280_v25, %v8786_v11 }
 0x3eb   :  { %v3317_v63 = vpack.c.bf16 %v3189_v0, %v3189_v0 }
 0x3ec   :  { %v4339_v43 = vpop.f32.mrf.mxu2  ;;  %v3334_v37 = vpack.c.bf16 %v3206_v29, %v3206_v29 }
 0x3ed   :  { %v4106_v47 = vunpack.c.l.b16 %v3317_v63  ;;  %v4614_v6 = vpack.c.bf16 %v4339_v43, %v4339_v43  ;;  %v6282_v2 = vpop.eup %6281 }
 0x3ee   :  { %v3207_v49 = vmul.f32 %v6282_v2, %v8797_v55  ;;  %v4252_v27 = vunpack.c.l.b16 %v3334_v37  ;;  %v2867_v36 = vpop.xlane.xlu1 %2866 }
 0x3ef   :  { %v4116_v46 = vpack.c.b16 %v4106_v47, %v4105_v28  ;;  %4743 = vst.msk [vmem:[%s9232_s3 + $0x190] sm:$0xf] %vm4642_vm2, %v4614_v6 }
 0x3f0   :  { %v3335_v59 = vpack.c.bf16 %v3207_v49, %v3207_v49 }
 0x3f1   :  { %4208 = vmatmul.bf16.gmra.mxu1 %v4116_v46 }
 0x3f2   :  { %v4253_v8 = vunpack.c.l.b16 %v3335_v59 }
 0x3f4   :  { %v4341_v42 = vpop.f32.mrf.mxu2  ;;  %v4262_v11 = vpack.c.b16 %v4253_v8, %v4252_v27 }
 0x3f5   :  { %v4615_v9 = vpack.c.bf16 %v4341_v42, %v4341_v42 }
 0x3f6   :  { %4358 = vmatmul.bf16.gmra.mxu2 %v4262_v11  ;;  %v2901_v55 = vpop.xlane.xlu1 %2900 }
 0x3f7   :  { %4744 = vst.msk [vmem:[%s9232_s3 + $0x194] sm:$0xf] %vm4642_vm2, %v4615_v9 }
 0x40f   :  { %v2963_v18 = vpop.xlane.xlu2 %2962 }
 0x410   :  { %6283 = vrcp.f32 %v2963_v18 }
 0x411   :  { %6285 = vrcp.f32 %v2867_v36 }
 0x415   :  { %v4049_v62 = vpop.f32.mrf.mxu0 }
 0x416   :  { %v2965_v26 = vpop.xlane.xlu0 %2964  ;;  %v4582_v40 = vpack.c.bf16 %v4049_v62, %v4049_v62  ;;  %v6284_v60 = vpop.eup %6283 }
 0x417   :  { %6287 = vrcp.f32 %v2965_v26  ;;  %v2869_v21 = vpop.xlane.xlu2 %2868  ;;  %v6286_v32 = vpop.eup %6285  ;;  %v3222_v19 = vmul.f32 %v6284_v60, %v8850_v61 }
 0x418   :  { %4711 = vst.msk [vmem:[%s9232_s3 + $0x110] sm:$0xf] %vm4642_vm2, %v4582_v40  ;;  %6289 = vrcp.f32 %v2869_v21  ;;  %v3174_v5 = vmul.f32 %v6286_v32, %v8806_v38 }
 0x419   :  { %6291 = vrcp.f32 %v2901_v55  ;;  %v4484_v39 = vpop.f32.mrf.mxu3  ;;  %v3350_v48 = vpack.c.bf16 %v3222_v19, %v3222_v19 }
 0x41a   :  { %v4630_v13 = vpack.c.bf16 %v4484_v39, %v4484_v39  ;;  %v3302_v61 = vpack.c.bf16 %v3174_v5, %v3174_v5 }
 0x41c   :  { %v4194_v52 = vpop.f32.mrf.mxu1  ;;  %4759 = vst.msk [vmem:[%s9232_s3 + $0x1d0] sm:$0xf] %vm4642_vm2, %v4630_v13  ;;  %v3962_v31 = vunpack.c.l.b16 %v3302_v61 }
 0x41d   :  { %v6288_v22 = vpop.eup %6287  ;;  %v4598_v1 = vpack.c.bf16 %v4194_v52, %v4194_v52  ;;  %v4051_v14 = vpop.f32.mrf.mxu0 }
 0x41e   :  { %v6290_v50 = vpop.eup %6289  ;;  %v2899_v53 = vpop.xlane.xlu0 %2898  ;;  %v4583_v57 = vpack.c.bf16 %v4051_v14, %v4051_v14  ;;  %v3223_v34 = vmul.f32 %v6288_v22, %v8863_v54  ;;  %v4397_v54 = vunpack.c.l.b16 %v3350_v48 }
 0x41f   :  { %v6292_v7 = vpop.eup %6291  ;;  %4727 = vst.msk [vmem:[%s9232_s3 + $0x150] sm:$0xf] %vm4642_vm2, %v4598_v1  ;;  %6293 = vrcp.f32 %v2899_v53  ;;  %v3175_v38 = vmul.f32 %v6290_v50, %v8865_v30  ;;  %v2935_v43 = vpop.xlane.xlu2 %2934 }
 0x420   :  { %4712 = vst.msk [vmem:[%s9232_s3 + $0x114] sm:$0xf] %vm4642_vm2, %v4583_v57  ;;  %v3351_v23 = vpack.c.bf16 %v3223_v34, %v3223_v34  ;;  %v3191_v58 = vmul.f32 %v6292_v7, %v8813_v56  ;;  %6295 = vrcp.f32 %v2935_v43 }
 0x421   :  { %v3303_v3 = vpack.c.bf16 %v3175_v38, %v3175_v38  ;;  %v4486_v35 = vpop.f32.mrf.mxu3 }
 0x422   :  { %v4398_v4 = vunpack.c.l.b16 %v3351_v23  ;;  %v4631_v44 = vpack.c.bf16 %v4486_v35, %v4486_v35  ;;  %v3319_v29 = vpack.c.bf16 %v3191_v58, %v3191_v58 }
 0x423   :  { %v3963_v17 = vunpack.c.l.b16 %v3303_v3 }
 0x424   :  { %v4196_v25 = vpop.f32.mrf.mxu1  ;;  %v4407_v0 = vpack.c.b16 %v4398_v4, %v4397_v54  ;;  %4760 = vst.msk [vmem:[%s9232_s3 + $0x1d4] sm:$0xf] %vm4642_vm2, %v4631_v44  ;;  %v4108_v6 = vunpack.c.l.b16 %v3319_v29 }
 0x425   :  { %v6294_v15 = vpop.eup %6293  ;;  %v4599_v30 = vpack.c.bf16 %v4196_v25, %v4196_v25  ;;  %v3972_v63 = vpack.c.b16 %v3963_v17, %v3962_v31 }
 0x426   :  { %4503 = vmatmul.bf16.gmra.mxu3 %v4407_v0  ;;  %v3190_v28 = vmul.f32 %v6294_v15, %v8883_v12  ;;  %v6296_v59 = vpop.eup %6295 }
 0x427   :  { %4728 = vst.msk [vmem:[%s9232_s3 + $0x154] sm:$0xf] %vm4642_vm2, %v4599_v30  ;;  %4068 = vmatmul.bf16.gmra.mxu0 %v3972_v63  ;;  %v3208_v9 = vmul.f32 %v6296_v59, %v8889_v10 }
 0x428   :  { %v3318_v56 = vpack.c.bf16 %v3190_v28, %v3190_v28 }
 0x429   :  { %v3336_v13 = vpack.c.bf16 %v3208_v9, %v3208_v9 }
 0x42a   :  { %v4107_v47 = vunpack.c.l.b16 %v3318_v56 }
 0x42b   :  { %v4344_v2 = vpop.f32.mrf.mxu2  ;;  %v4254_v14 = vunpack.c.l.b16 %v3336_v13 }
 0x42c   :  { %v4616_v46 = vpack.c.bf16 %v4344_v2, %v4344_v2  ;;  %v4117_v49 = vpack.c.b16 %v4108_v6, %v4107_v47 }
 0x42e   :  { %4745 = vst.msk [vmem:[%s9232_s3 + $0x198] sm:$0xf] %vm4642_vm2, %v4616_v46  ;;  %4213 = vmatmul.bf16.gmra.mxu1 %v4117_v49  ;;  %v2967_v12 = vpop.xlane.xlu1 %2966 }
 0x42f   :  { %6297 = vrcp.f32 %v2967_v12 }
 0x430   :  { %v2937_v37 = vpop.xlane.xlu0 %2936 }
 0x431   :  { %6299 = vrcp.f32 %v2937_v37  ;;  %v2969_v27 = vpop.xlane.xlu2 %2968 }
 0x432   :  { %6301 = vrcp.f32 %v2969_v27 }
 0x433   :  { %v4489_v8 = vpop.f32.mrf.mxu3  ;;  %v4346_v42 = vpop.f32.mrf.mxu2 }
 0x434   :  { %v4632_v11 = vpack.c.bf16 %v4489_v8, %v4489_v8  ;;  %v4617_v36 = vpack.c.bf16 %v4346_v42, %v4346_v42 }
 0x435   :  { %v6298_v18 = vpop.eup %6297  ;;  %v4054_v62 = vpop.f32.mrf.mxu0 }
 0x436   :  { %4761 = vst.msk [vmem:[%s9232_s3 + $0x1d8] sm:$0xf] %vm4642_vm2, %v4632_v11  ;;  %v4584_v26 = vpack.c.bf16 %v4054_v62, %v4054_v62  ;;  %v4199_v40 = vpop.f32.mrf.mxu1  ;;  %v3224_v21 = vmul.f32 %v6298_v18, %v8918_v51 }
 0x437   :  { %v6300_v55 = vpop.eup %6299  ;;  %v2873_v60 = vpop.xlane.xlu1 %2872  ;;  %4746 = vst.msk [vmem:[%s9232_s3 + $0x19c] sm:$0xf] %vm4642_vm2, %v4617_v36  ;;  %v4600_v39 = vpack.c.bf16 %v4199_v40, %v4199_v40 }
 0x438   :  { %v6302_v32 = vpop.eup %6301  ;;  %v2871_v10 = vpop.xlane.xlu0 %2870  ;;  %6303 = vrcp.f32 %v2873_v60  ;;  %v3209_v19 = vmul.f32 %v6300_v55, %v8920_v16  ;;  %4713 = vst.msk [vmem:[%s9232_s3 + $0x118] sm:$0xf] %vm4642_vm2, %v4584_v26  ;;  %v3352_v52 = vpack.c.bf16 %v3224_v21, %v3224_v21 }
 0x439   :  { %6305 = vrcp.f32 %v2871_v10  ;;  %v2903_v5 = vpop.xlane.xlu2 %2902  ;;  %v3225_v51 = vmul.f32 %v6302_v32, %v8923_v41  ;;  %4729 = vst.msk [vmem:[%s9232_s3 + $0x158] sm:$0xf] %vm4642_vm2, %v4600_v39 }
 0x43a   :  { %v3337_v22 = vpack.c.bf16 %v3209_v19, %v3209_v19  ;;  %6307 = vrcp.f32 %v2903_v5  ;;  %v4399_v57 = vunpack.c.l.b16 %v3352_v52 }
 0x43b   :  { %v3353_v1 = vpack.c.bf16 %v3225_v51, %v3225_v51  ;;  %v4491_v16 = vpop.f32.mrf.mxu3 }
 0x43c   :  { %v4255_v50 = vunpack.c.l.b16 %v3337_v22  ;;  %v4633_v53 = vpack.c.bf16 %v4491_v16, %v4491_v16 }
 0x43d   :  { %v4400_v34 = vunpack.c.l.b16 %v3353_v1  ;;  %v4056_v7 = vpop.f32.mrf.mxu0 }
 0x43e   :  { %v6304_v48 = vpop.eup %6303  ;;  %v4263_v38 = vpack.c.b16 %v4255_v50, %v4254_v14  ;;  %4762 = vst.msk [vmem:[%s9232_s3 + $0x1dc] sm:$0xf] %vm4642_vm2, %v4633_v53  ;;  %v4585_v23 = vpack.c.bf16 %v4056_v7, %v4056_v7  ;;  %v4201_v3 = vpop.f32.mrf.mxu1 }
 0x43f   :  { %v6306_v61 = vpop.eup %6305  ;;  %v3177_v41 = vmul.f32 %v6304_v48, %v8943_v45  ;;  %v4408_v35 = vpack.c.b16 %v4400_v34, %v4399_v57  ;;  %v4601_v4 = vpack.c.bf16 %v4201_v3, %v4201_v3 }
 0x440   :  { %v2905_v54 = vpop.xlane.xlu0 %2904  ;;  %4363 = vmatmul.bf16.gmra.mxu2 %v4263_v38  ;;  %v3176_v58 = vmul.f32 %v6306_v61, %v8945_v33  ;;  %v6308_v44 = vpop.eup %6307  ;;  %4714 = vst.msk [vmem:[%s9232_s3 + $0x11c] sm:$0xf] %vm4642_vm2, %v4585_v23 }
 0x441   :  { %6309 = vrcp.f32 %v2905_v54  ;;  %4508 = vmatmul.bf16.gmra.mxu3 %v4408_v35  ;;  %v3305_v45 = vpack.c.bf16 %v3177_v41, %v3177_v41  ;;  %4730 = vst.msk [vmem:[%s9232_s3 + $0x15c] sm:$0xf] %vm4642_vm2, %v4601_v4  ;;  %v3192_v25 = vmul.f32 %v6308_v44, %v8948_v20 }
 0x442   :  { %v3304_v31 = vpack.c.bf16 %v3176_v58, %v3176_v58 }
 0x443   :  { %v3965_v17 = vunpack.c.l.b16 %v3305_v45  ;;  %v3320_v63 = vpack.c.bf16 %v3192_v25, %v3192_v25 }
 0x444   :  { %v3964_v0 = vunpack.c.l.b16 %v3304_v31 }
 0x445   :  { %v4109_v43 = vunpack.c.l.b16 %v3320_v63 }
 0x446   :  { %v3973_v33 = vpack.c.b16 %v3965_v17, %v3964_v0 }
 0x447   :  { %v6310_v15 = vpop.eup %6309 }
 0x448   :  { %v3193_v30 = vmul.f32 %v6310_v15, %v8972_v24  ;;  %4073 = vmatmul.bf16.gmra.mxu0 %v3973_v33 }
 0x44a   :  { %v3321_v28 = vpack.c.bf16 %v3193_v30, %v3193_v30 }
 0x44c   :  { %v4349_v29 = vpop.f32.mrf.mxu2  ;;  %v4110_v56 = vunpack.c.l.b16 %v3321_v28 }
 0x44d   :  { %v4618_v47 = vpack.c.bf16 %v4349_v29, %v4349_v29 }
 0x44e   :  { %v4118_v6 = vpack.c.b16 %v4110_v56, %v4109_v43 }
 0x44f   :  { %4747 = vst.msk [vmem:[%s9232_s3 + $0x1a0] sm:$0xf] %vm4642_vm2, %v4618_v47  ;;  %v4059_v2 = vpop.f32.mrf.mxu0 }
 0x450   :  { %v4586_v20 = vpack.c.bf16 %v4059_v2, %v4059_v2  ;;  %4218 = vmatmul.bf16.gmra.mxu1 %v4118_v6 }
 0x452   :  { %4715 = vst.msk [vmem:[%s9232_s3 + $0x120] sm:$0xf] %vm4642_vm2, %v4586_v20 }
 0x454   :  { %v4351_v24 = vpop.f32.mrf.mxu2  ;;  %v4494_v46 = vpop.f32.mrf.mxu3 }
 0x455   :  { %v4619_v49 = vpack.c.bf16 %v4351_v24, %v4351_v24  ;;  %v4634_v12 = vpack.c.bf16 %v4494_v46, %v4494_v46 }
 0x456   :  { %v4204_v37 = vpop.f32.mrf.mxu1 }
 0x457   :  { %4748 = vst.msk [vmem:[%s9232_s3 + $0x1a4] sm:$0xf] %vm4642_vm2, %v4619_v49  ;;  %v4602_v59 = vpack.c.bf16 %v4204_v37, %v4204_v37  ;;  %v4061_v27 = vpop.f32.mrf.mxu0 }
 0x458   :  { %4763 = vst.msk [vmem:[%s9232_s3 + $0x1e0] sm:$0xf] %vm4642_vm2, %v4634_v12  ;;  %v4587_v8 = vpack.c.bf16 %v4061_v27, %v4061_v27 }
 0x459   :  { %4731 = vst.msk [vmem:[%s9232_s3 + $0x160] sm:$0xf] %vm4642_vm2, %v4602_v59 }
 0x45a   :  { %4716 = vst.msk [vmem:[%s9232_s3 + $0x124] sm:$0xf] %vm4642_vm2, %v4587_v8 }
 0x45c   :  { %v4496_v42 = vpop.f32.mrf.mxu3 }
 0x45d   :  { %v4635_v9 = vpack.c.bf16 %v4496_v42, %v4496_v42 }
 0x45e   :  { %v4206_v11 = vpop.f32.mrf.mxu1 }
 0x45f   :  { %4764 = vst.msk [vmem:[%s9232_s3 + $0x1e4] sm:$0xf] %vm4642_vm2, %v4635_v9  ;;  %v4603_v36 = vpack.c.bf16 %v4206_v11, %v4206_v11 }
 0x461   :  { %4732 = vst.msk [vmem:[%s9232_s3 + $0x164] sm:$0xf] %vm4642_vm2, %v4603_v36 }
 0x464   :  { %v4354_v18 = vpop.f32.mrf.mxu2 }
 0x465   :  { %v4620_v62 = vpack.c.bf16 %v4354_v18, %v4354_v18 }
 0x467   :  { %4749 = vst.msk [vmem:[%s9232_s3 + $0x1a8] sm:$0xf] %vm4642_vm2, %v4620_v62  ;;  %v4064_v55 = vpop.f32.mrf.mxu0 }
 0x468   :  { %v4588_v26 = vpack.c.bf16 %v4064_v55, %v4064_v55 }
 0x469   :  { %v4499_v40 = vpop.f32.mrf.mxu3 }
 0x46a   :  { %4717 = vst.msk [vmem:[%s9232_s3 + $0x128] sm:$0xf] %vm4642_vm2, %v4588_v26  ;;  %v4636_v21 = vpack.c.bf16 %v4499_v40, %v4499_v40 }
 0x46c   :  { %v4356_v60 = vpop.f32.mrf.mxu2  ;;  %4765 = vst.msk [vmem:[%s9232_s3 + $0x1e8] sm:$0xf] %vm4642_vm2, %v4636_v21 }
 0x46d   :  { %v4621_v32 = vpack.c.bf16 %v4356_v60, %v4356_v60 }
 0x46e   :  { %v4209_v10 = vpop.f32.mrf.mxu1 }
 0x46f   :  { %4750 = vst.msk [vmem:[%s9232_s3 + $0x1ac] sm:$0xf] %vm4642_vm2, %v4621_v32  ;;  %v4604_v39 = vpack.c.bf16 %v4209_v10, %v4209_v10  ;;  %v4066_v19 = vpop.f32.mrf.mxu0 }
 0x470   :  { %v4589_v13 = vpack.c.bf16 %v4066_v19, %v4066_v19 }
 0x471   :  { %4733 = vst.msk [vmem:[%s9232_s3 + $0x168] sm:$0xf] %vm4642_vm2, %v4604_v39  ;;  %v4501_v5 = vpop.f32.mrf.mxu3 }
 0x472   :  { %4718 = vst.msk [vmem:[%s9232_s3 + $0x12c] sm:$0xf] %vm4642_vm2, %v4589_v13  ;;  %v4637_v51 = vpack.c.bf16 %v4501_v5, %v4501_v5 }
 0x474   :  { %4766 = vst.msk [vmem:[%s9232_s3 + $0x1ec] sm:$0xf] %vm4642_vm2, %v4637_v51 }
 0x476   :  { %v4211_v52 = vpop.f32.mrf.mxu1 }
 0x477   :  { %v4605_v22 = vpack.c.bf16 %v4211_v52, %v4211_v52 }
 0x479   :  { %4734 = vst.msk [vmem:[%s9232_s3 + $0x16c] sm:$0xf] %vm4642_vm2, %v4605_v22  ;;  %v4359_v1 = vpop.f32.mrf.mxu2 }
 0x47a   :  { %v4622_v16 = vpack.c.bf16 %v4359_v1, %v4359_v1 }
 0x47c   :  { %4751 = vst.msk [vmem:[%s9232_s3 + $0x1b0] sm:$0xf] %vm4642_vm2, %v4622_v16 }
 0x481   :  { %v4361_v14 = vpop.f32.mrf.mxu2 }
 0x482   :  { %v4623_v50 = vpack.c.bf16 %v4361_v14, %v4361_v14 }
 0x484   :  { %4752 = vst.msk [vmem:[%s9232_s3 + $0x1b4] sm:$0xf] %vm4642_vm2, %v4623_v50 }
 0x4a4   :  { %v4069_v53 = vpop.f32.mrf.mxu0 }
 0x4a5   :  { %v4590_v57 = vpack.c.bf16 %v4069_v53, %v4069_v53 }
 0x4a7   :  { %4719 = vst.msk [vmem:[%s9232_s3 + $0x130] sm:$0xf] %vm4642_vm2, %v4590_v57 }
 0x4a9   :  { %v4504_v34 = vpop.f32.mrf.mxu3 }
 0x4aa   :  { %v4638_v48 = vpack.c.bf16 %v4504_v34, %v4504_v34 }
 0x4ab   :  { %v4214_v7 = vpop.f32.mrf.mxu1 }
 0x4ac   :  { %4767 = vst.msk [vmem:[%s9232_s3 + $0x1f0] sm:$0xf] %vm4642_vm2, %v4638_v48  ;;  %v4606_v38 = vpack.c.bf16 %v4214_v7, %v4214_v7  ;;  %v4071_v61 = vpop.f32.mrf.mxu0 }
 0x4ad   :  { %v4591_v41 = vpack.c.bf16 %v4071_v61, %v4071_v61 }
 0x4ae   :  { %4735 = vst.msk [vmem:[%s9232_s3 + $0x170] sm:$0xf] %vm4642_vm2, %v4606_v38 }
 0x4af   :  { %4720 = vst.msk [vmem:[%s9232_s3 + $0x134] sm:$0xf] %vm4642_vm2, %v4591_v41 }
 0x4b1   :  { %v4506_v23 = vpop.f32.mrf.mxu3 }
 0x4b2   :  { %v4639_v3 = vpack.c.bf16 %v4506_v23, %v4506_v23 }
 0x4b3   :  { %v4216_v35 = vpop.f32.mrf.mxu1 }
 0x4b4   :  { %4768 = vst.msk [vmem:[%s9232_s3 + $0x1f4] sm:$0xf] %vm4642_vm2, %v4639_v3  ;;  %v4607_v54 = vpack.c.bf16 %v4216_v35, %v4216_v35 }
 0x4b6   :  { %4736 = vst.msk [vmem:[%s9232_s3 + $0x174] sm:$0xf] %vm4642_vm2, %v4607_v54 }
 0x4c3   :  { %v4364_v4 = vpop.f32.mrf.mxu2 }
 0x4c4   :  { %v4624_v58 = vpack.c.bf16 %v4364_v4, %v4364_v4  ;;  %v4509_v44 = vpop.f32.mrf.mxu3 }
 0x4c5   :  { %v4074_v45 = vpop.f32.mrf.mxu0  ;;  %v4640_v31 = vpack.c.bf16 %v4509_v44, %v4509_v44 }
 0x4c6   :  { %4753 = vst.msk [vmem:[%s9232_s3 + $0x1b8] sm:$0xf] %vm4642_vm2, %v4624_v58  ;;  %v4592_v17 = vpack.c.bf16 %v4074_v45, %v4074_v45 }
 0x4c7   :  { %4769 = vst.msk [vmem:[%s9232_s3 + $0x1f8] sm:$0xf] %vm4642_vm2, %v4640_v31 }
 0x4c8   :  { %4721 = vst.msk [vmem:[%s9232_s3 + $0x138] sm:$0xf] %vm4642_vm2, %v4592_v17 }
 0x4cb   :  { %v4366_v25 = vpop.f32.mrf.mxu2 }
 0x4cc   :  { %v4625_v0 = vpack.c.bf16 %v4366_v25, %v4366_v25  ;;  %v4511_v33 = vpop.f32.mrf.mxu3 }
 0x4cd   :  { %v4076_v15 = vpop.f32.mrf.mxu0  ;;  %v4219_v30 = vpop.f32.mrf.mxu1  ;;  %v4641_v63 = vpack.c.bf16 %v4511_v33, %v4511_v33 }
 0x4ce   :  { %4754 = vst.msk [vmem:[%s9232_s3 + $0x1bc] sm:$0xf] %vm4642_vm2, %v4625_v0  ;;  %v4593_v28 = vpack.c.bf16 %v4076_v15, %v4076_v15  ;;  %v4608_v29 = vpack.c.bf16 %v4219_v30, %v4219_v30 }
 0x4cf   :  { %4770 = vst.msk [vmem:[%s9232_s3 + $0x1fc] sm:$0xf] %vm4642_vm2, %v4641_v63 }
 0x4d0   :  { %4722 = vst.msk [vmem:[%s9232_s3 + $0x13c] sm:$0xf] %vm4642_vm2, %v4593_v28 }
 0x4d1   :  { %4737 = vst.msk [vmem:[%s9232_s3 + $0x178] sm:$0xf] %vm4642_vm2, %v4608_v29 }
 0x4d5   :  { %v4221_v43 = vpop.f32.mrf.mxu1 }
 0x4d6   :  { %v4609_v56 = vpack.c.bf16 %v4221_v43, %v4221_v43 }
 0x4d8   :  { %4738 = vst.msk [vmem:[%s9232_s3 + $0x17c] sm:$0xf] %vm4642_vm2, %v4609_v56 }

// kernel: decoder_layer.15
= control target key start
LH: loop header
LB: loop body
LE: loop exit
PB: predicated region body
PF: predicated region fallthrough
CT: control target
= control target key end

     0   :  { %s373_s0 = inlined_call_operand.vmem [shape: f32[16,32], index: 0, kind: input, shape index: {}]   ;;  %s374_s1 = inlined_call_operand.vmem [shape: bf16[32,64], index: 1, kind: input, shape index: {}]   ;;  %s375_s2 = inlined_call_operand.vmem [shape: f32[1,64], index: 2, kind: input, shape index: {}]   ;;  %s376_s3 = inlined_call_operand.vmem [shape: bf16[64,32], index: 3, kind: input, shape index: {}]   ;;  %s377_s4 = inlined_call_operand.vmem [shape: f32[1,32], index: 4, kind: input, shape index: {}]   ;;  %s378_s5 = inlined_call_operand.vmem [shape: f32[1,32], index: 5, kind: input, shape index: {}]   ;;  %s379_s6 = inlined_call_operand.vmem [shape: f32[1,32], index: 6, kind: input, shape index: {}]   ;;  %s380_s7 = inlined_call_operand.hbm [shape: f32[16,32], index: 7, kind: output, shape index: {}]  }
   0x1   :  { %v238_v0 = vld [vmem:[%s374_s1 + $0x8] sm:$0xff]  ;;  %v237_v1 = vld [vmem:[%s374_s1] sm:$0xff] }
   0x2   :  { %v28_v2 = vld [vmem:[%s373_s0] sm:$0xff]  ;;  %v29_v3 = vld [vmem:[%s373_s0 + $0x8] sm:$0xff]  ;;  %61 = vmatpush.bf16.msra.mxu0 %v238_v0 }
   0x3   :  { %12 = vsyncpa [#allocation3], 0  ;;  %v30_v4 = vpack.c.bf16 %v29_v3, %v28_v2  ;;  %vm51_vm0 = vcmask 261120   ;;  %v242_v5 = vld [vmem:[%s376_s3 + $0x18] sm:$0xff]  ;;  %v241_v6 = vld [vmem:[%s376_s3 + $0x10] sm:$0xff]  ;;  %vm108_vm1 = vcmask 523264  }
   0x4   :  { %116 = vmatpush.bf16.msra.mxu1 %v242_v5  ;;  %v240_v7 = vld [vmem:[%s376_s3 + $0x8] sm:$0xff]  ;;  %v239_v8 = vld [vmem:[%s376_s3] sm:$0xff]  ;;  %v283_v26 = vmov 32.0   ;;  %s199_s23 = sshll.u32 %s380_s7, 4  ;;  %s286_s24 = smov 8   ;;  %s200_s23 = int_to_ptr.hbm [resolvable:$true] %s199_s23 }
   0x5   :  { %v247_v10 = vld [vmem:[%s375_s2] ss:$0 sm:$0xff]  ;;  %251 = vrcp.f32 %v283_v26 }
   0x6   :  { %62 = vmatpush.bf16.msra.mxu0 %v237_v1  ;;  %v248_v17 = vld [vmem:[%s377_s4] ss:$0 sm:$0xff] }
   0x7   :  { %v249_v57 = vld [vmem:[%s378_s5] ss:$0 sm:$0xff]  ;;  %s284_s5 = smov [#allocation2]  }
   0x8   :  { %117 = vmatpush.bf16.msra.mxu1 %v241_v6  ;;  %v250_v61 = vld [vmem:[%s379_s6] ss:$0 sm:$0xff]  ;;  %s197_s20 = sshll.u32 %s284_s5, 4  ;;  %s285_s6 = smov 128   ;;  %s198_s20 = int_to_ptr.vmem [resolvable:$true] %s197_s20 }
   0x9   :  { %219 = vmatmul.msk.bf16.vlgmr.msra.gmra.mxu0 %vm51_vm0, %v30_v4 }
   0xb   :  { %v252_v27 = vpop.eup %251 }
   0xc   :  { %118 = vmatpush.bf16.msra.mxu1 %v240_v7  ;;  %v137_v28 = vmul.f32 32.0, %v252_v27  ;;  %vm141_vm2 = vweird.f32 %v252_v27 }
   0xe   :  { %v138_v29 = vsub.f32 1.0, %v137_v28 }
  0x10   :  { %119 = vmatpush.bf16.msra.mxu1 %v239_v8  ;;  %v139_v30 = vmul.f32 %v252_v27, %v138_v29 }
  0x12   :  { %v140_v31 = vadd.f32 %v252_v27, %v139_v30 }
  0x14   :  { %v142_v32 = vsel %vm141_vm2, %v252_v27, %v140_v31 }
  0x86   :  { %v64_v9 = vpop.f32.mrf.mxu0 }
  0x87   :  { %v65_v11 = vadd.f32 %v247_v10, %v64_v9 }
  0x89   :  { %v69_v14 = vmax.f32 %v65_v11, 0.0 }
  0x8e   :  { %v66_v12 = vpop.f32.mrf.mxu0 }
  0x8f   :  { %v67_v13 = vadd.f32 %v247_v10, %v66_v12 }
  0x91   :  { %v70_v15 = vmax.f32 %v67_v13, 0.0 }
  0x93   :  { %v71_v16 = vpack.c.bf16 %v70_v15, %v69_v14 }
  0x95   :  { %236 = vmatmul.msk.bf16.vlgmr.msra.gmra.mxu1 %vm108_vm1, %v71_v16 }
 0x112   :  { %v121_v18 = vpop.f32.mrf.mxu1 }
 0x113   :  { %v122_v19 = vadd.f32 %v248_v17, %v121_v18 }
 0x115   :  { %v126_v20 = vadd.f32 %v122_v19, %v28_v2 }
 0x117   :  { %v130_v21 = vsel %vm51_vm0, %v126_v20, 0.0 }
 0x118   :  { %131 = vadd.xlane.f32.xlu0 %v130_v21 }
 0x11a   :  { %v123_v22 = vpop.f32.mrf.mxu1 }
 0x11b   :  { %v124_v23 = vadd.f32 %v248_v17, %v123_v22 }
 0x11d   :  { %v127_v24 = vadd.f32 %v124_v23, %v29_v3 }
 0x11f   :  { %v133_v25 = vsel %vm51_vm0, %v127_v24, 0.0 }
 0x120   :  { %134 = vadd.xlane.f32.xlu0 %v133_v25 }
 0x18b   :  { %v132_v33 = vpop.xlane.xlu0 %131 }
 0x18c   :  { %v143_v34 = vmul.f32 %v142_v32, %v132_v33 }
 0x18e   :  { %v145_v35 = vsub.f32 %v126_v20, %v143_v34 }
 0x190   :  { %v147_v36 = vmul.f32 %v145_v35, %v145_v35 }
 0x192   :  { %v149_v37 = vsel %vm51_vm0, %v147_v36, 0.0 }
 0x193   :  { %150 = vadd.xlane.f32.xlu1 %v149_v37  ;;  %v135_v38 = vpop.xlane.xlu0 %134 }
 0x194   :  { %v144_v39 = vmul.f32 %v142_v32, %v135_v38 }
 0x196   :  { %v146_v40 = vsub.f32 %v127_v24, %v144_v39 }
 0x198   :  { %v148_v41 = vmul.f32 %v146_v40, %v146_v40 }
 0x19a   :  { %v152_v42 = vsel %vm51_vm0, %v148_v41, 0.0 }
 0x19b   :  { %153 = vadd.xlane.f32.xlu1 %v152_v42 }
 0x206   :  { %v151_v43 = vpop.xlane.xlu1 %150 }
 0x207   :  { %v155_v44 = vmul.f32 %v151_v43, %v142_v32 }
 0x209   :  { %v157_v45 = vadd.f32 1e-05, %v155_v44 }
 0x20b   :  { %253 = vrsqrt.f32 %v157_v45  ;;  %vm165_vm4 = vweird.f32 %v157_v45 }
 0x20e   :  { %v154_v46 = vpop.xlane.xlu1 %153 }
 0x20f   :  { %v156_v47 = vmul.f32 %v154_v46, %v142_v32 }
 0x211   :  { %v254_v48 = vpop.eup %253  ;;  %v158_v49 = vadd.f32 1e-05, %v156_v47 }
 0x212   :  { %v160_v50 = vmul.f32 %v254_v48, %v157_v45  ;;  %vm166_vm3 = vweird.f32 %v254_v48 }
 0x213   :  { %255 = vrsqrt.f32 %v158_v49  ;;  %vm167_vm5 = vmor %vm165_vm4, %vm166_vm3  ;;  %vm175_vm7 = vweird.f32 %v158_v49 }
 0x214   :  { %v161_v51 = vmul.f32 %v254_v48, %v160_v50 }
 0x216   :  { %v162_v52 = vmul.f32 0.5, %v161_v51 }
 0x218   :  { %v163_v53 = vsub.f32 1.5, %v162_v52 }
 0x219   :  { %v256_v54 = vpop.eup %255 }
 0x21a   :  { %v164_v55 = vmul.f32 %v254_v48, %v163_v53  ;;  %v170_v56 = vmul.f32 %v256_v54, %v158_v49  ;;  %vm176_vm6 = vweird.f32 %v256_v54 }
 0x21b   :  { %vm177_vm8 = vmor %vm175_vm7, %vm176_vm6 }
 0x21c   :  { %v168_v58 = vsel %vm167_vm5, %v254_v48, %v164_v55  ;;  %v171_v59 = vmul.f32 %v256_v54, %v170_v56 }
 0x21d   :  { %v179_v60 = vmul.f32 %v168_v58, %v145_v35 }
 0x21e   :  { %v172_v62 = vmul.f32 0.5, %v171_v59 }
 0x21f   :  { %v184_v63 = vmul.f32 %v249_v57, %v179_v60 }
 0x220   :  { %v173_v0 = vsub.f32 1.5, %v172_v62 }
 0x221   :  { %v189_v1 = vadd.f32 %v250_v61, %v184_v63 }
 0x222   :  { %v174_v2 = vmul.f32 %v256_v54, %v173_v0 }
 0x223   :  { %191 = vst.msk [vmem:[#allocation2] sm:$0xff] %vm51_vm0, %v189_v1 }
 0x224   :  { %v178_v3 = vsel %vm177_vm8, %v256_v54, %v174_v2 }
 0x225   :  { %v180_v4 = vmul.f32 %v178_v3, %v146_v40 }
 0x227   :  { %v185_v5 = vmul.f32 %v249_v57, %v180_v4 }
 0x229   :  { %v190_v6 = vadd.f32 %v250_v61, %v185_v5 }
 0x22b   :  { %192 = vst.msk [vmem:[#allocation2 + $0x8] sm:$0xff] %vm51_vm0, %v190_v6 }
 0x22c   :  { %205 = dma.vmem_to_hbm [thread:$0]  %s198_s20, 256, %s200_s23, [#allocation3], %s285_s6, %s285_s6, %s286_s24  }
 0x22d   :  { %281 = dma.done.wait [#allocation3], 256  }
 0x22e   :  { %282 = vsyncadd [#allocation3], 4294967040 }
 0x22f   :  { %210 = vsyncpa [#allocation3], 1 }

</bundles_post_ra>
